<compile_context>
chip_gen: v7x
topology: tpu7x:2x2x1
jax: 0.10.0
libtpu: 0.0.40
codegen_flags: <defaults>
</compile_context>

<pallas_src>
import functools

import jax
import jax.numpy as jnp
from jax import lax
from jax.experimental import pallas as pl
from jax.experimental.pallas import tpu as pltpu


# ---------------------------------------------------------------------------
# in-kernel helpers (operate on values / refs inside Pallas kernels)
# ---------------------------------------------------------------------------
def _hardswish(y):
    return y * jnp.clip(y + 3.0, 0.0, 6.0) * (1.0 / 6.0)


def _sigmoid(y):
    return 1.0 / (1.0 + jnp.exp(-y))


def _relu(y):
    return jnp.maximum(y, 0.0)


def _mm(x, w, b=None):
    """MXU matmul: f32 activation x bf16 weight -> f32 accumulate (+ optional bias)."""
    y = jnp.dot(x.astype(jnp.bfloat16), w, preferred_element_type=jnp.float32)
    if b is not None:
        y = y + b
    return y


def _dw_relu_s1(pad_ref, w_ref, b, *, k, ho, wo):
    """Depthwise kxk conv (stride 1) on a zero-padded VMEM scratch, + bias + ReLU.
       pad_ref: (Hp, Wp, C) scratch ref; w_ref: (k*k, C) ref; b: (1, C) value or None."""
    c = w_ref.shape[1]
    acc = jnp.zeros((ho, wo, c), jnp.float32)
    for i in range(k):
        for j in range(k):
            acc = acc + pad_ref[i:i + ho, j:j + wo, :] * w_ref[i * k + j:i * k + j + 1, :]
    if b is not None:
        acc = acc + b
    return _relu(acc)


def _dw_relu_s2(pad_ref, out_ref, w_ref, b, *, k, ho, wo):
    """Depthwise kxk conv (stride 2) + bias + ReLU, computed fully in-kernel.
       For each output row, unit-stride taps build the stride-1 row, then a tiny 0/1
       selection matmul (MXU) keeps every 2nd column. Rows are written into out_ref,
       shaped (ho*wo, C)."""
    c = w_ref.shape[1]
    wp = pad_ref.shape[1]
    wf = wp - k + 1                          # stride-1 output width
    q = lax.broadcasted_iota(jnp.int32, (wo, wf), 0)
    xi = lax.broadcasted_iota(jnp.int32, (wo, wf), 1)
    sel = (xi == 2 * q).astype(jnp.float32)  # (wo, wf) one-hot column selector
    for p in range(ho):
        acc = jnp.zeros((wf, c), jnp.float32)
        for i in range(k):
            r = 2 * p + i
            for j in range(k):
                acc = acc + pad_ref[r, j:j + wf, :] * w_ref[i * k + j:i * k + j + 1, :]
        acc = jnp.dot(sel, acc, preferred_element_type=jnp.float32)   # (wo, c)
        if b is not None:
            acc = acc + b
        out_ref[p * wo:(p + 1) * wo, :] = _relu(acc)


# ---------------------------------------------------------------------------
# Pallas kernel 1: fused "head"  (features[0] .. features[17])
# ---------------------------------------------------------------------------
def _head_kernel(patches_ref, c0w, c0b, c1w, c1b, sw1, sb1, sw2, sb2,
                 c2w, c2b, c3w, c4w, c5w, c6w, c7w, c8w,
                 o_ref, pad1, dwo1, pad2, dwo2, pad3,
                 *, h0, w0, h1, w1, h4, w4):
    # features[0..1]: 3x3 s=2 stem conv (im2col matmul) + Hardswish
    x = _hardswish(_mm(patches_ref[0], c0w[...], c0b[...]))             # (h0*w0, 16)

    # features[2..3]: depthwise 3x3 s=2 p=1 (bias) + ReLU; padding folded into scratch
    pad1[...] = jnp.zeros_like(pad1)
    pad1[1:1 + h0, 1:1 + w0, :] = x.reshape(h0, w0, 16)
    _dw_relu_s2(pad1, dwo1, c1w, c1b[...], k=3, ho=h1, wo=w1)
    x = dwo1[...]                                                       # (h1*w1, 16)

    # features[4]: SqueezeExcitation(16, 8): avgpool -> fc1+ReLU -> fc2+Sigmoid -> scale
    s = jnp.mean(x, axis=0, keepdims=True)                              # (1, 16)
    s = _relu(_mm(s, sw1[...], sb1[...]))
    s = _sigmoid(_mm(s, sw2[...], sb2[...]))
    x = x * s

    # features[5]: 1x1 conv 16->16 (bias, no activation)
    x = _mm(x, c2w[...], c2b[...])

    # features[6..7]: 1x1 conv 16->72, padding=1, no bias, + ReLU.
    # Border of a bias-free 1x1 conv is 0 after ReLU, so we write the interior into a
    # zeroed scratch whose outer ring is also the following dw-conv's pad=1 halo.
    x = _relu(_mm(x, c3w[...]))                                         # (h1*w1, 72)
    pad2[...] = jnp.zeros_like(pad2)
    pad2[2:2 + h1, 2:2 + w1, :] = x.reshape(h1, w1, 72)

    # features[8..9]: depthwise 3x3 s=2 p=1 (no bias) + ReLU
    _dw_relu_s2(pad2, dwo2, c4w, None, k=3, ho=h4, wo=w4)
    x = dwo2[...]                                                       # (h4*w4, 72)

    # features[10..13]: 1x1 72->24 + ReLU, 1x1 24->88 + ReLU
    x = _relu(_mm(x, c5w[...]))
    x = _relu(_mm(x, c6w[...]))                                         # (h4*w4, 88)

    # features[14..15]: depthwise 3x3 s=1 p=1 (no bias) + ReLU
    pad3[...] = jnp.zeros_like(pad3)
    pad3[1:1 + h4, 1:1 + w4, :] = x.reshape(h4, w4, 88)
    x = _dw_relu_s1(pad3, c7w, None, k=3, ho=h4, wo=w4).reshape(h4 * w4, 88)

    # features[16..17]: 1x1 88->24 + ReLU
    x = _relu(_mm(x, c8w[...]))
    o_ref[0] = x.reshape(h4, w4, 24)


# ---------------------------------------------------------------------------
# Pallas kernel 2: fused InvertedResidual  (expand + dw 5x5 + project + residual)
# ---------------------------------------------------------------------------
def _ir_kernel(x_ref, we, be, wd, bd, wpj, bpj, o_ref, pad_scr, dwo_scr,
               *, h, w, ho, wo, stride, resnet):
    cin = x_ref.shape[-1]
    e = we.shape[-1]
    cout = wpj.shape[-1]

    x = x_ref[0].reshape(h * w, cin)
    # expand 1x1 (bias) + Hardswish
    y = _hardswish(_mm(x, we[...], be[...]))                            # (h*w, e)
    # depthwise 5x5 pad=2 (bias) + ReLU; padding folded into scratch
    pad_scr[...] = jnp.zeros_like(pad_scr)
    pad_scr[2:2 + h, 2:2 + w, :] = y.reshape(h, w, e)
    if stride == 1:
        d = _dw_relu_s1(pad_scr, wd, bd[...], k=5, ho=ho, wo=wo).reshape(ho * wo, e)
    else:
        _dw_relu_s2(pad_scr, dwo_scr, wd, bd[...], k=5, ho=ho, wo=wo)
        d = dwo_scr[...]
    # project 1x1 (bias), fused residual add
    out = _mm(d, wpj[...], bpj[...])                                    # (ho*wo, cout)
    if resnet:
        out = out + x
    o_ref[0] = out.reshape(ho, wo, cout)


# ---------------------------------------------------------------------------
# Pallas kernel 3: fused "tail"  (final 1x1 conv + Hardswish + avgpool + classifier)
# ---------------------------------------------------------------------------
def _tail_kernel(x_ref, w9, b9, wf1, bf1, wf2, bf2, o_ref, *, hw):
    c = x_ref.shape[-1]
    x = x_ref[0].reshape(hw, c)
    # features[26..27]: 1x1 conv 48->288 (bias) + Hardswish
    y = _hardswish(_mm(x, w9[...], b9[...]))                            # (hw, 288)
    # AdaptiveAvgPool2d(1) + flatten
    m = jnp.mean(y, axis=0, keepdims=True)                              # (1, 288)
    # classifier: Linear(288,16) + Hardswish + Dropout + Linear(16, nc)
    z = _hardswish(_mm(m, wf1[...], bf1[...]))
    # TODO(synk): torch.nn.Dropout(p=0.2) is treated as identity (inference/eval mode).
    o_ref[0] = _mm(z, wf2[...], bf2[...])                               # (1, nc)


# ---------------------------------------------------------------------------
# wrappers (pallas_call construction)
# ---------------------------------------------------------------------------
def _wspec(arr):
    nd = arr.ndim
    return pl.BlockSpec(arr.shape, lambda i, _n=nd: (0,) * _n)


def _parallel_params():
    return pltpu.CompilerParams(dimension_semantics=("parallel",))


def _stem_patches(x_nhwc):
    """im2col for the 3x3 stride-2 pad-1 stem conv (tiny one-time JAX glue on the input)."""
    n, h, w, c = x_nhwc.shape
    xp = jnp.pad(x_nhwc, ((0, 0), (1, 1), (1, 1), (0, 0)))
    h0 = (h - 1) // 2 + 1
    w0 = (w - 1) // 2 + 1
    cols = []
    for i in range(3):
        for j in range(3):
            cols.append(xp[:, i:i + 2 * (h0 - 1) + 1:2, j:j + 2 * (w0 - 1) + 1:2, :])
    patches = jnp.stack(cols, axis=3)                    # (N, h0, w0, 9, C)
    return patches.reshape(n, h0 * w0, 9 * c), h0, w0


def _head_call(patches, P, h0, w0):
    n = patches.shape[0]
    kp = patches.shape[-1]
    h1 = (h0 - 1) // 2 + 1
    w1 = (w0 - 1) // 2 + 1
    h4 = (h1 + 1) // 2 + 1
    w4 = (w1 + 1) // 2 + 1
    weights = [P["c0_w"], P["c0_b"], P["c1_w"], P["c1_b"],
               P["se0"]["w1"], P["se0"]["b1"], P["se0"]["w2"], P["se0"]["b2"],
               P["c2_w"], P["c2_b"], P["c3_w"], P["c4_w"],
               P["c5_w"], P["c6_w"], P["c7_w"], P["c8_w"]]
    kern = functools.partial(_head_kernel, h0=h0, w0=w0, h1=h1, w1=w1, h4=h4, w4=w4)
    return pl.pallas_call(
        kern,
        grid=(n,),
        in_specs=[pl.BlockSpec((1, h0 * w0, kp), lambda i: (i, 0, 0))]
        + [_wspec(a) for a in weights],
        out_specs=pl.BlockSpec((1, h4, w4, 24), lambda i: (i, 0, 0, 0)),
        out_shape=jax.ShapeDtypeStruct((n, h4, w4, 24), jnp.float32),
        scratch_shapes=[
            pltpu.VMEM((h0 + 2, w0 + 2, 16), jnp.float32),   # dw c1 padded input
            pltpu.VMEM((h1 * w1, 16), jnp.float32),          # dw c1 output rows
            pltpu.VMEM((h1 + 4, w1 + 4, 72), jnp.float32),   # conv3 pad=1 ring + dw c4 halo
            pltpu.VMEM((h4 * w4, 72), jnp.float32),          # dw c4 output rows
            pltpu.VMEM((h4 + 2, w4 + 2, 88), jnp.float32),   # dw c7 padded input
        ],
        compiler_params=_parallel_params(),
    )(patches, *weights)


def _ir_call(x, p):
    n, h, w, cin = x.shape
    e = p["we"].shape[1]
    cout = p["wp"].shape[1]
    s = p["stride"]
    ho = (h - 1) // s + 1        # (h + 2*2 - 5)//s + 1
    wo = (w - 1) // s + 1
    weights = [p["we"], p["be"], p["wd"], p["bd"], p["wp"], p["bp"]]
    kern = functools.partial(_ir_kernel, h=h, w=w, ho=ho, wo=wo,
                             stride=s, resnet=p["resnet"])
    return pl.pallas_call(
        kern,
        grid=(n,),
        in_specs=[pl.BlockSpec((1, h, w, cin), lambda i: (i, 0, 0, 0))]
        + [_wspec(a) for a in weights],
        out_specs=pl.BlockSpec((1, ho, wo, cout), lambda i: (i, 0, 0, 0)),
        out_shape=jax.ShapeDtypeStruct((n, ho, wo, cout), jnp.float32),
        scratch_shapes=[
            pltpu.VMEM((h + 4, w + 4, e), jnp.float32),      # padded expanded activation
            pltpu.VMEM((ho * wo, e), jnp.float32),           # strided dw output rows
        ],
        compiler_params=_parallel_params(),
    )(x, *weights)


def _tail_call(x, P):
    n, h, w, c = x.shape
    nc = P["fc2_w"].shape[1]
    weights = [P["c9_w"], P["c9_b"], P["fc1_w"], P["fc1_b"], P["fc2_w"], P["fc2_b"]]
    kern = functools.partial(_tail_kernel, hw=h * w)
    out = pl.pallas_call(
        kern,
        grid=(n,),
        in_specs=[pl.BlockSpec((1, h, w, c), lambda i: (i, 0, 0, 0))]
        + [_wspec(a) for a in weights],
        out_specs=pl.BlockSpec((1, 1, nc), lambda i: (i, 0, 0)),
        out_shape=jax.ShapeDtypeStruct((n, 1, nc), jnp.float32),
        compiler_params=_parallel_params(),
    )(x, *weights)
    return out[:, 0, :]


# ---------------------------------------------------------------------------
# deterministic parameter init (shapes follow MobileNetV3Small.__init__)
# ---------------------------------------------------------------------------
class _Init:
    def __init__(self, seed):
        self.key = jax.random.PRNGKey(seed)

    def __call__(self, shape, fan_in):
        self.key, k = jax.random.split(self.key)
        return jax.random.normal(k, shape, jnp.float32) / jnp.sqrt(float(fan_in))


def init_params(*, in_channels=3, num_classes=10, seed=1):
    init = _Init(seed)

    def mw(k_in, n_out):                       # matmul / 1x1-conv weight, bf16 for the MXU
        return init((k_in, n_out), k_in).astype(jnp.bfloat16)

    def bias(n):                               # (1, n) f32
        return init((1, n), n)

    def dw(k, c):                              # depthwise weight, taps flattened, f32 (VPU)
        return init((k * k, c), k * k)

    P = {}
    # features[0]: Conv2d(in, 16, 3, s=2, p=1, bias=True) + Hardswish
    P["c0_w"] = mw(9 * in_channels, 16); P["c0_b"] = bias(16)
    # features[2]: depthwise Conv2d(16,16,3,s=2,p=1,bias=True) + ReLU
    P["c1_w"] = dw(3, 16); P["c1_b"] = bias(16)
    # features[4]: SqueezeExcitation(16, 8)
    P["se0"] = dict(w1=mw(16, 8), b1=bias(8), w2=mw(8, 16), b2=bias(16))
    # features[5]: Conv2d(16,16,1,bias=True)
    P["c2_w"] = mw(16, 16); P["c2_b"] = bias(16)
    # features[6]: Conv2d(16,72,1,padding=1,bias=False) + ReLU
    P["c3_w"] = mw(16, 72)
    # features[8]: depthwise Conv2d(72,72,3,s=2,p=1,bias=False) + ReLU
    P["c4_w"] = dw(3, 72)
    # features[10]: Conv2d(72,24,1,bias=False) + ReLU
    P["c5_w"] = mw(72, 24)
    # features[12]: Conv2d(24,88,1,bias=False) + ReLU
    P["c6_w"] = mw(24, 88)
    # features[14]: depthwise Conv2d(88,88,3,s=1,p=1,bias=False) + ReLU
    P["c7_w"] = dw(3, 88)
    # features[16]: Conv2d(88,24,1,bias=False) + ReLU
    P["c8_w"] = mw(88, 24)
    # InvertedResidual blocks: (in, expand, out, stride, resnet); k=5, pad=2, Hardswish expand
    ir_cfg = [
        (24, 96, 40, 2, False),
        (40, 240, 40, 1, True),
        (40, 240, 40, 1, True),
        (40, 128, 48, 1, False),
        (48, 144, 48, 1, True),
        (48, 288, 48, 2, False),
        (48, 288, 48, 1, True),
        (48, 288, 48, 1, True),
    ]
    P["irs"] = [dict(we=mw(cin, e), be=bias(e),
                     wd=dw(5, e), bd=bias(e),
                     wp=mw(e, cout), bp=bias(cout),
                     stride=s, resnet=res)
                for cin, e, cout, s, res in ir_cfg]
    # features[26]: Conv2d(48,288,1,bias=True) + Hardswish
    P["c9_w"] = mw(48, 288); P["c9_b"] = bias(288)
    # classifier
    P["fc1_w"] = mw(288, 16); P["fc1_b"] = bias(16)
    P["fc2_w"] = mw(16, num_classes); P["fc2_b"] = bias(num_classes)
    return P


# ---------------------------------------------------------------------------
# full forward pass (matches MobileNetV3Small.forward semantics)
# ---------------------------------------------------------------------------
def mobilenet_v3_small_forward(x_nchw, P):
    x = jnp.transpose(x_nchw, (0, 2, 3, 1)).astype(jnp.float32)   # NCHW -> NHWC
    patches, h0, w0 = _stem_patches(x)          # one-time, tiny im2col for the stem conv
    y = _head_call(patches, P, h0, w0)          # fused features[0..17]
    for irp in P["irs"]:
        y = _ir_call(y, irp)                    # fused expand + dw + project (+ residual)
    return _tail_call(y, P)                     # fused final conv + avgpool + classifier


# ---------------------------------------------------------------------------
if __name__ == "__main__":
    key = jax.random.PRNGKey(0)
    # small, MobileNet-consistent input: batch=2, 3 channels, 32x32, NCHW like PyTorch
    x = jax.random.normal(key, (2, 3, 32, 32), jnp.float32)
    params = init_params(in_channels=3, num_classes=10, seed=1)

    out = mobilenet_v3_small_forward(x, params)
    out = jax.block_until_ready(out)

    assert out.shape == (2, 10), out.shape
    assert bool(jnp.all(jnp.isfinite(out)))
    print("KERNEL_OK")
</pallas_src>

<mosaic_0001>
module attributes {stable_mosaic.version = 11 : i64} {
  func.func @_head_kernel(%arg0: i32, %arg1: memref<1x256x27xf32, #tpu.memory_space<vmem>>, %arg2: memref<27x16xbf16, #tpu.memory_space<vmem>>, %arg3: memref<1x16xf32, #tpu.memory_space<vmem>>, %arg4: memref<9x16xf32, #tpu.memory_space<vmem>>, %arg5: memref<1x16xf32, #tpu.memory_space<vmem>>, %arg6: memref<16x8xbf16, #tpu.memory_space<vmem>>, %arg7: memref<1x8xf32, #tpu.memory_space<vmem>>, %arg8: memref<8x16xbf16, #tpu.memory_space<vmem>>, %arg9: memref<1x16xf32, #tpu.memory_space<vmem>>, %arg10: memref<16x16xbf16, #tpu.memory_space<vmem>>, %arg11: memref<1x16xf32, #tpu.memory_space<vmem>>, %arg12: memref<16x72xbf16, #tpu.memory_space<vmem>>, %arg13: memref<9x72xf32, #tpu.memory_space<vmem>>, %arg14: memref<72x24xbf16, #tpu.memory_space<vmem>>, %arg15: memref<24x88xbf16, #tpu.memory_space<vmem>>, %arg16: memref<9x88xf32, #tpu.memory_space<vmem>>, %arg17: memref<88x24xbf16, #tpu.memory_space<vmem>>, %arg18: memref<1x5x5x24xf32, #tpu.memory_space<vmem>>, %arg19: memref<18x18x16xf32, #tpu.memory_space<vmem>>, %arg20: memref<64x16xf32, #tpu.memory_space<vmem>>, %arg21: memref<12x12x72xf32, #tpu.memory_space<vmem>>, %arg22: memref<25x72xf32, #tpu.memory_space<vmem>>, %arg23: memref<7x7x88xf32, #tpu.memory_space<vmem>>) attributes {dimension_semantics = [#tpu.dimension_semantics<parallel>], iteration_bounds = array<i64: 2>, scalar_prefetch = 0 : i64, scratch_operands = 5 : i64, tpu.core_type = #tpu.core_type<tc>, window_params = [{transform_indices = @transform_0, window_bounds = array<i64: 1, 256, 27>}, {pipeline_mode = #tpu.pipeline_mode<synchronous>, transform_indices = @transform_1, window_bounds = array<i64: 27, 16>}, {pipeline_mode = #tpu.pipeline_mode<synchronous>, transform_indices = @transform_2, window_bounds = array<i64: 1, 16>}, {pipeline_mode = #tpu.pipeline_mode<synchronous>, transform_indices = @transform_3, window_bounds = array<i64: 9, 16>}, {pipeline_mode = #tpu.pipeline_mode<synchronous>, transform_indices = @transform_4, window_bounds = array<i64: 1, 16>}, {pipeline_mode = #tpu.pipeline_mode<synchronous>, transform_indices = @transform_5, window_bounds = array<i64: 16, 8>}, {pipeline_mode = #tpu.pipeline_mode<synchronous>, transform_indices = @transform_6, window_bounds = array<i64: 1, 8>}, {pipeline_mode = #tpu.pipeline_mode<synchronous>, transform_indices = @transform_7, window_bounds = array<i64: 8, 16>}, {pipeline_mode = #tpu.pipeline_mode<synchronous>, transform_indices = @transform_8, window_bounds = array<i64: 1, 16>}, {pipeline_mode = #tpu.pipeline_mode<synchronous>, transform_indices = @transform_9, window_bounds = array<i64: 16, 16>}, {pipeline_mode = #tpu.pipeline_mode<synchronous>, transform_indices = @transform_10, window_bounds = array<i64: 1, 16>}, {pipeline_mode = #tpu.pipeline_mode<synchronous>, transform_indices = @transform_11, window_bounds = array<i64: 16, 72>}, {pipeline_mode = #tpu.pipeline_mode<synchronous>, transform_indices = @transform_12, window_bounds = array<i64: 9, 72>}, {pipeline_mode = #tpu.pipeline_mode<synchronous>, transform_indices = @transform_13, window_bounds = array<i64: 72, 24>}, {pipeline_mode = #tpu.pipeline_mode<synchronous>, transform_indices = @transform_14, window_bounds = array<i64: 24, 88>}, {pipeline_mode = #tpu.pipeline_mode<synchronous>, transform_indices = @transform_15, window_bounds = array<i64: 9, 88>}, {pipeline_mode = #tpu.pipeline_mode<synchronous>, transform_indices = @transform_16, window_bounds = array<i64: 88, 24>}, {transform_indices = @transform_17, window_bounds = array<i64: 1, 5, 5, 24>}]} {
    %c0 = arith.constant 0 : index
    %c0_0 = arith.constant 0 : index
    %c0_1 = arith.constant 0 : index
    %0 = vector.load %arg1[%c0, %c0_0, %c0_1] : memref<1x256x27xf32, #tpu.memory_space<vmem>>, vector<1x256x27xf32>
    %1 = vector.shape_cast %0 : vector<1x256x27xf32> to vector<256x27xf32>
    %c0_2 = arith.constant 0 : index
    %c0_3 = arith.constant 0 : index
    %2 = vector.load %arg2[%c0_2, %c0_3] : memref<27x16xbf16, #tpu.memory_space<vmem>>, vector<27x16xbf16>
    %c0_4 = arith.constant 0 : index
    %c0_5 = arith.constant 0 : index
    %3 = vector.load %arg3[%c0_4, %c0_5] : memref<1x16xf32, #tpu.memory_space<vmem>>, vector<1x16xf32>
    %4 = arith.truncf %1 : vector<256x27xf32> to vector<256x27xbf16>
    %cst = arith.constant dense<0.000000e+00> : vector<256x16xf32>
    %5 = tpu.matmul %4, %2, %cst {dimension_numbers = #tpu.dot_dimension_numbers<[1], [0], [0], [1], [0, 0, 1, 1], [], []>} : vector<256x27xbf16>, vector<27x16xbf16>, vector<256x16xf32> -> vector<256x16xf32>
    %6 = vector.broadcast %3 : vector<1x16xf32> to vector<256x16xf32>
    %7 = arith.addf %5, %6 : vector<256x16xf32>
    %cst_6 = arith.constant 3.000000e+00 : f32
    %8 = vector.broadcast %cst_6 : f32 to vector<256x16xf32>
    %9 = arith.addf %7, %8 : vector<256x16xf32>
    %cst_7 = arith.constant 0.000000e+00 : f32
    %cst_8 = arith.constant 6.000000e+00 : f32
    %10 = vector.broadcast %cst_7 : f32 to vector<256x16xf32>
    %11 = arith.maximumf %10, %9 : vector<256x16xf32>
    %12 = vector.broadcast %cst_8 : f32 to vector<256x16xf32>
    %13 = arith.minimumf %12, %11 : vector<256x16xf32>
    %14 = arith.mulf %7, %13 : vector<256x16xf32>
    %cst_9 = arith.constant 0.166666672 : f32
    %15 = vector.broadcast %cst_9 : f32 to vector<256x16xf32>
    %16 = arith.mulf %14, %15 : vector<256x16xf32>
    %cst_10 = arith.constant 0.000000e+00 : f32
    %17 = vector.broadcast %cst_10 : f32 to vector<18x18x16xf32>
    %c0_11 = arith.constant 0 : index
    %c0_12 = arith.constant 0 : index
    %c0_13 = arith.constant 0 : index
    %18 = vector.load %arg19[%c0_11, %c0_12, %c0_13] : memref<18x18x16xf32, #tpu.memory_space<vmem>>, vector<18x18x16xf32>
    tpu.vector_store %arg19[%c0_11, %c0_12, %c0_13], %17 {strides = array<i32>} : memref<18x18x16xf32, #tpu.memory_space<vmem>>, vector<18x18x16xf32>,
    %19 = vector.shape_cast %16 : vector<256x16xf32> to vector<16x16x16xf32>
    %c1 = arith.constant 1 : index
    %c1_14 = arith.constant 1 : index
    %c0_15 = arith.constant 0 : index
    %20 = vector.load %arg19[%c1, %c1_14, %c0_15] : memref<18x18x16xf32, #tpu.memory_space<vmem>>, vector<16x16x16xf32>
    tpu.vector_store %arg19[%c1, %c1_14, %c0_15], %19 {strides = array<i32>} : memref<18x18x16xf32, #tpu.memory_space<vmem>>, vector<16x16x16xf32>,
    %c0_16 = arith.constant 0 : index
    %c0_17 = arith.constant 0 : index
    %21 = vector.load %arg5[%c0_16, %c0_17] : memref<1x16xf32, #tpu.memory_space<vmem>>, vector<1x16xf32>
    %22 = tpu.iota {dimensions = array<i32: 0>} : vector<8x16xi32>
    %23 = tpu.iota {dimensions = array<i32: 1>} : vector<8x16xi32>
    %c2_i32 = arith.constant 2 : i32
    %24 = vector.broadcast %c2_i32 : i32 to vector<8x16xi32>
    %25 = arith.muli %24, %22 : vector<8x16xi32>
    %26 = arith.cmpi eq, %23, %25 : vector<8x16xi32>
    %27 = arith.extui %26 : vector<8x16xi1> to vector<8x16xi32>
    %28 = arith.sitofp %27 : vector<8x16xi32> to vector<8x16xf32>
    %cst_18 = arith.constant 0.000000e+00 : f32
    %29 = vector.broadcast %cst_18 : f32 to vector<16x16xf32>
    %c0_19 = arith.constant 0 : index
    %c0_20 = arith.constant 0 : index
    %c0_21 = arith.constant 0 : index
    %30 = vector.load %arg19[%c0_19, %c0_20, %c0_21] : memref<18x18x16xf32, #tpu.memory_space<vmem>>, vector<1x16x16xf32>
    %31 = vector.shape_cast %30 : vector<1x16x16xf32> to vector<16x16xf32>
    %c0_22 = arith.constant 0 : index
    %c0_23 = arith.constant 0 : index
    %32 = vector.load %arg4[%c0_22, %c0_23] : memref<9x16xf32, #tpu.memory_space<vmem>>, vector<1x16xf32>
    %33 = vector.broadcast %32 : vector<1x16xf32> to vector<16x16xf32>
    %34 = arith.mulf %31, %33 : vector<16x16xf32>
    %35 = arith.addf %29, %34 : vector<16x16xf32>
    %c0_24 = arith.constant 0 : index
    %c1_25 = arith.constant 1 : index
    %c0_26 = arith.constant 0 : index
    %36 = vector.load %arg19[%c0_24, %c1_25, %c0_26] : memref<18x18x16xf32, #tpu.memory_space<vmem>>, vector<1x16x16xf32>
    %37 = vector.shape_cast %36 : vector<1x16x16xf32> to vector<16x16xf32>
    %c1_27 = arith.constant 1 : index
    %c0_28 = arith.constant 0 : index
    %38 = vector.load %arg4[%c1_27, %c0_28] : memref<9x16xf32, #tpu.memory_space<vmem>>, vector<1x16xf32>
    %39 = vector.broadcast %38 : vector<1x16xf32> to vector<16x16xf32>
    %40 = arith.mulf %37, %39 : vector<16x16xf32>
    %41 = arith.addf %35, %40 : vector<16x16xf32>
    %c0_29 = arith.constant 0 : index
    %c2 = arith.constant 2 : index
    %c0_30 = arith.constant 0 : index
    %42 = vector.load %arg19[%c0_29, %c2, %c0_30] : memref<18x18x16xf32, #tpu.memory_space<vmem>>, vector<1x16x16xf32>
    %43 = vector.shape_cast %42 : vector<1x16x16xf32> to vector<16x16xf32>
    %c2_31 = arith.constant 2 : index
    %c0_32 = arith.constant 0 : index
    %44 = vector.load %arg4[%c2_31, %c0_32] : memref<9x16xf32, #tpu.memory_space<vmem>>, vector<1x16xf32>
    %45 = vector.broadcast %44 : vector<1x16xf32> to vector<16x16xf32>
    %46 = arith.mulf %43, %45 : vector<16x16xf32>
    %47 = arith.addf %41, %46 : vector<16x16xf32>
    %c1_33 = arith.constant 1 : index
    %c0_34 = arith.constant 0 : index
    %c0_35 = arith.constant 0 : index
    %48 = vector.load %arg19[%c1_33, %c0_34, %c0_35] : memref<18x18x16xf32, #tpu.memory_space<vmem>>, vector<1x16x16xf32>
    %49 = vector.shape_cast %48 : vector<1x16x16xf32> to vector<16x16xf32>
    %c3 = arith.constant 3 : index
    %c0_36 = arith.constant 0 : index
    %50 = vector.load %arg4[%c3, %c0_36] : memref<9x16xf32, #tpu.memory_space<vmem>>, vector<1x16xf32>
    %51 = vector.broadcast %50 : vector<1x16xf32> to vector<16x16xf32>
    %52 = arith.mulf %49, %51 : vector<16x16xf32>
    %53 = arith.addf %47, %52 : vector<16x16xf32>
    %c1_37 = arith.constant 1 : index
    %c1_38 = arith.constant 1 : index
    %c0_39 = arith.constant 0 : index
    %54 = vector.load %arg19[%c1_37, %c1_38, %c0_39] : memref<18x18x16xf32, #tpu.memory_space<vmem>>, vector<1x16x16xf32>
    %55 = vector.shape_cast %54 : vector<1x16x16xf32> to vector<16x16xf32>
    %c4 = arith.constant 4 : index
    %c0_40 = arith.constant 0 : index
    %56 = vector.load %arg4[%c4, %c0_40] : memref<9x16xf32, #tpu.memory_space<vmem>>, vector<1x16xf32>
    %57 = vector.broadcast %56 : vector<1x16xf32> to vector<16x16xf32>
    %58 = arith.mulf %55, %57 : vector<16x16xf32>
    %59 = arith.addf %53, %58 : vector<16x16xf32>
    %c1_41 = arith.constant 1 : index
    %c2_42 = arith.constant 2 : index
    %c0_43 = arith.constant 0 : index
    %60 = vector.load %arg19[%c1_41, %c2_42, %c0_43] : memref<18x18x16xf32, #tpu.memory_space<vmem>>, vector<1x16x16xf32>
    %61 = vector.shape_cast %60 : vector<1x16x16xf32> to vector<16x16xf32>
    %c5 = arith.constant 5 : index
    %c0_44 = arith.constant 0 : index
    %62 = vector.load %arg4[%c5, %c0_44] : memref<9x16xf32, #tpu.memory_space<vmem>>, vector<1x16xf32>
    %63 = vector.broadcast %62 : vector<1x16xf32> to vector<16x16xf32>
    %64 = arith.mulf %61, %63 : vector<16x16xf32>
    %65 = arith.addf %59, %64 : vector<16x16xf32>
    %c2_45 = arith.constant 2 : index
    %c0_46 = arith.constant 0 : index
    %c0_47 = arith.constant 0 : index
    %66 = vector.load %arg19[%c2_45, %c0_46, %c0_47] : memref<18x18x16xf32, #tpu.memory_space<vmem>>, vector<1x16x16xf32>
    %67 = vector.shape_cast %66 : vector<1x16x16xf32> to vector<16x16xf32>
    %c6 = arith.constant 6 : index
    %c0_48 = arith.constant 0 : index
    %68 = vector.load %arg4[%c6, %c0_48] : memref<9x16xf32, #tpu.memory_space<vmem>>, vector<1x16xf32>
    %69 = vector.broadcast %68 : vector<1x16xf32> to vector<16x16xf32>
    %70 = arith.mulf %67, %69 : vector<16x16xf32>
    %71 = arith.addf %65, %70 : vector<16x16xf32>
    %c2_49 = arith.constant 2 : index
    %c1_50 = arith.constant 1 : index
    %c0_51 = arith.constant 0 : index
    %72 = vector.load %arg19[%c2_49, %c1_50, %c0_51] : memref<18x18x16xf32, #tpu.memory_space<vmem>>, vector<1x16x16xf32>
    %73 = vector.shape_cast %72 : vector<1x16x16xf32> to vector<16x16xf32>
    %c7 = arith.constant 7 : index
    %c0_52 = arith.constant 0 : index
    %74 = vector.load %arg4[%c7, %c0_52] : memref<9x16xf32, #tpu.memory_space<vmem>>, vector<1x16xf32>
    %75 = vector.broadcast %74 : vector<1x16xf32> to vector<16x16xf32>
    %76 = arith.mulf %73, %75 : vector<16x16xf32>
    %77 = arith.addf %71, %76 : vector<16x16xf32>
    %c2_53 = arith.constant 2 : index
    %c2_54 = arith.constant 2 : index
    %c0_55 = arith.constant 0 : index
    %78 = vector.load %arg19[%c2_53, %c2_54, %c0_55] : memref<18x18x16xf32, #tpu.memory_space<vmem>>, vector<1x16x16xf32>
    %79 = vector.shape_cast %78 : vector<1x16x16xf32> to vector<16x16xf32>
    %c8 = arith.constant 8 : index
    %c0_56 = arith.constant 0 : index
    %80 = vector.load %arg4[%c8, %c0_56] : memref<9x16xf32, #tpu.memory_space<vmem>>, vector<1x16xf32>
    %81 = vector.broadcast %80 : vector<1x16xf32> to vector<16x16xf32>
    %82 = arith.mulf %79, %81 : vector<16x16xf32>
    %83 = arith.addf %77, %82 : vector<16x16xf32>
    %cst_57 = arith.constant dense<0.000000e+00> : vector<8x16xf32>
    %84 = tpu.matmul %28, %83, %cst_57 {dimension_numbers = #tpu.dot_dimension_numbers<[1], [0], [0], [1], [0, 0, 1, 1], [], []>} : vector<8x16xf32>, vector<16x16xf32>, vector<8x16xf32> -> vector<8x16xf32>
    %85 = vector.broadcast %21 : vector<1x16xf32> to vector<8x16xf32>
    %86 = arith.addf %84, %85 : vector<8x16xf32>
    %cst_58 = arith.constant 0.000000e+00 : f32
    %87 = vector.broadcast %cst_58 : f32 to vector<8x16xf32>
    %88 = arith.maximumf %86, %87 : vector<8x16xf32>
    %c0_59 = arith.constant 0 : index
    %c0_60 = arith.constant 0 : index
    %89 = vector.load %arg20[%c0_59, %c0_60] : memref<64x16xf32, #tpu.memory_space<vmem>>, vector<8x16xf32>
    tpu.vector_store %arg20[%c0_59, %c0_60], %88 {strides = array<i32>} : memref<64x16xf32, #tpu.memory_space<vmem>>, vector<8x16xf32>,
    %cst_61 = arith.constant 0.000000e+00 : f32
    %90 = vector.broadcast %cst_61 : f32 to vector<16x16xf32>
    %c2_62 = arith.constant 2 : index
    %c0_63 = arith.constant 0 : index
    %c0_64 = arith.constant 0 : index
    %91 = vector.load %arg19[%c2_62, %c0_63, %c0_64] : memref<18x18x16xf32, #tpu.memory_space<vmem>>, vector<1x16x16xf32>
    %92 = vector.shape_cast %91 : vector<1x16x16xf32> to vector<16x16xf32>
    %c0_65 = arith.constant 0 : index
    %c0_66 = arith.constant 0 : index
    %93 = vector.load %arg4[%c0_65, %c0_66] : memref<9x16xf32, #tpu.memory_space<vmem>>, vector<1x16xf32>
    %94 = vector.broadcast %93 : vector<1x16xf32> to vector<16x16xf32>
    %95 = arith.mulf %92, %94 : vector<16x16xf32>
    %96 = arith.addf %90, %95 : vector<16x16xf32>
    %c2_67 = arith.constant 2 : index
    %c1_68 = arith.constant 1 : index
    %c0_69 = arith.constant 0 : index
    %97 = vector.load %arg19[%c2_67, %c1_68, %c0_69] : memref<18x18x16xf32, #tpu.memory_space<vmem>>, vector<1x16x16xf32>
    %98 = vector.shape_cast %97 : vector<1x16x16xf32> to vector<16x16xf32>
    %c1_70 = arith.constant 1 : index
    %c0_71 = arith.constant 0 : index
    %99 = vector.load %arg4[%c1_70, %c0_71] : memref<9x16xf32, #tpu.memory_space<vmem>>, vector<1x16xf32>
    %100 = vector.broadcast %99 : vector<1x16xf32> to vector<16x16xf32>
    %101 = arith.mulf %98, %100 : vector<16x16xf32>
    %102 = arith.addf %96, %101 : vector<16x16xf32>
    %c2_72 = arith.constant 2 : index
    %c2_73 = arith.constant 2 : index
    %c0_74 = arith.constant 0 : index
    %103 = vector.load %arg19[%c2_72, %c2_73, %c0_74] : memref<18x18x16xf32, #tpu.memory_space<vmem>>, vector<1x16x16xf32>
    %104 = vector.shape_cast %103 : vector<1x16x16xf32> to vector<16x16xf32>
    %c2_75 = arith.constant 2 : index
    %c0_76 = arith.constant 0 : index
    %105 = vector.load %arg4[%c2_75, %c0_76] : memref<9x16xf32, #tpu.memory_space<vmem>>, vector<1x16xf32>
    %106 = vector.broadcast %105 : vector<1x16xf32> to vector<16x16xf32>
    %107 = arith.mulf %104, %106 : vector<16x16xf32>
    %108 = arith.addf %102, %107 : vector<16x16xf32>
    %c3_77 = arith.constant 3 : index
    %c0_78 = arith.constant 0 : index
    %c0_79 = arith.constant 0 : index
    %109 = vector.load %arg19[%c3_77, %c0_78, %c0_79] : memref<18x18x16xf32, #tpu.memory_space<vmem>>, vector<1x16x16xf32>
    %110 = vector.shape_cast %109 : vector<1x16x16xf32> to vector<16x16xf32>
    %c3_80 = arith.constant 3 : index
    %c0_81 = arith.constant 0 : index
    %111 = vector.load %arg4[%c3_80, %c0_81] : memref<9x16xf32, #tpu.memory_space<vmem>>, vector<1x16xf32>
    %112 = vector.broadcast %111 : vector<1x16xf32> to vector<16x16xf32>
    %113 = arith.mulf %110, %112 : vector<16x16xf32>
    %114 = arith.addf %108, %113 : vector<16x16xf32>
    %c3_82 = arith.constant 3 : index
    %c1_83 = arith.constant 1 : index
    %c0_84 = arith.constant 0 : index
    %115 = vector.load %arg19[%c3_82, %c1_83, %c0_84] : memref<18x18x16xf32, #tpu.memory_space<vmem>>, vector<1x16x16xf32>
    %116 = vector.shape_cast %115 : vector<1x16x16xf32> to vector<16x16xf32>
    %c4_85 = arith.constant 4 : index
    %c0_86 = arith.constant 0 : index
    %117 = vector.load %arg4[%c4_85, %c0_86] : memref<9x16xf32, #tpu.memory_space<vmem>>, vector<1x16xf32>
    %118 = vector.broadcast %117 : vector<1x16xf32> to vector<16x16xf32>
    %119 = arith.mulf %116, %118 : vector<16x16xf32>
    %120 = arith.addf %114, %119 : vector<16x16xf32>
    %c3_87 = arith.constant 3 : index
    %c2_88 = arith.constant 2 : index
    %c0_89 = arith.constant 0 : index
    %121 = vector.load %arg19[%c3_87, %c2_88, %c0_89] : memref<18x18x16xf32, #tpu.memory_space<vmem>>, vector<1x16x16xf32>
    %122 = vector.shape_cast %121 : vector<1x16x16xf32> to vector<16x16xf32>
    %c5_90 = arith.constant 5 : index
    %c0_91 = arith.constant 0 : index
    %123 = vector.load %arg4[%c5_90, %c0_91] : memref<9x16xf32, #tpu.memory_space<vmem>>, vector<1x16xf32>
    %124 = vector.broadcast %123 : vector<1x16xf32> to vector<16x16xf32>
    %125 = arith.mulf %122, %124 : vector<16x16xf32>
    %126 = arith.addf %120, %125 : vector<16x16xf32>
    %c4_92 = arith.constant 4 : index
    %c0_93 = arith.constant 0 : index
    %c0_94 = arith.constant 0 : index
    %127 = vector.load %arg19[%c4_92, %c0_93, %c0_94] : memref<18x18x16xf32, #tpu.memory_space<vmem>>, vector<1x16x16xf32>
    %128 = vector.shape_cast %127 : vector<1x16x16xf32> to vector<16x16xf32>
    %c6_95 = arith.constant 6 : index
    %c0_96 = arith.constant 0 : index
    %129 = vector.load %arg4[%c6_95, %c0_96] : memref<9x16xf32, #tpu.memory_space<vmem>>, vector<1x16xf32>
    %130 = vector.broadcast %129 : vector<1x16xf32> to vector<16x16xf32>
    %131 = arith.mulf %128, %130 : vector<16x16xf32>
    %132 = arith.addf %126, %131 : vector<16x16xf32>
    %c4_97 = arith.constant 4 : index
    %c1_98 = arith.constant 1 : index
    %c0_99 = arith.constant 0 : index
    %133 = vector.load %arg19[%c4_97, %c1_98, %c0_99] : memref<18x18x16xf32, #tpu.memory_space<vmem>>, vector<1x16x16xf32>
    %134 = vector.shape_cast %133 : vector<1x16x16xf32> to vector<16x16xf32>
    %c7_100 = arith.constant 7 : index
    %c0_101 = arith.constant 0 : index
    %135 = vector.load %arg4[%c7_100, %c0_101] : memref<9x16xf32, #tpu.memory_space<vmem>>, vector<1x16xf32>
    %136 = vector.broadcast %135 : vector<1x16xf32> to vector<16x16xf32>
    %137 = arith.mulf %134, %136 : vector<16x16xf32>
    %138 = arith.addf %132, %137 : vector<16x16xf32>
    %c4_102 = arith.constant 4 : index
    %c2_103 = arith.constant 2 : index
    %c0_104 = arith.constant 0 : index
    %139 = vector.load %arg19[%c4_102, %c2_103, %c0_104] : memref<18x18x16xf32, #tpu.memory_space<vmem>>, vector<1x16x16xf32>
    %140 = vector.shape_cast %139 : vector<1x16x16xf32> to vector<16x16xf32>
    %c8_105 = arith.constant 8 : index
    %c0_106 = arith.constant 0 : index
    %141 = vector.load %arg4[%c8_105, %c0_106] : memref<9x16xf32, #tpu.memory_space<vmem>>, vector<1x16xf32>
    %142 = vector.broadcast %141 : vector<1x16xf32> to vector<16x16xf32>
    %143 = arith.mulf %140, %142 : vector<16x16xf32>
    %144 = arith.addf %138, %143 : vector<16x16xf32>
    %cst_107 = arith.constant dense<0.000000e+00> : vector<8x16xf32>
    %145 = tpu.matmul %28, %144, %cst_107 {dimension_numbers = #tpu.dot_dimension_numbers<[1], [0], [0], [1], [0, 0, 1, 1], [], []>} : vector<8x16xf32>, vector<16x16xf32>, vector<8x16xf32> -> vector<8x16xf32>
    %146 = vector.broadcast %21 : vector<1x16xf32> to vector<8x16xf32>
    %147 = arith.addf %145, %146 : vector<8x16xf32>
    %cst_108 = arith.constant 0.000000e+00 : f32
    %148 = vector.broadcast %cst_108 : f32 to vector<8x16xf32>
    %149 = arith.maximumf %147, %148 : vector<8x16xf32>
    %c8_109 = arith.constant 8 : index
    %c0_110 = arith.constant 0 : index
    %150 = vector.load %arg20[%c8_109, %c0_110] : memref<64x16xf32, #tpu.memory_space<vmem>>, vector<8x16xf32>
    tpu.vector_store %arg20[%c8_109, %c0_110], %149 {strides = array<i32>} : memref<64x16xf32, #tpu.memory_space<vmem>>, vector<8x16xf32>,
    %cst_111 = arith.constant 0.000000e+00 : f32
    %151 = vector.broadcast %cst_111 : f32 to vector<16x16xf32>
    %c4_112 = arith.constant 4 : index
    %c0_113 = arith.constant 0 : index
    %c0_114 = arith.constant 0 : index
    %152 = vector.load %arg19[%c4_112, %c0_113, %c0_114] : memref<18x18x16xf32, #tpu.memory_space<vmem>>, vector<1x16x16xf32>
    %153 = vector.shape_cast %152 : vector<1x16x16xf32> to vector<16x16xf32>
    %c0_115 = arith.constant 0 : index
    %c0_116 = arith.constant 0 : index
    %154 = vector.load %arg4[%c0_115, %c0_116] : memref<9x16xf32, #tpu.memory_space<vmem>>, vector<1x16xf32>
    %155 = vector.broadcast %154 : vector<1x16xf32> to vector<16x16xf32>
    %156 = arith.mulf %153, %155 : vector<16x16xf32>
    %157 = arith.addf %151, %156 : vector<16x16xf32>
    %c4_117 = arith.constant 4 : index
    %c1_118 = arith.constant 1 : index
    %c0_119 = arith.constant 0 : index
    %158 = vector.load %arg19[%c4_117, %c1_118, %c0_119] : memref<18x18x16xf32, #tpu.memory_space<vmem>>, vector<1x16x16xf32>
    %159 = vector.shape_cast %158 : vector<1x16x16xf32> to vector<16x16xf32>
    %c1_120 = arith.constant 1 : index
    %c0_121 = arith.constant 0 : index
    %160 = vector.load %arg4[%c1_120, %c0_121] : memref<9x16xf32, #tpu.memory_space<vmem>>, vector<1x16xf32>
    %161 = vector.broadcast %160 : vector<1x16xf32> to vector<16x16xf32>
    %162 = arith.mulf %159, %161 : vector<16x16xf32>
    %163 = arith.addf %157, %162 : vector<16x16xf32>
    %c4_122 = arith.constant 4 : index
    %c2_123 = arith.constant 2 : index
    %c0_124 = arith.constant 0 : index
    %164 = vector.load %arg19[%c4_122, %c2_123, %c0_124] : memref<18x18x16xf32, #tpu.memory_space<vmem>>, vector<1x16x16xf32>
    %165 = vector.shape_cast %164 : vector<1x16x16xf32> to vector<16x16xf32>
    %c2_125 = arith.constant 2 : index
    %c0_126 = arith.constant 0 : index
    %166 = vector.load %arg4[%c2_125, %c0_126] : memref<9x16xf32, #tpu.memory_space<vmem>>, vector<1x16xf32>
    %167 = vector.broadcast %166 : vector<1x16xf32> to vector<16x16xf32>
    %168 = arith.mulf %165, %167 : vector<16x16xf32>
    %169 = arith.addf %163, %168 : vector<16x16xf32>
    %c5_127 = arith.constant 5 : index
    %c0_128 = arith.constant 0 : index
    %c0_129 = arith.constant 0 : index
    %170 = vector.load %arg19[%c5_127, %c0_128, %c0_129] : memref<18x18x16xf32, #tpu.memory_space<vmem>>, vector<1x16x16xf32>
    %171 = vector.shape_cast %170 : vector<1x16x16xf32> to vector<16x16xf32>
    %c3_130 = arith.constant 3 : index
    %c0_131 = arith.constant 0 : index
    %172 = vector.load %arg4[%c3_130, %c0_131] : memref<9x16xf32, #tpu.memory_space<vmem>>, vector<1x16xf32>
    %173 = vector.broadcast %172 : vector<1x16xf32> to vector<16x16xf32>
    %174 = arith.mulf %171, %173 : vector<16x16xf32>
    %175 = arith.addf %169, %174 : vector<16x16xf32>
    %c5_132 = arith.constant 5 : index
    %c1_133 = arith.constant 1 : index
    %c0_134 = arith.constant 0 : index
    %176 = vector.load %arg19[%c5_132, %c1_133, %c0_134] : memref<18x18x16xf32, #tpu.memory_space<vmem>>, vector<1x16x16xf32>
    %177 = vector.shape_cast %176 : vector<1x16x16xf32> to vector<16x16xf32>
    %c4_135 = arith.constant 4 : index
    %c0_136 = arith.constant 0 : index
    %178 = vector.load %arg4[%c4_135, %c0_136] : memref<9x16xf32, #tpu.memory_space<vmem>>, vector<1x16xf32>
    %179 = vector.broadcast %178 : vector<1x16xf32> to vector<16x16xf32>
    %180 = arith.mulf %177, %179 : vector<16x16xf32>
    %181 = arith.addf %175, %180 : vector<16x16xf32>
    %c5_137 = arith.constant 5 : index
    %c2_138 = arith.constant 2 : index
    %c0_139 = arith.constant 0 : index
    %182 = vector.load %arg19[%c5_137, %c2_138, %c0_139] : memref<18x18x16xf32, #tpu.memory_space<vmem>>, vector<1x16x16xf32>
    %183 = vector.shape_cast %182 : vector<1x16x16xf32> to vector<16x16xf32>
    %c5_140 = arith.constant 5 : index
    %c0_141 = arith.constant 0 : index
    %184 = vector.load %arg4[%c5_140, %c0_141] : memref<9x16xf32, #tpu.memory_space<vmem>>, vector<1x16xf32>
    %185 = vector.broadcast %184 : vector<1x16xf32> to vector<16x16xf32>
    %186 = arith.mulf %183, %185 : vector<16x16xf32>
    %187 = arith.addf %181, %186 : vector<16x16xf32>
    %c6_142 = arith.constant 6 : index
    %c0_143 = arith.constant 0 : index
    %c0_144 = arith.constant 0 : index
    %188 = vector.load %arg19[%c6_142, %c0_143, %c0_144] : memref<18x18x16xf32, #tpu.memory_space<vmem>>, vector<1x16x16xf32>
    %189 = vector.shape_cast %188 : vector<1x16x16xf32> to vector<16x16xf32>
    %c6_145 = arith.constant 6 : index
    %c0_146 = arith.constant 0 : index
    %190 = vector.load %arg4[%c6_145, %c0_146] : memref<9x16xf32, #tpu.memory_space<vmem>>, vector<1x16xf32>
    %191 = vector.broadcast %190 : vector<1x16xf32> to vector<16x16xf32>
    %192 = arith.mulf %189, %191 : vector<16x16xf32>
    %193 = arith.addf %187, %192 : vector<16x16xf32>
    %c6_147 = arith.constant 6 : index
    %c1_148 = arith.constant 1 : index
    %c0_149 = arith.constant 0 : index
    %194 = vector.load %arg19[%c6_147, %c1_148, %c0_149] : memref<18x18x16xf32, #tpu.memory_space<vmem>>, vector<1x16x16xf32>
    %195 = vector.shape_cast %194 : vector<1x16x16xf32> to vector<16x16xf32>
    %c7_150 = arith.constant 7 : index
    %c0_151 = arith.constant 0 : index
    %196 = vector.load %arg4[%c7_150, %c0_151] : memref<9x16xf32, #tpu.memory_space<vmem>>, vector<1x16xf32>
    %197 = vector.broadcast %196 : vector<1x16xf32> to vector<16x16xf32>
    %198 = arith.mulf %195, %197 : vector<16x16xf32>
    %199 = arith.addf %193, %198 : vector<16x16xf32>
    %c6_152 = arith.constant 6 : index
    %c2_153 = arith.constant 2 : index
    %c0_154 = arith.constant 0 : index
    %200 = vector.load %arg19[%c6_152, %c2_153, %c0_154] : memref<18x18x16xf32, #tpu.memory_space<vmem>>, vector<1x16x16xf32>
    %201 = vector.shape_cast %200 : vector<1x16x16xf32> to vector<16x16xf32>
    %c8_155 = arith.constant 8 : index
    %c0_156 = arith.constant 0 : index
    %202 = vector.load %arg4[%c8_155, %c0_156] : memref<9x16xf32, #tpu.memory_space<vmem>>, vector<1x16xf32>
    %203 = vector.broadcast %202 : vector<1x16xf32> to vector<16x16xf32>
    %204 = arith.mulf %201, %203 : vector<16x16xf32>
    %205 = arith.addf %199, %204 : vector<16x16xf32>
    %cst_157 = arith.constant dense<0.000000e+00> : vector<8x16xf32>
    %206 = tpu.matmul %28, %205, %cst_157 {dimension_numbers = #tpu.dot_dimension_numbers<[1], [0], [0], [1], [0, 0, 1, 1], [], []>} : vector<8x16xf32>, vector<16x16xf32>, vector<8x16xf32> -> vector<8x16xf32>
    %207 = vector.broadcast %21 : vector<1x16xf32> to vector<8x16xf32>
    %208 = arith.addf %206, %207 : vector<8x16xf32>
    %cst_158 = arith.constant 0.000000e+00 : f32
    %209 = vector.broadcast %cst_158 : f32 to vector<8x16xf32>
    %210 = arith.maximumf %208, %209 : vector<8x16xf32>
    %c16 = arith.constant 16 : index
    %c0_159 = arith.constant 0 : index
    %211 = vector.load %arg20[%c16, %c0_159] : memref<64x16xf32, #tpu.memory_space<vmem>>, vector<8x16xf32>
    tpu.vector_store %arg20[%c16, %c0_159], %210 {strides = array<i32>} : memref<64x16xf32, #tpu.memory_space<vmem>>, vector<8x16xf32>,
    %cst_160 = arith.constant 0.000000e+00 : f32
    %212 = vector.broadcast %cst_160 : f32 to vector<16x16xf32>
    %c6_161 = arith.constant 6 : index
    %c0_162 = arith.constant 0 : index
    %c0_163 = arith.constant 0 : index
    %213 = vector.load %arg19[%c6_161, %c0_162, %c0_163] : memref<18x18x16xf32, #tpu.memory_space<vmem>>, vector<1x16x16xf32>
    %214 = vector.shape_cast %213 : vector<1x16x16xf32> to vector<16x16xf32>
    %c0_164 = arith.constant 0 : index
    %c0_165 = arith.constant 0 : index
    %215 = vector.load %arg4[%c0_164, %c0_165] : memref<9x16xf32, #tpu.memory_space<vmem>>, vector<1x16xf32>
    %216 = vector.broadcast %215 : vector<1x16xf32> to vector<16x16xf32>
    %217 = arith.mulf %214, %216 : vector<16x16xf32>
    %218 = arith.addf %212, %217 : vector<16x16xf32>
    %c6_166 = arith.constant 6 : index
    %c1_167 = arith.constant 1 : index
    %c0_168 = arith.constant 0 : index
    %219 = vector.load %arg19[%c6_166, %c1_167, %c0_168] : memref<18x18x16xf32, #tpu.memory_space<vmem>>, vector<1x16x16xf32>
    %220 = vector.shape_cast %219 : vector<1x16x16xf32> to vector<16x16xf32>
    %c1_169 = arith.constant 1 : index
    %c0_170 = arith.constant 0 : index
    %221 = vector.load %arg4[%c1_169, %c0_170] : memref<9x16xf32, #tpu.memory_space<vmem>>, vector<1x16xf32>
    %222 = vector.broadcast %221 : vector<1x16xf32> to vector<16x16xf32>
    %223 = arith.mulf %220, %222 : vector<16x16xf32>
    %224 = arith.addf %218, %223 : vector<16x16xf32>
    %c6_171 = arith.constant 6 : index
    %c2_172 = arith.constant 2 : index
    %c0_173 = arith.constant 0 : index
    %225 = vector.load %arg19[%c6_171, %c2_172, %c0_173] : memref<18x18x16xf32, #tpu.memory_space<vmem>>, vector<1x16x16xf32>
    %226 = vector.shape_cast %225 : vector<1x16x16xf32> to vector<16x16xf32>
    %c2_174 = arith.constant 2 : index
    %c0_175 = arith.constant 0 : index
    %227 = vector.load %arg4[%c2_174, %c0_175] : memref<9x16xf32, #tpu.memory_space<vmem>>, vector<1x16xf32>
    %228 = vector.broadcast %227 : vector<1x16xf32> to vector<16x16xf32>
    %229 = arith.mulf %226, %228 : vector<16x16xf32>
    %230 = arith.addf %224, %229 : vector<16x16xf32>
    %c7_176 = arith.constant 7 : index
    %c0_177 = arith.constant 0 : index
    %c0_178 = arith.constant 0 : index
    %231 = vector.load %arg19[%c7_176, %c0_177, %c0_178] : memref<18x18x16xf32, #tpu.memory_space<vmem>>, vector<1x16x16xf32>
    %232 = vector.shape_cast %231 : vector<1x16x16xf32> to vector<16x16xf32>
    %c3_179 = arith.constant 3 : index
    %c0_180 = arith.constant 0 : index
    %233 = vector.load %arg4[%c3_179, %c0_180] : memref<9x16xf32, #tpu.memory_space<vmem>>, vector<1x16xf32>
    %234 = vector.broadcast %233 : vector<1x16xf32> to vector<16x16xf32>
    %235 = arith.mulf %232, %234 : vector<16x16xf32>
    %236 = arith.addf %230, %235 : vector<16x16xf32>
    %c7_181 = arith.constant 7 : index
    %c1_182 = arith.constant 1 : index
    %c0_183 = arith.constant 0 : index
    %237 = vector.load %arg19[%c7_181, %c1_182, %c0_183] : memref<18x18x16xf32, #tpu.memory_space<vmem>>, vector<1x16x16xf32>
    %238 = vector.shape_cast %237 : vector<1x16x16xf32> to vector<16x16xf32>
    %c4_184 = arith.constant 4 : index
    %c0_185 = arith.constant 0 : index
    %239 = vector.load %arg4[%c4_184, %c0_185] : memref<9x16xf32, #tpu.memory_space<vmem>>, vector<1x16xf32>
    %240 = vector.broadcast %239 : vector<1x16xf32> to vector<16x16xf32>
    %241 = arith.mulf %238, %240 : vector<16x16xf32>
    %242 = arith.addf %236, %241 : vector<16x16xf32>
    %c7_186 = arith.constant 7 : index
    %c2_187 = arith.constant 2 : index
    %c0_188 = arith.constant 0 : index
    %243 = vector.load %arg19[%c7_186, %c2_187, %c0_188] : memref<18x18x16xf32, #tpu.memory_space<vmem>>, vector<1x16x16xf32>
    %244 = vector.shape_cast %243 : vector<1x16x16xf32> to vector<16x16xf32>
    %c5_189 = arith.constant 5 : index
    %c0_190 = arith.constant 0 : index
    %245 = vector.load %arg4[%c5_189, %c0_190] : memref<9x16xf32, #tpu.memory_space<vmem>>, vector<1x16xf32>
    %246 = vector.broadcast %245 : vector<1x16xf32> to vector<16x16xf32>
    %247 = arith.mulf %244, %246 : vector<16x16xf32>
    %248 = arith.addf %242, %247 : vector<16x16xf32>
    %c8_191 = arith.constant 8 : index
    %c0_192 = arith.constant 0 : index
    %c0_193 = arith.constant 0 : index
    %249 = vector.load %arg19[%c8_191, %c0_192, %c0_193] : memref<18x18x16xf32, #tpu.memory_space<vmem>>, vector<1x16x16xf32>
    %250 = vector.shape_cast %249 : vector<1x16x16xf32> to vector<16x16xf32>
    %c6_194 = arith.constant 6 : index
    %c0_195 = arith.constant 0 : index
    %251 = vector.load %arg4[%c6_194, %c0_195] : memref<9x16xf32, #tpu.memory_space<vmem>>, vector<1x16xf32>
    %252 = vector.broadcast %251 : vector<1x16xf32> to vector<16x16xf32>
    %253 = arith.mulf %250, %252 : vector<16x16xf32>
    %254 = arith.addf %248, %253 : vector<16x16xf32>
    %c8_196 = arith.constant 8 : index
    %c1_197 = arith.constant 1 : index
    %c0_198 = arith.constant 0 : index
    %255 = vector.load %arg19[%c8_196, %c1_197, %c0_198] : memref<18x18x16xf32, #tpu.memory_space<vmem>>, vector<1x16x16xf32>
    %256 = vector.shape_cast %255 : vector<1x16x16xf32> to vector<16x16xf32>
    %c7_199 = arith.constant 7 : index
    %c0_200 = arith.constant 0 : index
    %257 = vector.load %arg4[%c7_199, %c0_200] : memref<9x16xf32, #tpu.memory_space<vmem>>, vector<1x16xf32>
    %258 = vector.broadcast %257 : vector<1x16xf32> to vector<16x16xf32>
    %259 = arith.mulf %256, %258 : vector<16x16xf32>
    %260 = arith.addf %254, %259 : vector<16x16xf32>
    %c8_201 = arith.constant 8 : index
    %c2_202 = arith.constant 2 : index
    %c0_203 = arith.constant 0 : index
    %261 = vector.load %arg19[%c8_201, %c2_202, %c0_203] : memref<18x18x16xf32, #tpu.memory_space<vmem>>, vector<1x16x16xf32>
    %262 = vector.shape_cast %261 : vector<1x16x16xf32> to vector<16x16xf32>
    %c8_204 = arith.constant 8 : index
    %c0_205 = arith.constant 0 : index
    %263 = vector.load %arg4[%c8_204, %c0_205] : memref<9x16xf32, #tpu.memory_space<vmem>>, vector<1x16xf32>
    %264 = vector.broadcast %263 : vector<1x16xf32> to vector<16x16xf32>
    %265 = arith.mulf %262, %264 : vector<16x16xf32>
    %266 = arith.addf %260, %265 : vector<16x16xf32>
    %cst_206 = arith.constant dense<0.000000e+00> : vector<8x16xf32>
    %267 = tpu.matmul %28, %266, %cst_206 {dimension_numbers = #tpu.dot_dimension_numbers<[1], [0], [0], [1], [0, 0, 1, 1], [], []>} : vector<8x16xf32>, vector<16x16xf32>, vector<8x16xf32> -> vector<8x16xf32>
    %268 = vector.broadcast %21 : vector<1x16xf32> to vector<8x16xf32>
    %269 = arith.addf %267, %268 : vector<8x16xf32>
    %cst_207 = arith.constant 0.000000e+00 : f32
    %270 = vector.broadcast %cst_207 : f32 to vector<8x16xf32>
    %271 = arith.maximumf %269, %270 : vector<8x16xf32>
    %c24 = arith.constant 24 : index
    %c0_208 = arith.constant 0 : index
    %272 = vector.load %arg20[%c24, %c0_208] : memref<64x16xf32, #tpu.memory_space<vmem>>, vector<8x16xf32>
    tpu.vector_store %arg20[%c24, %c0_208], %271 {strides = array<i32>} : memref<64x16xf32, #tpu.memory_space<vmem>>, vector<8x16xf32>,
    %cst_209 = arith.constant 0.000000e+00 : f32
    %273 = vector.broadcast %cst_209 : f32 to vector<16x16xf32>
    %c8_210 = arith.constant 8 : index
    %c0_211 = arith.constant 0 : index
    %c0_212 = arith.constant 0 : index
    %274 = vector.load %arg19[%c8_210, %c0_211, %c0_212] : memref<18x18x16xf32, #tpu.memory_space<vmem>>, vector<1x16x16xf32>
    %275 = vector.shape_cast %274 : vector<1x16x16xf32> to vector<16x16xf32>
    %c0_213 = arith.constant 0 : index
    %c0_214 = arith.constant 0 : index
    %276 = vector.load %arg4[%c0_213, %c0_214] : memref<9x16xf32, #tpu.memory_space<vmem>>, vector<1x16xf32>
    %277 = vector.broadcast %276 : vector<1x16xf32> to vector<16x16xf32>
    %278 = arith.mulf %275, %277 : vector<16x16xf32>
    %279 = arith.addf %273, %278 : vector<16x16xf32>
    %c8_215 = arith.constant 8 : index
    %c1_216 = arith.constant 1 : index
    %c0_217 = arith.constant 0 : index
    %280 = vector.load %arg19[%c8_215, %c1_216, %c0_217] : memref<18x18x16xf32, #tpu.memory_space<vmem>>, vector<1x16x16xf32>
    %281 = vector.shape_cast %280 : vector<1x16x16xf32> to vector<16x16xf32>
    %c1_218 = arith.constant 1 : index
    %c0_219 = arith.constant 0 : index
    %282 = vector.load %arg4[%c1_218, %c0_219] : memref<9x16xf32, #tpu.memory_space<vmem>>, vector<1x16xf32>
    %283 = vector.broadcast %282 : vector<1x16xf32> to vector<16x16xf32>
    %284 = arith.mulf %281, %283 : vector<16x16xf32>
    %285 = arith.addf %279, %284 : vector<16x16xf32>
    %c8_220 = arith.constant 8 : index
    %c2_221 = arith.constant 2 : index
    %c0_222 = arith.constant 0 : index
    %286 = vector.load %arg19[%c8_220, %c2_221, %c0_222] : memref<18x18x16xf32, #tpu.memory_space<vmem>>, vector<1x16x16xf32>
    %287 = vector.shape_cast %286 : vector<1x16x16xf32> to vector<16x16xf32>
    %c2_223 = arith.constant 2 : index
    %c0_224 = arith.constant 0 : index
    %288 = vector.load %arg4[%c2_223, %c0_224] : memref<9x16xf32, #tpu.memory_space<vmem>>, vector<1x16xf32>
    %289 = vector.broadcast %288 : vector<1x16xf32> to vector<16x16xf32>
    %290 = arith.mulf %287, %289 : vector<16x16xf32>
    %291 = arith.addf %285, %290 : vector<16x16xf32>
    %c9 = arith.constant 9 : index
    %c0_225 = arith.constant 0 : index
    %c0_226 = arith.constant 0 : index
    %292 = vector.load %arg19[%c9, %c0_225, %c0_226] : memref<18x18x16xf32, #tpu.memory_space<vmem>>, vector<1x16x16xf32>
    %293 = vector.shape_cast %292 : vector<1x16x16xf32> to vector<16x16xf32>
    %c3_227 = arith.constant 3 : index
    %c0_228 = arith.constant 0 : index
    %294 = vector.load %arg4[%c3_227, %c0_228] : memref<9x16xf32, #tpu.memory_space<vmem>>, vector<1x16xf32>
    %295 = vector.broadcast %294 : vector<1x16xf32> to vector<16x16xf32>
    %296 = arith.mulf %293, %295 : vector<16x16xf32>
    %297 = arith.addf %291, %296 : vector<16x16xf32>
    %c9_229 = arith.constant 9 : index
    %c1_230 = arith.constant 1 : index
    %c0_231 = arith.constant 0 : index
    %298 = vector.load %arg19[%c9_229, %c1_230, %c0_231] : memref<18x18x16xf32, #tpu.memory_space<vmem>>, vector<1x16x16xf32>
    %299 = vector.shape_cast %298 : vector<1x16x16xf32> to vector<16x16xf32>
    %c4_232 = arith.constant 4 : index
    %c0_233 = arith.constant 0 : index
    %300 = vector.load %arg4[%c4_232, %c0_233] : memref<9x16xf32, #tpu.memory_space<vmem>>, vector<1x16xf32>
    %301 = vector.broadcast %300 : vector<1x16xf32> to vector<16x16xf32>
    %302 = arith.mulf %299, %301 : vector<16x16xf32>
    %303 = arith.addf %297, %302 : vector<16x16xf32>
    %c9_234 = arith.constant 9 : index
    %c2_235 = arith.constant 2 : index
    %c0_236 = arith.constant 0 : index
    %304 = vector.load %arg19[%c9_234, %c2_235, %c0_236] : memref<18x18x16xf32, #tpu.memory_space<vmem>>, vector<1x16x16xf32>
    %305 = vector.shape_cast %304 : vector<1x16x16xf32> to vector<16x16xf32>
    %c5_237 = arith.constant 5 : index
    %c0_238 = arith.constant 0 : index
    %306 = vector.load %arg4[%c5_237, %c0_238] : memref<9x16xf32, #tpu.memory_space<vmem>>, vector<1x16xf32>
    %307 = vector.broadcast %306 : vector<1x16xf32> to vector<16x16xf32>
    %308 = arith.mulf %305, %307 : vector<16x16xf32>
    %309 = arith.addf %303, %308 : vector<16x16xf32>
    %c10 = arith.constant 10 : index
    %c0_239 = arith.constant 0 : index
    %c0_240 = arith.constant 0 : index
    %310 = vector.load %arg19[%c10, %c0_239, %c0_240] : memref<18x18x16xf32, #tpu.memory_space<vmem>>, vector<1x16x16xf32>
    %311 = vector.shape_cast %310 : vector<1x16x16xf32> to vector<16x16xf32>
    %c6_241 = arith.constant 6 : index
    %c0_242 = arith.constant 0 : index
    %312 = vector.load %arg4[%c6_241, %c0_242] : memref<9x16xf32, #tpu.memory_space<vmem>>, vector<1x16xf32>
    %313 = vector.broadcast %312 : vector<1x16xf32> to vector<16x16xf32>
    %314 = arith.mulf %311, %313 : vector<16x16xf32>
    %315 = arith.addf %309, %314 : vector<16x16xf32>
    %c10_243 = arith.constant 10 : index
    %c1_244 = arith.constant 1 : index
    %c0_245 = arith.constant 0 : index
    %316 = vector.load %arg19[%c10_243, %c1_244, %c0_245] : memref<18x18x16xf32, #tpu.memory_space<vmem>>, vector<1x16x16xf32>
    %317 = vector.shape_cast %316 : vector<1x16x16xf32> to vector<16x16xf32>
    %c7_246 = arith.constant 7 : index
    %c0_247 = arith.constant 0 : index
    %318 = vector.load %arg4[%c7_246, %c0_247] : memref<9x16xf32, #tpu.memory_space<vmem>>, vector<1x16xf32>
    %319 = vector.broadcast %318 : vector<1x16xf32> to vector<16x16xf32>
    %320 = arith.mulf %317, %319 : vector<16x16xf32>
    %321 = arith.addf %315, %320 : vector<16x16xf32>
    %c10_248 = arith.constant 10 : index
    %c2_249 = arith.constant 2 : index
    %c0_250 = arith.constant 0 : index
    %322 = vector.load %arg19[%c10_248, %c2_249, %c0_250] : memref<18x18x16xf32, #tpu.memory_space<vmem>>, vector<1x16x16xf32>
    %323 = vector.shape_cast %322 : vector<1x16x16xf32> to vector<16x16xf32>
    %c8_251 = arith.constant 8 : index
    %c0_252 = arith.constant 0 : index
    %324 = vector.load %arg4[%c8_251, %c0_252] : memref<9x16xf32, #tpu.memory_space<vmem>>, vector<1x16xf32>
    %325 = vector.broadcast %324 : vector<1x16xf32> to vector<16x16xf32>
    %326 = arith.mulf %323, %325 : vector<16x16xf32>
    %327 = arith.addf %321, %326 : vector<16x16xf32>
    %cst_253 = arith.constant dense<0.000000e+00> : vector<8x16xf32>
    %328 = tpu.matmul %28, %327, %cst_253 {dimension_numbers = #tpu.dot_dimension_numbers<[1], [0], [0], [1], [0, 0, 1, 1], [], []>} : vector<8x16xf32>, vector<16x16xf32>, vector<8x16xf32> -> vector<8x16xf32>
    %329 = vector.broadcast %21 : vector<1x16xf32> to vector<8x16xf32>
    %330 = arith.addf %328, %329 : vector<8x16xf32>
    %cst_254 = arith.constant 0.000000e+00 : f32
    %331 = vector.broadcast %cst_254 : f32 to vector<8x16xf32>
    %332 = arith.maximumf %330, %331 : vector<8x16xf32>
    %c32 = arith.constant 32 : index
    %c0_255 = arith.constant 0 : index
    %333 = vector.load %arg20[%c32, %c0_255] : memref<64x16xf32, #tpu.memory_space<vmem>>, vector<8x16xf32>
    tpu.vector_store %arg20[%c32, %c0_255], %332 {strides = array<i32>} : memref<64x16xf32, #tpu.memory_space<vmem>>, vector<8x16xf32>,
    %cst_256 = arith.constant 0.000000e+00 : f32
    %334 = vector.broadcast %cst_256 : f32 to vector<16x16xf32>
    %c10_257 = arith.constant 10 : index
    %c0_258 = arith.constant 0 : index
    %c0_259 = arith.constant 0 : index
    %335 = vector.load %arg19[%c10_257, %c0_258, %c0_259] : memref<18x18x16xf32, #tpu.memory_space<vmem>>, vector<1x16x16xf32>
    %336 = vector.shape_cast %335 : vector<1x16x16xf32> to vector<16x16xf32>
    %c0_260 = arith.constant 0 : index
    %c0_261 = arith.constant 0 : index
    %337 = vector.load %arg4[%c0_260, %c0_261] : memref<9x16xf32, #tpu.memory_space<vmem>>, vector<1x16xf32>
    %338 = vector.broadcast %337 : vector<1x16xf32> to vector<16x16xf32>
    %339 = arith.mulf %336, %338 : vector<16x16xf32>
    %340 = arith.addf %334, %339 : vector<16x16xf32>
    %c10_262 = arith.constant 10 : index
    %c1_263 = arith.constant 1 : index
    %c0_264 = arith.constant 0 : index
    %341 = vector.load %arg19[%c10_262, %c1_263, %c0_264] : memref<18x18x16xf32, #tpu.memory_space<vmem>>, vector<1x16x16xf32>
    %342 = vector.shape_cast %341 : vector<1x16x16xf32> to vector<16x16xf32>
    %c1_265 = arith.constant 1 : index
    %c0_266 = arith.constant 0 : index
    %343 = vector.load %arg4[%c1_265, %c0_266] : memref<9x16xf32, #tpu.memory_space<vmem>>, vector<1x16xf32>
    %344 = vector.broadcast %343 : vector<1x16xf32> to vector<16x16xf32>
    %345 = arith.mulf %342, %344 : vector<16x16xf32>
    %346 = arith.addf %340, %345 : vector<16x16xf32>
    %c10_267 = arith.constant 10 : index
    %c2_268 = arith.constant 2 : index
    %c0_269 = arith.constant 0 : index
    %347 = vector.load %arg19[%c10_267, %c2_268, %c0_269] : memref<18x18x16xf32, #tpu.memory_space<vmem>>, vector<1x16x16xf32>
    %348 = vector.shape_cast %347 : vector<1x16x16xf32> to vector<16x16xf32>
    %c2_270 = arith.constant 2 : index
    %c0_271 = arith.constant 0 : index
    %349 = vector.load %arg4[%c2_270, %c0_271] : memref<9x16xf32, #tpu.memory_space<vmem>>, vector<1x16xf32>
    %350 = vector.broadcast %349 : vector<1x16xf32> to vector<16x16xf32>
    %351 = arith.mulf %348, %350 : vector<16x16xf32>
    %352 = arith.addf %346, %351 : vector<16x16xf32>
    %c11 = arith.constant 11 : index
    %c0_272 = arith.constant 0 : index
    %c0_273 = arith.constant 0 : index
    %353 = vector.load %arg19[%c11, %c0_272, %c0_273] : memref<18x18x16xf32, #tpu.memory_space<vmem>>, vector<1x16x16xf32>
    %354 = vector.shape_cast %353 : vector<1x16x16xf32> to vector<16x16xf32>
    %c3_274 = arith.constant 3 : index
    %c0_275 = arith.constant 0 : index
    %355 = vector.load %arg4[%c3_274, %c0_275] : memref<9x16xf32, #tpu.memory_space<vmem>>, vector<1x16xf32>
    %356 = vector.broadcast %355 : vector<1x16xf32> to vector<16x16xf32>
    %357 = arith.mulf %354, %356 : vector<16x16xf32>
    %358 = arith.addf %352, %357 : vector<16x16xf32>
    %c11_276 = arith.constant 11 : index
    %c1_277 = arith.constant 1 : index
    %c0_278 = arith.constant 0 : index
    %359 = vector.load %arg19[%c11_276, %c1_277, %c0_278] : memref<18x18x16xf32, #tpu.memory_space<vmem>>, vector<1x16x16xf32>
    %360 = vector.shape_cast %359 : vector<1x16x16xf32> to vector<16x16xf32>
    %c4_279 = arith.constant 4 : index
    %c0_280 = arith.constant 0 : index
    %361 = vector.load %arg4[%c4_279, %c0_280] : memref<9x16xf32, #tpu.memory_space<vmem>>, vector<1x16xf32>
    %362 = vector.broadcast %361 : vector<1x16xf32> to vector<16x16xf32>
    %363 = arith.mulf %360, %362 : vector<16x16xf32>
    %364 = arith.addf %358, %363 : vector<16x16xf32>
    %c11_281 = arith.constant 11 : index
    %c2_282 = arith.constant 2 : index
    %c0_283 = arith.constant 0 : index
    %365 = vector.load %arg19[%c11_281, %c2_282, %c0_283] : memref<18x18x16xf32, #tpu.memory_space<vmem>>, vector<1x16x16xf32>
    %366 = vector.shape_cast %365 : vector<1x16x16xf32> to vector<16x16xf32>
    %c5_284 = arith.constant 5 : index
    %c0_285 = arith.constant 0 : index
    %367 = vector.load %arg4[%c5_284, %c0_285] : memref<9x16xf32, #tpu.memory_space<vmem>>, vector<1x16xf32>
    %368 = vector.broadcast %367 : vector<1x16xf32> to vector<16x16xf32>
    %369 = arith.mulf %366, %368 : vector<16x16xf32>
    %370 = arith.addf %364, %369 : vector<16x16xf32>
    %c12 = arith.constant 12 : index
    %c0_286 = arith.constant 0 : index
    %c0_287 = arith.constant 0 : index
    %371 = vector.load %arg19[%c12, %c0_286, %c0_287] : memref<18x18x16xf32, #tpu.memory_space<vmem>>, vector<1x16x16xf32>
    %372 = vector.shape_cast %371 : vector<1x16x16xf32> to vector<16x16xf32>
    %c6_288 = arith.constant 6 : index
    %c0_289 = arith.constant 0 : index
    %373 = vector.load %arg4[%c6_288, %c0_289] : memref<9x16xf32, #tpu.memory_space<vmem>>, vector<1x16xf32>
    %374 = vector.broadcast %373 : vector<1x16xf32> to vector<16x16xf32>
    %375 = arith.mulf %372, %374 : vector<16x16xf32>
    %376 = arith.addf %370, %375 : vector<16x16xf32>
    %c12_290 = arith.constant 12 : index
    %c1_291 = arith.constant 1 : index
    %c0_292 = arith.constant 0 : index
    %377 = vector.load %arg19[%c12_290, %c1_291, %c0_292] : memref<18x18x16xf32, #tpu.memory_space<vmem>>, vector<1x16x16xf32>
    %378 = vector.shape_cast %377 : vector<1x16x16xf32> to vector<16x16xf32>
    %c7_293 = arith.constant 7 : index
    %c0_294 = arith.constant 0 : index
    %379 = vector.load %arg4[%c7_293, %c0_294] : memref<9x16xf32, #tpu.memory_space<vmem>>, vector<1x16xf32>
    %380 = vector.broadcast %379 : vector<1x16xf32> to vector<16x16xf32>
    %381 = arith.mulf %378, %380 : vector<16x16xf32>
    %382 = arith.addf %376, %381 : vector<16x16xf32>
    %c12_295 = arith.constant 12 : index
    %c2_296 = arith.constant 2 : index
    %c0_297 = arith.constant 0 : index
    %383 = vector.load %arg19[%c12_295, %c2_296, %c0_297] : memref<18x18x16xf32, #tpu.memory_space<vmem>>, vector<1x16x16xf32>
    %384 = vector.shape_cast %383 : vector<1x16x16xf32> to vector<16x16xf32>
    %c8_298 = arith.constant 8 : index
    %c0_299 = arith.constant 0 : index
    %385 = vector.load %arg4[%c8_298, %c0_299] : memref<9x16xf32, #tpu.memory_space<vmem>>, vector<1x16xf32>
    %386 = vector.broadcast %385 : vector<1x16xf32> to vector<16x16xf32>
    %387 = arith.mulf %384, %386 : vector<16x16xf32>
    %388 = arith.addf %382, %387 : vector<16x16xf32>
    %cst_300 = arith.constant dense<0.000000e+00> : vector<8x16xf32>
    %389 = tpu.matmul %28, %388, %cst_300 {dimension_numbers = #tpu.dot_dimension_numbers<[1], [0], [0], [1], [0, 0, 1, 1], [], []>} : vector<8x16xf32>, vector<16x16xf32>, vector<8x16xf32> -> vector<8x16xf32>
    %390 = vector.broadcast %21 : vector<1x16xf32> to vector<8x16xf32>
    %391 = arith.addf %389, %390 : vector<8x16xf32>
    %cst_301 = arith.constant 0.000000e+00 : f32
    %392 = vector.broadcast %cst_301 : f32 to vector<8x16xf32>
    %393 = arith.maximumf %391, %392 : vector<8x16xf32>
    %c40 = arith.constant 40 : index
    %c0_302 = arith.constant 0 : index
    %394 = vector.load %arg20[%c40, %c0_302] : memref<64x16xf32, #tpu.memory_space<vmem>>, vector<8x16xf32>
    tpu.vector_store %arg20[%c40, %c0_302], %393 {strides = array<i32>} : memref<64x16xf32, #tpu.memory_space<vmem>>, vector<8x16xf32>,
    %cst_303 = arith.constant 0.000000e+00 : f32
    %395 = vector.broadcast %cst_303 : f32 to vector<16x16xf32>
    %c12_304 = arith.constant 12 : index
    %c0_305 = arith.constant 0 : index
    %c0_306 = arith.constant 0 : index
    %396 = vector.load %arg19[%c12_304, %c0_305, %c0_306] : memref<18x18x16xf32, #tpu.memory_space<vmem>>, vector<1x16x16xf32>
    %397 = vector.shape_cast %396 : vector<1x16x16xf32> to vector<16x16xf32>
    %c0_307 = arith.constant 0 : index
    %c0_308 = arith.constant 0 : index
    %398 = vector.load %arg4[%c0_307, %c0_308] : memref<9x16xf32, #tpu.memory_space<vmem>>, vector<1x16xf32>
    %399 = vector.broadcast %398 : vector<1x16xf32> to vector<16x16xf32>
    %400 = arith.mulf %397, %399 : vector<16x16xf32>
    %401 = arith.addf %395, %400 : vector<16x16xf32>
    %c12_309 = arith.constant 12 : index
    %c1_310 = arith.constant 1 : index
    %c0_311 = arith.constant 0 : index
    %402 = vector.load %arg19[%c12_309, %c1_310, %c0_311] : memref<18x18x16xf32, #tpu.memory_space<vmem>>, vector<1x16x16xf32>
    %403 = vector.shape_cast %402 : vector<1x16x16xf32> to vector<16x16xf32>
    %c1_312 = arith.constant 1 : index
    %c0_313 = arith.constant 0 : index
    %404 = vector.load %arg4[%c1_312, %c0_313] : memref<9x16xf32, #tpu.memory_space<vmem>>, vector<1x16xf32>
    %405 = vector.broadcast %404 : vector<1x16xf32> to vector<16x16xf32>
    %406 = arith.mulf %403, %405 : vector<16x16xf32>
    %407 = arith.addf %401, %406 : vector<16x16xf32>
    %c12_314 = arith.constant 12 : index
    %c2_315 = arith.constant 2 : index
    %c0_316 = arith.constant 0 : index
    %408 = vector.load %arg19[%c12_314, %c2_315, %c0_316] : memref<18x18x16xf32, #tpu.memory_space<vmem>>, vector<1x16x16xf32>
    %409 = vector.shape_cast %408 : vector<1x16x16xf32> to vector<16x16xf32>
    %c2_317 = arith.constant 2 : index
    %c0_318 = arith.constant 0 : index
    %410 = vector.load %arg4[%c2_317, %c0_318] : memref<9x16xf32, #tpu.memory_space<vmem>>, vector<1x16xf32>
    %411 = vector.broadcast %410 : vector<1x16xf32> to vector<16x16xf32>
    %412 = arith.mulf %409, %411 : vector<16x16xf32>
    %413 = arith.addf %407, %412 : vector<16x16xf32>
    %c13 = arith.constant 13 : index
    %c0_319 = arith.constant 0 : index
    %c0_320 = arith.constant 0 : index
    %414 = vector.load %arg19[%c13, %c0_319, %c0_320] : memref<18x18x16xf32, #tpu.memory_space<vmem>>, vector<1x16x16xf32>
    %415 = vector.shape_cast %414 : vector<1x16x16xf32> to vector<16x16xf32>
    %c3_321 = arith.constant 3 : index
    %c0_322 = arith.constant 0 : index
    %416 = vector.load %arg4[%c3_321, %c0_322] : memref<9x16xf32, #tpu.memory_space<vmem>>, vector<1x16xf32>
    %417 = vector.broadcast %416 : vector<1x16xf32> to vector<16x16xf32>
    %418 = arith.mulf %415, %417 : vector<16x16xf32>
    %419 = arith.addf %413, %418 : vector<16x16xf32>
    %c13_323 = arith.constant 13 : index
    %c1_324 = arith.constant 1 : index
    %c0_325 = arith.constant 0 : index
    %420 = vector.load %arg19[%c13_323, %c1_324, %c0_325] : memref<18x18x16xf32, #tpu.memory_space<vmem>>, vector<1x16x16xf32>
    %421 = vector.shape_cast %420 : vector<1x16x16xf32> to vector<16x16xf32>
    %c4_326 = arith.constant 4 : index
    %c0_327 = arith.constant 0 : index
    %422 = vector.load %arg4[%c4_326, %c0_327] : memref<9x16xf32, #tpu.memory_space<vmem>>, vector<1x16xf32>
    %423 = vector.broadcast %422 : vector<1x16xf32> to vector<16x16xf32>
    %424 = arith.mulf %421, %423 : vector<16x16xf32>
    %425 = arith.addf %419, %424 : vector<16x16xf32>
    %c13_328 = arith.constant 13 : index
    %c2_329 = arith.constant 2 : index
    %c0_330 = arith.constant 0 : index
    %426 = vector.load %arg19[%c13_328, %c2_329, %c0_330] : memref<18x18x16xf32, #tpu.memory_space<vmem>>, vector<1x16x16xf32>
    %427 = vector.shape_cast %426 : vector<1x16x16xf32> to vector<16x16xf32>
    %c5_331 = arith.constant 5 : index
    %c0_332 = arith.constant 0 : index
    %428 = vector.load %arg4[%c5_331, %c0_332] : memref<9x16xf32, #tpu.memory_space<vmem>>, vector<1x16xf32>
    %429 = vector.broadcast %428 : vector<1x16xf32> to vector<16x16xf32>
    %430 = arith.mulf %427, %429 : vector<16x16xf32>
    %431 = arith.addf %425, %430 : vector<16x16xf32>
    %c14 = arith.constant 14 : index
    %c0_333 = arith.constant 0 : index
    %c0_334 = arith.constant 0 : index
    %432 = vector.load %arg19[%c14, %c0_333, %c0_334] : memref<18x18x16xf32, #tpu.memory_space<vmem>>, vector<1x16x16xf32>
    %433 = vector.shape_cast %432 : vector<1x16x16xf32> to vector<16x16xf32>
    %c6_335 = arith.constant 6 : index
    %c0_336 = arith.constant 0 : index
    %434 = vector.load %arg4[%c6_335, %c0_336] : memref<9x16xf32, #tpu.memory_space<vmem>>, vector<1x16xf32>
    %435 = vector.broadcast %434 : vector<1x16xf32> to vector<16x16xf32>
    %436 = arith.mulf %433, %435 : vector<16x16xf32>
    %437 = arith.addf %431, %436 : vector<16x16xf32>
    %c14_337 = arith.constant 14 : index
    %c1_338 = arith.constant 1 : index
    %c0_339 = arith.constant 0 : index
    %438 = vector.load %arg19[%c14_337, %c1_338, %c0_339] : memref<18x18x16xf32, #tpu.memory_space<vmem>>, vector<1x16x16xf32>
    %439 = vector.shape_cast %438 : vector<1x16x16xf32> to vector<16x16xf32>
    %c7_340 = arith.constant 7 : index
    %c0_341 = arith.constant 0 : index
    %440 = vector.load %arg4[%c7_340, %c0_341] : memref<9x16xf32, #tpu.memory_space<vmem>>, vector<1x16xf32>
    %441 = vector.broadcast %440 : vector<1x16xf32> to vector<16x16xf32>
    %442 = arith.mulf %439, %441 : vector<16x16xf32>
    %443 = arith.addf %437, %442 : vector<16x16xf32>
    %c14_342 = arith.constant 14 : index
    %c2_343 = arith.constant 2 : index
    %c0_344 = arith.constant 0 : index
    %444 = vector.load %arg19[%c14_342, %c2_343, %c0_344] : memref<18x18x16xf32, #tpu.memory_space<vmem>>, vector<1x16x16xf32>
    %445 = vector.shape_cast %444 : vector<1x16x16xf32> to vector<16x16xf32>
    %c8_345 = arith.constant 8 : index
    %c0_346 = arith.constant 0 : index
    %446 = vector.load %arg4[%c8_345, %c0_346] : memref<9x16xf32, #tpu.memory_space<vmem>>, vector<1x16xf32>
    %447 = vector.broadcast %446 : vector<1x16xf32> to vector<16x16xf32>
    %448 = arith.mulf %445, %447 : vector<16x16xf32>
    %449 = arith.addf %443, %448 : vector<16x16xf32>
    %cst_347 = arith.constant dense<0.000000e+00> : vector<8x16xf32>
    %450 = tpu.matmul %28, %449, %cst_347 {dimension_numbers = #tpu.dot_dimension_numbers<[1], [0], [0], [1], [0, 0, 1, 1], [], []>} : vector<8x16xf32>, vector<16x16xf32>, vector<8x16xf32> -> vector<8x16xf32>
    %451 = vector.broadcast %21 : vector<1x16xf32> to vector<8x16xf32>
    %452 = arith.addf %450, %451 : vector<8x16xf32>
    %cst_348 = arith.constant 0.000000e+00 : f32
    %453 = vector.broadcast %cst_348 : f32 to vector<8x16xf32>
    %454 = arith.maximumf %452, %453 : vector<8x16xf32>
    %c48 = arith.constant 48 : index
    %c0_349 = arith.constant 0 : index
    %455 = vector.load %arg20[%c48, %c0_349] : memref<64x16xf32, #tpu.memory_space<vmem>>, vector<8x16xf32>
    tpu.vector_store %arg20[%c48, %c0_349], %454 {strides = array<i32>} : memref<64x16xf32, #tpu.memory_space<vmem>>, vector<8x16xf32>,
    %cst_350 = arith.constant 0.000000e+00 : f32
    %456 = vector.broadcast %cst_350 : f32 to vector<16x16xf32>
    %c14_351 = arith.constant 14 : index
    %c0_352 = arith.constant 0 : index
    %c0_353 = arith.constant 0 : index
    %457 = vector.load %arg19[%c14_351, %c0_352, %c0_353] : memref<18x18x16xf32, #tpu.memory_space<vmem>>, vector<1x16x16xf32>
    %458 = vector.shape_cast %457 : vector<1x16x16xf32> to vector<16x16xf32>
    %c0_354 = arith.constant 0 : index
    %c0_355 = arith.constant 0 : index
    %459 = vector.load %arg4[%c0_354, %c0_355] : memref<9x16xf32, #tpu.memory_space<vmem>>, vector<1x16xf32>
    %460 = vector.broadcast %459 : vector<1x16xf32> to vector<16x16xf32>
    %461 = arith.mulf %458, %460 : vector<16x16xf32>
    %462 = arith.addf %456, %461 : vector<16x16xf32>
    %c14_356 = arith.constant 14 : index
    %c1_357 = arith.constant 1 : index
    %c0_358 = arith.constant 0 : index
    %463 = vector.load %arg19[%c14_356, %c1_357, %c0_358] : memref<18x18x16xf32, #tpu.memory_space<vmem>>, vector<1x16x16xf32>
    %464 = vector.shape_cast %463 : vector<1x16x16xf32> to vector<16x16xf32>
    %c1_359 = arith.constant 1 : index
    %c0_360 = arith.constant 0 : index
    %465 = vector.load %arg4[%c1_359, %c0_360] : memref<9x16xf32, #tpu.memory_space<vmem>>, vector<1x16xf32>
    %466 = vector.broadcast %465 : vector<1x16xf32> to vector<16x16xf32>
    %467 = arith.mulf %464, %466 : vector<16x16xf32>
    %468 = arith.addf %462, %467 : vector<16x16xf32>
    %c14_361 = arith.constant 14 : index
    %c2_362 = arith.constant 2 : index
    %c0_363 = arith.constant 0 : index
    %469 = vector.load %arg19[%c14_361, %c2_362, %c0_363] : memref<18x18x16xf32, #tpu.memory_space<vmem>>, vector<1x16x16xf32>
    %470 = vector.shape_cast %469 : vector<1x16x16xf32> to vector<16x16xf32>
    %c2_364 = arith.constant 2 : index
    %c0_365 = arith.constant 0 : index
    %471 = vector.load %arg4[%c2_364, %c0_365] : memref<9x16xf32, #tpu.memory_space<vmem>>, vector<1x16xf32>
    %472 = vector.broadcast %471 : vector<1x16xf32> to vector<16x16xf32>
    %473 = arith.mulf %470, %472 : vector<16x16xf32>
    %474 = arith.addf %468, %473 : vector<16x16xf32>
    %c15 = arith.constant 15 : index
    %c0_366 = arith.constant 0 : index
    %c0_367 = arith.constant 0 : index
    %475 = vector.load %arg19[%c15, %c0_366, %c0_367] : memref<18x18x16xf32, #tpu.memory_space<vmem>>, vector<1x16x16xf32>
    %476 = vector.shape_cast %475 : vector<1x16x16xf32> to vector<16x16xf32>
    %c3_368 = arith.constant 3 : index
    %c0_369 = arith.constant 0 : index
    %477 = vector.load %arg4[%c3_368, %c0_369] : memref<9x16xf32, #tpu.memory_space<vmem>>, vector<1x16xf32>
    %478 = vector.broadcast %477 : vector<1x16xf32> to vector<16x16xf32>
    %479 = arith.mulf %476, %478 : vector<16x16xf32>
    %480 = arith.addf %474, %479 : vector<16x16xf32>
    %c15_370 = arith.constant 15 : index
    %c1_371 = arith.constant 1 : index
    %c0_372 = arith.constant 0 : index
    %481 = vector.load %arg19[%c15_370, %c1_371, %c0_372] : memref<18x18x16xf32, #tpu.memory_space<vmem>>, vector<1x16x16xf32>
    %482 = vector.shape_cast %481 : vector<1x16x16xf32> to vector<16x16xf32>
    %c4_373 = arith.constant 4 : index
    %c0_374 = arith.constant 0 : index
    %483 = vector.load %arg4[%c4_373, %c0_374] : memref<9x16xf32, #tpu.memory_space<vmem>>, vector<1x16xf32>
    %484 = vector.broadcast %483 : vector<1x16xf32> to vector<16x16xf32>
    %485 = arith.mulf %482, %484 : vector<16x16xf32>
    %486 = arith.addf %480, %485 : vector<16x16xf32>
    %c15_375 = arith.constant 15 : index
    %c2_376 = arith.constant 2 : index
    %c0_377 = arith.constant 0 : index
    %487 = vector.load %arg19[%c15_375, %c2_376, %c0_377] : memref<18x18x16xf32, #tpu.memory_space<vmem>>, vector<1x16x16xf32>
    %488 = vector.shape_cast %487 : vector<1x16x16xf32> to vector<16x16xf32>
    %c5_378 = arith.constant 5 : index
    %c0_379 = arith.constant 0 : index
    %489 = vector.load %arg4[%c5_378, %c0_379] : memref<9x16xf32, #tpu.memory_space<vmem>>, vector<1x16xf32>
    %490 = vector.broadcast %489 : vector<1x16xf32> to vector<16x16xf32>
    %491 = arith.mulf %488, %490 : vector<16x16xf32>
    %492 = arith.addf %486, %491 : vector<16x16xf32>
    %c16_380 = arith.constant 16 : index
    %c0_381 = arith.constant 0 : index
    %c0_382 = arith.constant 0 : index
    %493 = vector.load %arg19[%c16_380, %c0_381, %c0_382] : memref<18x18x16xf32, #tpu.memory_space<vmem>>, vector<1x16x16xf32>
    %494 = vector.shape_cast %493 : vector<1x16x16xf32> to vector<16x16xf32>
    %c6_383 = arith.constant 6 : index
    %c0_384 = arith.constant 0 : index
    %495 = vector.load %arg4[%c6_383, %c0_384] : memref<9x16xf32, #tpu.memory_space<vmem>>, vector<1x16xf32>
    %496 = vector.broadcast %495 : vector<1x16xf32> to vector<16x16xf32>
    %497 = arith.mulf %494, %496 : vector<16x16xf32>
    %498 = arith.addf %492, %497 : vector<16x16xf32>
    %c16_385 = arith.constant 16 : index
    %c1_386 = arith.constant 1 : index
    %c0_387 = arith.constant 0 : index
    %499 = vector.load %arg19[%c16_385, %c1_386, %c0_387] : memref<18x18x16xf32, #tpu.memory_space<vmem>>, vector<1x16x16xf32>
    %500 = vector.shape_cast %499 : vector<1x16x16xf32> to vector<16x16xf32>
    %c7_388 = arith.constant 7 : index
    %c0_389 = arith.constant 0 : index
    %501 = vector.load %arg4[%c7_388, %c0_389] : memref<9x16xf32, #tpu.memory_space<vmem>>, vector<1x16xf32>
    %502 = vector.broadcast %501 : vector<1x16xf32> to vector<16x16xf32>
    %503 = arith.mulf %500, %502 : vector<16x16xf32>
    %504 = arith.addf %498, %503 : vector<16x16xf32>
    %c16_390 = arith.constant 16 : index
    %c2_391 = arith.constant 2 : index
    %c0_392 = arith.constant 0 : index
    %505 = vector.load %arg19[%c16_390, %c2_391, %c0_392] : memref<18x18x16xf32, #tpu.memory_space<vmem>>, vector<1x16x16xf32>
    %506 = vector.shape_cast %505 : vector<1x16x16xf32> to vector<16x16xf32>
    %c8_393 = arith.constant 8 : index
    %c0_394 = arith.constant 0 : index
    %507 = vector.load %arg4[%c8_393, %c0_394] : memref<9x16xf32, #tpu.memory_space<vmem>>, vector<1x16xf32>
    %508 = vector.broadcast %507 : vector<1x16xf32> to vector<16x16xf32>
    %509 = arith.mulf %506, %508 : vector<16x16xf32>
    %510 = arith.addf %504, %509 : vector<16x16xf32>
    %cst_395 = arith.constant dense<0.000000e+00> : vector<8x16xf32>
    %511 = tpu.matmul %28, %510, %cst_395 {dimension_numbers = #tpu.dot_dimension_numbers<[1], [0], [0], [1], [0, 0, 1, 1], [], []>} : vector<8x16xf32>, vector<16x16xf32>, vector<8x16xf32> -> vector<8x16xf32>
    %512 = vector.broadcast %21 : vector<1x16xf32> to vector<8x16xf32>
    %513 = arith.addf %511, %512 : vector<8x16xf32>
    %cst_396 = arith.constant 0.000000e+00 : f32
    %514 = vector.broadcast %cst_396 : f32 to vector<8x16xf32>
    %515 = arith.maximumf %513, %514 : vector<8x16xf32>
    %c56 = arith.constant 56 : index
    %c0_397 = arith.constant 0 : index
    %516 = vector.load %arg20[%c56, %c0_397] : memref<64x16xf32, #tpu.memory_space<vmem>>, vector<8x16xf32>
    tpu.vector_store %arg20[%c56, %c0_397], %515 {strides = array<i32>} : memref<64x16xf32, #tpu.memory_space<vmem>>, vector<8x16xf32>,
    %c0_398 = arith.constant 0 : index
    %c0_399 = arith.constant 0 : index
    %517 = vector.load %arg20[%c0_398, %c0_399] : memref<64x16xf32, #tpu.memory_space<vmem>>, vector<64x16xf32>
    %cst_400 = arith.constant dense<0.000000e+00> : vector<16xf32>
    %518 = vector.multi_reduction <add>, %517, %cst_400 [0] : vector<64x16xf32> to vector<16xf32>
    %519 = vector.shape_cast %518 : vector<16xf32> to vector<1x16xf32>
    %cst_401 = arith.constant 6.400000e+01 : f32
    %520 = vector.broadcast %cst_401 : f32 to vector<1x16xf32>
    %521 = arith.divf %519, %520 : vector<1x16xf32>
    %c0_402 = arith.constant 0 : index
    %c0_403 = arith.constant 0 : index
    %522 = vector.load %arg6[%c0_402, %c0_403] : memref<16x8xbf16, #tpu.memory_space<vmem>>, vector<16x8xbf16>
    %c0_404 = arith.constant 0 : index
    %c0_405 = arith.constant 0 : index
    %523 = vector.load %arg7[%c0_404, %c0_405] : memref<1x8xf32, #tpu.memory_space<vmem>>, vector<1x8xf32>
    %524 = arith.truncf %521 : vector<1x16xf32> to vector<1x16xbf16>
    %cst_406 = arith.constant dense<0.000000e+00> : vector<1x8xf32>
    %525 = tpu.matmul %524, %522, %cst_406 {dimension_numbers = #tpu.dot_dimension_numbers<[1], [0], [0], [1], [0, 0, 1, 1], [], []>} : vector<1x16xbf16>, vector<16x8xbf16>, vector<1x8xf32> -> vector<1x8xf32>
    %526 = arith.addf %525, %523 : vector<1x8xf32>
    %cst_407 = arith.constant 0.000000e+00 : f32
    %527 = vector.broadcast %cst_407 : f32 to vector<1x8xf32>
    %528 = arith.maximumf %526, %527 : vector<1x8xf32>
    %c0_408 = arith.constant 0 : index
    %c0_409 = arith.constant 0 : index
    %529 = vector.load %arg8[%c0_408, %c0_409] : memref<8x16xbf16, #tpu.memory_space<vmem>>, vector<8x16xbf16>
    %c0_410 = arith.constant 0 : index
    %c0_411 = arith.constant 0 : index
    %530 = vector.load %arg9[%c0_410, %c0_411] : memref<1x16xf32, #tpu.memory_space<vmem>>, vector<1x16xf32>
    %531 = arith.truncf %528 : vector<1x8xf32> to vector<1x8xbf16>
    %cst_412 = arith.constant dense<0.000000e+00> : vector<1x16xf32>
    %532 = tpu.matmul %531, %529, %cst_412 {dimension_numbers = #tpu.dot_dimension_numbers<[1], [0], [0], [1], [0, 0, 1, 1], [], []>} : vector<1x8xbf16>, vector<8x16xbf16>, vector<1x16xf32> -> vector<1x16xf32>
    %533 = arith.addf %532, %530 : vector<1x16xf32>
    %cst_413 = arith.constant 0.000000e+00 : f32
    %534 = vector.broadcast %cst_413 : f32 to vector<1x16xf32>
    %535 = arith.subf %534, %533 : vector<1x16xf32>
    %536 = math.exp %535 : vector<1x16xf32>
    %cst_414 = arith.constant 1.000000e+00 : f32
    %537 = vector.broadcast %cst_414 : f32 to vector<1x16xf32>
    %538 = arith.addf %537, %536 : vector<1x16xf32>
    %cst_415 = arith.constant 1.000000e+00 : f32
    %539 = vector.broadcast %cst_415 : f32 to vector<1x16xf32>
    %540 = arith.divf %539, %538 : vector<1x16xf32>
    %541 = vector.broadcast %540 : vector<1x16xf32> to vector<64x16xf32>
    %542 = arith.mulf %517, %541 : vector<64x16xf32>
    %c0_416 = arith.constant 0 : index
    %c0_417 = arith.constant 0 : index
    %543 = vector.load %arg10[%c0_416, %c0_417] : memref<16x16xbf16, #tpu.memory_space<vmem>>, vector<16x16xbf16>
    %c0_418 = arith.constant 0 : index
    %c0_419 = arith.constant 0 : index
    %544 = vector.load %arg11[%c0_418, %c0_419] : memref<1x16xf32, #tpu.memory_space<vmem>>, vector<1x16xf32>
    %545 = arith.truncf %542 : vector<64x16xf32> to vector<64x16xbf16>
    %cst_420 = arith.constant dense<0.000000e+00> : vector<64x16xf32>
    %546 = tpu.matmul %545, %543, %cst_420 {dimension_numbers = #tpu.dot_dimension_numbers<[1], [0], [0], [1], [0, 0, 1, 1], [], []>} : vector<64x16xbf16>, vector<16x16xbf16>, vector<64x16xf32> -> vector<64x16xf32>
    %547 = vector.broadcast %544 : vector<1x16xf32> to vector<64x16xf32>
    %548 = arith.addf %546, %547 : vector<64x16xf32>
    %c0_421 = arith.constant 0 : index
    %c0_422 = arith.constant 0 : index
    %549 = vector.load %arg12[%c0_421, %c0_422] : memref<16x72xbf16, #tpu.memory_space<vmem>>, vector<16x72xbf16>
    %550 = arith.truncf %548 : vector<64x16xf32> to vector<64x16xbf16>
    %cst_423 = arith.constant dense<0.000000e+00> : vector<64x72xf32>
    %551 = tpu.matmul %550, %549, %cst_423 {dimension_numbers = #tpu.dot_dimension_numbers<[1], [0], [0], [1], [0, 0, 1, 1], [], []>} : vector<64x16xbf16>, vector<16x72xbf16>, vector<64x72xf32> -> vector<64x72xf32>
    %cst_424 = arith.constant 0.000000e+00 : f32
    %552 = vector.broadcast %cst_424 : f32 to vector<64x72xf32>
    %553 = arith.maximumf %551, %552 : vector<64x72xf32>
    %cst_425 = arith.constant 0.000000e+00 : f32
    %554 = vector.broadcast %cst_425 : f32 to vector<12x12x72xf32>
    %c0_426 = arith.constant 0 : index
    %c0_427 = arith.constant 0 : index
    %c0_428 = arith.constant 0 : index
    %555 = vector.load %arg21[%c0_426, %c0_427, %c0_428] : memref<12x12x72xf32, #tpu.memory_space<vmem>>, vector<12x12x72xf32>
    tpu.vector_store %arg21[%c0_426, %c0_427, %c0_428], %554 {strides = array<i32>} : memref<12x12x72xf32, #tpu.memory_space<vmem>>, vector<12x12x72xf32>,
    %556 = vector.shape_cast %553 : vector<64x72xf32> to vector<8x8x72xf32>
    %c2_429 = arith.constant 2 : index
    %c2_430 = arith.constant 2 : index
    %c0_431 = arith.constant 0 : index
    %557 = vector.load %arg21[%c2_429, %c2_430, %c0_431] : memref<12x12x72xf32, #tpu.memory_space<vmem>>, vector<8x8x72xf32>
    tpu.vector_store %arg21[%c2_429, %c2_430, %c0_431], %556 {strides = array<i32>} : memref<12x12x72xf32, #tpu.memory_space<vmem>>, vector<8x8x72xf32>,
    %558 = tpu.iota {dimensions = array<i32: 0>} : vector<5x10xi32>
    %559 = tpu.iota {dimensions = array<i32: 1>} : vector<5x10xi32>
    %c2_i32_432 = arith.constant 2 : i32
    %560 = vector.broadcast %c2_i32_432 : i32 to vector<5x10xi32>
    %561 = arith.muli %560, %558 : vector<5x10xi32>
    %562 = arith.cmpi eq, %559, %561 : vector<5x10xi32>
    %563 = arith.extui %562 : vector<5x10xi1> to vector<5x10xi32>
    %564 = arith.sitofp %563 : vector<5x10xi32> to vector<5x10xf32>
    %cst_433 = arith.constant 0.000000e+00 : f32
    %565 = vector.broadcast %cst_433 : f32 to vector<10x72xf32>
    %c0_434 = arith.constant 0 : index
    %c0_435 = arith.constant 0 : index
    %c0_436 = arith.constant 0 : index
    %566 = vector.load %arg21[%c0_434, %c0_435, %c0_436] : memref<12x12x72xf32, #tpu.memory_space<vmem>>, vector<1x10x72xf32>
    %567 = vector.shape_cast %566 : vector<1x10x72xf32> to vector<10x72xf32>
    %c0_437 = arith.constant 0 : index
    %c0_438 = arith.constant 0 : index
    %568 = vector.load %arg13[%c0_437, %c0_438] : memref<9x72xf32, #tpu.memory_space<vmem>>, vector<1x72xf32>
    %569 = vector.broadcast %568 : vector<1x72xf32> to vector<10x72xf32>
    %570 = arith.mulf %567, %569 : vector<10x72xf32>
    %571 = arith.addf %565, %570 : vector<10x72xf32>
    %c0_439 = arith.constant 0 : index
    %c1_440 = arith.constant 1 : index
    %c0_441 = arith.constant 0 : index
    %572 = vector.load %arg21[%c0_439, %c1_440, %c0_441] : memref<12x12x72xf32, #tpu.memory_space<vmem>>, vector<1x10x72xf32>
    %573 = vector.shape_cast %572 : vector<1x10x72xf32> to vector<10x72xf32>
    %c1_442 = arith.constant 1 : index
    %c0_443 = arith.constant 0 : index
    %574 = vector.load %arg13[%c1_442, %c0_443] : memref<9x72xf32, #tpu.memory_space<vmem>>, vector<1x72xf32>
    %575 = vector.broadcast %574 : vector<1x72xf32> to vector<10x72xf32>
    %576 = arith.mulf %573, %575 : vector<10x72xf32>
    %577 = arith.addf %571, %576 : vector<10x72xf32>
    %c0_444 = arith.constant 0 : index
    %c2_445 = arith.constant 2 : index
    %c0_446 = arith.constant 0 : index
    %578 = vector.load %arg21[%c0_444, %c2_445, %c0_446] : memref<12x12x72xf32, #tpu.memory_space<vmem>>, vector<1x10x72xf32>
    %579 = vector.shape_cast %578 : vector<1x10x72xf32> to vector<10x72xf32>
    %c2_447 = arith.constant 2 : index
    %c0_448 = arith.constant 0 : index
    %580 = vector.load %arg13[%c2_447, %c0_448] : memref<9x72xf32, #tpu.memory_space<vmem>>, vector<1x72xf32>
    %581 = vector.broadcast %580 : vector<1x72xf32> to vector<10x72xf32>
    %582 = arith.mulf %579, %581 : vector<10x72xf32>
    %583 = arith.addf %577, %582 : vector<10x72xf32>
    %c1_449 = arith.constant 1 : index
    %c0_450 = arith.constant 0 : index
    %c0_451 = arith.constant 0 : index
    %584 = vector.load %arg21[%c1_449, %c0_450, %c0_451] : memref<12x12x72xf32, #tpu.memory_space<vmem>>, vector<1x10x72xf32>
    %585 = vector.shape_cast %584 : vector<1x10x72xf32> to vector<10x72xf32>
    %c3_452 = arith.constant 3 : index
    %c0_453 = arith.constant 0 : index
    %586 = vector.load %arg13[%c3_452, %c0_453] : memref<9x72xf32, #tpu.memory_space<vmem>>, vector<1x72xf32>
    %587 = vector.broadcast %586 : vector<1x72xf32> to vector<10x72xf32>
    %588 = arith.mulf %585, %587 : vector<10x72xf32>
    %589 = arith.addf %583, %588 : vector<10x72xf32>
    %c1_454 = arith.constant 1 : index
    %c1_455 = arith.constant 1 : index
    %c0_456 = arith.constant 0 : index
    %590 = vector.load %arg21[%c1_454, %c1_455, %c0_456] : memref<12x12x72xf32, #tpu.memory_space<vmem>>, vector<1x10x72xf32>
    %591 = vector.shape_cast %590 : vector<1x10x72xf32> to vector<10x72xf32>
    %c4_457 = arith.constant 4 : index
    %c0_458 = arith.constant 0 : index
    %592 = vector.load %arg13[%c4_457, %c0_458] : memref<9x72xf32, #tpu.memory_space<vmem>>, vector<1x72xf32>
    %593 = vector.broadcast %592 : vector<1x72xf32> to vector<10x72xf32>
    %594 = arith.mulf %591, %593 : vector<10x72xf32>
    %595 = arith.addf %589, %594 : vector<10x72xf32>
    %c1_459 = arith.constant 1 : index
    %c2_460 = arith.constant 2 : index
    %c0_461 = arith.constant 0 : index
    %596 = vector.load %arg21[%c1_459, %c2_460, %c0_461] : memref<12x12x72xf32, #tpu.memory_space<vmem>>, vector<1x10x72xf32>
    %597 = vector.shape_cast %596 : vector<1x10x72xf32> to vector<10x72xf32>
    %c5_462 = arith.constant 5 : index
    %c0_463 = arith.constant 0 : index
    %598 = vector.load %arg13[%c5_462, %c0_463] : memref<9x72xf32, #tpu.memory_space<vmem>>, vector<1x72xf32>
    %599 = vector.broadcast %598 : vector<1x72xf32> to vector<10x72xf32>
    %600 = arith.mulf %597, %599 : vector<10x72xf32>
    %601 = arith.addf %595, %600 : vector<10x72xf32>
    %c2_464 = arith.constant 2 : index
    %c0_465 = arith.constant 0 : index
    %c0_466 = arith.constant 0 : index
    %602 = vector.load %arg21[%c2_464, %c0_465, %c0_466] : memref<12x12x72xf32, #tpu.memory_space<vmem>>, vector<1x10x72xf32>
    %603 = vector.shape_cast %602 : vector<1x10x72xf32> to vector<10x72xf32>
    %c6_467 = arith.constant 6 : index
    %c0_468 = arith.constant 0 : index
    %604 = vector.load %arg13[%c6_467, %c0_468] : memref<9x72xf32, #tpu.memory_space<vmem>>, vector<1x72xf32>
    %605 = vector.broadcast %604 : vector<1x72xf32> to vector<10x72xf32>
    %606 = arith.mulf %603, %605 : vector<10x72xf32>
    %607 = arith.addf %601, %606 : vector<10x72xf32>
    %c2_469 = arith.constant 2 : index
    %c1_470 = arith.constant 1 : index
    %c0_471 = arith.constant 0 : index
    %608 = vector.load %arg21[%c2_469, %c1_470, %c0_471] : memref<12x12x72xf32, #tpu.memory_space<vmem>>, vector<1x10x72xf32>
    %609 = vector.shape_cast %608 : vector<1x10x72xf32> to vector<10x72xf32>
    %c7_472 = arith.constant 7 : index
    %c0_473 = arith.constant 0 : index
    %610 = vector.load %arg13[%c7_472, %c0_473] : memref<9x72xf32, #tpu.memory_space<vmem>>, vector<1x72xf32>
    %611 = vector.broadcast %610 : vector<1x72xf32> to vector<10x72xf32>
    %612 = arith.mulf %609, %611 : vector<10x72xf32>
    %613 = arith.addf %607, %612 : vector<10x72xf32>
    %c2_474 = arith.constant 2 : index
    %c2_475 = arith.constant 2 : index
    %c0_476 = arith.constant 0 : index
    %614 = vector.load %arg21[%c2_474, %c2_475, %c0_476] : memref<12x12x72xf32, #tpu.memory_space<vmem>>, vector<1x10x72xf32>
    %615 = vector.shape_cast %614 : vector<1x10x72xf32> to vector<10x72xf32>
    %c8_477 = arith.constant 8 : index
    %c0_478 = arith.constant 0 : index
    %616 = vector.load %arg13[%c8_477, %c0_478] : memref<9x72xf32, #tpu.memory_space<vmem>>, vector<1x72xf32>
    %617 = vector.broadcast %616 : vector<1x72xf32> to vector<10x72xf32>
    %618 = arith.mulf %615, %617 : vector<10x72xf32>
    %619 = arith.addf %613, %618 : vector<10x72xf32>
    %cst_479 = arith.constant dense<0.000000e+00> : vector<5x72xf32>
    %620 = tpu.matmul %564, %619, %cst_479 {dimension_numbers = #tpu.dot_dimension_numbers<[1], [0], [0], [1], [0, 0, 1, 1], [], []>} : vector<5x10xf32>, vector<10x72xf32>, vector<5x72xf32> -> vector<5x72xf32>
    %cst_480 = arith.constant 0.000000e+00 : f32
    %621 = vector.broadcast %cst_480 : f32 to vector<5x72xf32>
    %622 = arith.maximumf %620, %621 : vector<5x72xf32>
    %c0_481 = arith.constant 0 : index
    %c0_482 = arith.constant 0 : index
    %623 = vector.load %arg22[%c0_481, %c0_482] : memref<25x72xf32, #tpu.memory_space<vmem>>, vector<5x72xf32>
    tpu.vector_store %arg22[%c0_481, %c0_482], %622 {strides = array<i32>} : memref<25x72xf32, #tpu.memory_space<vmem>>, vector<5x72xf32>,
    %cst_483 = arith.constant 0.000000e+00 : f32
    %624 = vector.broadcast %cst_483 : f32 to vector<10x72xf32>
    %c2_484 = arith.constant 2 : index
    %c0_485 = arith.constant 0 : index
    %c0_486 = arith.constant 0 : index
    %625 = vector.load %arg21[%c2_484, %c0_485, %c0_486] : memref<12x12x72xf32, #tpu.memory_space<vmem>>, vector<1x10x72xf32>
    %626 = vector.shape_cast %625 : vector<1x10x72xf32> to vector<10x72xf32>
    %c0_487 = arith.constant 0 : index
    %c0_488 = arith.constant 0 : index
    %627 = vector.load %arg13[%c0_487, %c0_488] : memref<9x72xf32, #tpu.memory_space<vmem>>, vector<1x72xf32>
    %628 = vector.broadcast %627 : vector<1x72xf32> to vector<10x72xf32>
    %629 = arith.mulf %626, %628 : vector<10x72xf32>
    %630 = arith.addf %624, %629 : vector<10x72xf32>
    %c2_489 = arith.constant 2 : index
    %c1_490 = arith.constant 1 : index
    %c0_491 = arith.constant 0 : index
    %631 = vector.load %arg21[%c2_489, %c1_490, %c0_491] : memref<12x12x72xf32, #tpu.memory_space<vmem>>, vector<1x10x72xf32>
    %632 = vector.shape_cast %631 : vector<1x10x72xf32> to vector<10x72xf32>
    %c1_492 = arith.constant 1 : index
    %c0_493 = arith.constant 0 : index
    %633 = vector.load %arg13[%c1_492, %c0_493] : memref<9x72xf32, #tpu.memory_space<vmem>>, vector<1x72xf32>
    %634 = vector.broadcast %633 : vector<1x72xf32> to vector<10x72xf32>
    %635 = arith.mulf %632, %634 : vector<10x72xf32>
    %636 = arith.addf %630, %635 : vector<10x72xf32>
    %c2_494 = arith.constant 2 : index
    %c2_495 = arith.constant 2 : index
    %c0_496 = arith.constant 0 : index
    %637 = vector.load %arg21[%c2_494, %c2_495, %c0_496] : memref<12x12x72xf32, #tpu.memory_space<vmem>>, vector<1x10x72xf32>
    %638 = vector.shape_cast %637 : vector<1x10x72xf32> to vector<10x72xf32>
    %c2_497 = arith.constant 2 : index
    %c0_498 = arith.constant 0 : index
    %639 = vector.load %arg13[%c2_497, %c0_498] : memref<9x72xf32, #tpu.memory_space<vmem>>, vector<1x72xf32>
    %640 = vector.broadcast %639 : vector<1x72xf32> to vector<10x72xf32>
    %641 = arith.mulf %638, %640 : vector<10x72xf32>
    %642 = arith.addf %636, %641 : vector<10x72xf32>
    %c3_499 = arith.constant 3 : index
    %c0_500 = arith.constant 0 : index
    %c0_501 = arith.constant 0 : index
    %643 = vector.load %arg21[%c3_499, %c0_500, %c0_501] : memref<12x12x72xf32, #tpu.memory_space<vmem>>, vector<1x10x72xf32>
    %644 = vector.shape_cast %643 : vector<1x10x72xf32> to vector<10x72xf32>
    %c3_502 = arith.constant 3 : index
    %c0_503 = arith.constant 0 : index
    %645 = vector.load %arg13[%c3_502, %c0_503] : memref<9x72xf32, #tpu.memory_space<vmem>>, vector<1x72xf32>
    %646 = vector.broadcast %645 : vector<1x72xf32> to vector<10x72xf32>
    %647 = arith.mulf %644, %646 : vector<10x72xf32>
    %648 = arith.addf %642, %647 : vector<10x72xf32>
    %c3_504 = arith.constant 3 : index
    %c1_505 = arith.constant 1 : index
    %c0_506 = arith.constant 0 : index
    %649 = vector.load %arg21[%c3_504, %c1_505, %c0_506] : memref<12x12x72xf32, #tpu.memory_space<vmem>>, vector<1x10x72xf32>
    %650 = vector.shape_cast %649 : vector<1x10x72xf32> to vector<10x72xf32>
    %c4_507 = arith.constant 4 : index
    %c0_508 = arith.constant 0 : index
    %651 = vector.load %arg13[%c4_507, %c0_508] : memref<9x72xf32, #tpu.memory_space<vmem>>, vector<1x72xf32>
    %652 = vector.broadcast %651 : vector<1x72xf32> to vector<10x72xf32>
    %653 = arith.mulf %650, %652 : vector<10x72xf32>
    %654 = arith.addf %648, %653 : vector<10x72xf32>
    %c3_509 = arith.constant 3 : index
    %c2_510 = arith.constant 2 : index
    %c0_511 = arith.constant 0 : index
    %655 = vector.load %arg21[%c3_509, %c2_510, %c0_511] : memref<12x12x72xf32, #tpu.memory_space<vmem>>, vector<1x10x72xf32>
    %656 = vector.shape_cast %655 : vector<1x10x72xf32> to vector<10x72xf32>
    %c5_512 = arith.constant 5 : index
    %c0_513 = arith.constant 0 : index
    %657 = vector.load %arg13[%c5_512, %c0_513] : memref<9x72xf32, #tpu.memory_space<vmem>>, vector<1x72xf32>
    %658 = vector.broadcast %657 : vector<1x72xf32> to vector<10x72xf32>
    %659 = arith.mulf %656, %658 : vector<10x72xf32>
    %660 = arith.addf %654, %659 : vector<10x72xf32>
    %c4_514 = arith.constant 4 : index
    %c0_515 = arith.constant 0 : index
    %c0_516 = arith.constant 0 : index
    %661 = vector.load %arg21[%c4_514, %c0_515, %c0_516] : memref<12x12x72xf32, #tpu.memory_space<vmem>>, vector<1x10x72xf32>
    %662 = vector.shape_cast %661 : vector<1x10x72xf32> to vector<10x72xf32>
    %c6_517 = arith.constant 6 : index
    %c0_518 = arith.constant 0 : index
    %663 = vector.load %arg13[%c6_517, %c0_518] : memref<9x72xf32, #tpu.memory_space<vmem>>, vector<1x72xf32>
    %664 = vector.broadcast %663 : vector<1x72xf32> to vector<10x72xf32>
    %665 = arith.mulf %662, %664 : vector<10x72xf32>
    %666 = arith.addf %660, %665 : vector<10x72xf32>
    %c4_519 = arith.constant 4 : index
    %c1_520 = arith.constant 1 : index
    %c0_521 = arith.constant 0 : index
    %667 = vector.load %arg21[%c4_519, %c1_520, %c0_521] : memref<12x12x72xf32, #tpu.memory_space<vmem>>, vector<1x10x72xf32>
    %668 = vector.shape_cast %667 : vector<1x10x72xf32> to vector<10x72xf32>
    %c7_522 = arith.constant 7 : index
    %c0_523 = arith.constant 0 : index
    %669 = vector.load %arg13[%c7_522, %c0_523] : memref<9x72xf32, #tpu.memory_space<vmem>>, vector<1x72xf32>
    %670 = vector.broadcast %669 : vector<1x72xf32> to vector<10x72xf32>
    %671 = arith.mulf %668, %670 : vector<10x72xf32>
    %672 = arith.addf %666, %671 : vector<10x72xf32>
    %c4_524 = arith.constant 4 : index
    %c2_525 = arith.constant 2 : index
    %c0_526 = arith.constant 0 : index
    %673 = vector.load %arg21[%c4_524, %c2_525, %c0_526] : memref<12x12x72xf32, #tpu.memory_space<vmem>>, vector<1x10x72xf32>
    %674 = vector.shape_cast %673 : vector<1x10x72xf32> to vector<10x72xf32>
    %c8_527 = arith.constant 8 : index
    %c0_528 = arith.constant 0 : index
    %675 = vector.load %arg13[%c8_527, %c0_528] : memref<9x72xf32, #tpu.memory_space<vmem>>, vector<1x72xf32>
    %676 = vector.broadcast %675 : vector<1x72xf32> to vector<10x72xf32>
    %677 = arith.mulf %674, %676 : vector<10x72xf32>
    %678 = arith.addf %672, %677 : vector<10x72xf32>
    %cst_529 = arith.constant dense<0.000000e+00> : vector<5x72xf32>
    %679 = tpu.matmul %564, %678, %cst_529 {dimension_numbers = #tpu.dot_dimension_numbers<[1], [0], [0], [1], [0, 0, 1, 1], [], []>} : vector<5x10xf32>, vector<10x72xf32>, vector<5x72xf32> -> vector<5x72xf32>
    %cst_530 = arith.constant 0.000000e+00 : f32
    %680 = vector.broadcast %cst_530 : f32 to vector<5x72xf32>
    %681 = arith.maximumf %679, %680 : vector<5x72xf32>
    %c5_531 = arith.constant 5 : index
    %c0_532 = arith.constant 0 : index
    %682 = vector.load %arg22[%c5_531, %c0_532] : memref<25x72xf32, #tpu.memory_space<vmem>>, vector<5x72xf32>
    tpu.vector_store %arg22[%c5_531, %c0_532], %681 {strides = array<i32>} : memref<25x72xf32, #tpu.memory_space<vmem>>, vector<5x72xf32>,
    %cst_533 = arith.constant 0.000000e+00 : f32
    %683 = vector.broadcast %cst_533 : f32 to vector<10x72xf32>
    %c4_534 = arith.constant 4 : index
    %c0_535 = arith.constant 0 : index
    %c0_536 = arith.constant 0 : index
    %684 = vector.load %arg21[%c4_534, %c0_535, %c0_536] : memref<12x12x72xf32, #tpu.memory_space<vmem>>, vector<1x10x72xf32>
    %685 = vector.shape_cast %684 : vector<1x10x72xf32> to vector<10x72xf32>
    %c0_537 = arith.constant 0 : index
    %c0_538 = arith.constant 0 : index
    %686 = vector.load %arg13[%c0_537, %c0_538] : memref<9x72xf32, #tpu.memory_space<vmem>>, vector<1x72xf32>
    %687 = vector.broadcast %686 : vector<1x72xf32> to vector<10x72xf32>
    %688 = arith.mulf %685, %687 : vector<10x72xf32>
    %689 = arith.addf %683, %688 : vector<10x72xf32>
    %c4_539 = arith.constant 4 : index
    %c1_540 = arith.constant 1 : index
    %c0_541 = arith.constant 0 : index
    %690 = vector.load %arg21[%c4_539, %c1_540, %c0_541] : memref<12x12x72xf32, #tpu.memory_space<vmem>>, vector<1x10x72xf32>
    %691 = vector.shape_cast %690 : vector<1x10x72xf32> to vector<10x72xf32>
    %c1_542 = arith.constant 1 : index
    %c0_543 = arith.constant 0 : index
    %692 = vector.load %arg13[%c1_542, %c0_543] : memref<9x72xf32, #tpu.memory_space<vmem>>, vector<1x72xf32>
    %693 = vector.broadcast %692 : vector<1x72xf32> to vector<10x72xf32>
    %694 = arith.mulf %691, %693 : vector<10x72xf32>
    %695 = arith.addf %689, %694 : vector<10x72xf32>
    %c4_544 = arith.constant 4 : index
    %c2_545 = arith.constant 2 : index
    %c0_546 = arith.constant 0 : index
    %696 = vector.load %arg21[%c4_544, %c2_545, %c0_546] : memref<12x12x72xf32, #tpu.memory_space<vmem>>, vector<1x10x72xf32>
    %697 = vector.shape_cast %696 : vector<1x10x72xf32> to vector<10x72xf32>
    %c2_547 = arith.constant 2 : index
    %c0_548 = arith.constant 0 : index
    %698 = vector.load %arg13[%c2_547, %c0_548] : memref<9x72xf32, #tpu.memory_space<vmem>>, vector<1x72xf32>
    %699 = vector.broadcast %698 : vector<1x72xf32> to vector<10x72xf32>
    %700 = arith.mulf %697, %699 : vector<10x72xf32>
    %701 = arith.addf %695, %700 : vector<10x72xf32>
    %c5_549 = arith.constant 5 : index
    %c0_550 = arith.constant 0 : index
    %c0_551 = arith.constant 0 : index
    %702 = vector.load %arg21[%c5_549, %c0_550, %c0_551] : memref<12x12x72xf32, #tpu.memory_space<vmem>>, vector<1x10x72xf32>
    %703 = vector.shape_cast %702 : vector<1x10x72xf32> to vector<10x72xf32>
    %c3_552 = arith.constant 3 : index
    %c0_553 = arith.constant 0 : index
    %704 = vector.load %arg13[%c3_552, %c0_553] : memref<9x72xf32, #tpu.memory_space<vmem>>, vector<1x72xf32>
    %705 = vector.broadcast %704 : vector<1x72xf32> to vector<10x72xf32>
    %706 = arith.mulf %703, %705 : vector<10x72xf32>
    %707 = arith.addf %701, %706 : vector<10x72xf32>
    %c5_554 = arith.constant 5 : index
    %c1_555 = arith.constant 1 : index
    %c0_556 = arith.constant 0 : index
    %708 = vector.load %arg21[%c5_554, %c1_555, %c0_556] : memref<12x12x72xf32, #tpu.memory_space<vmem>>, vector<1x10x72xf32>
    %709 = vector.shape_cast %708 : vector<1x10x72xf32> to vector<10x72xf32>
    %c4_557 = arith.constant 4 : index
    %c0_558 = arith.constant 0 : index
    %710 = vector.load %arg13[%c4_557, %c0_558] : memref<9x72xf32, #tpu.memory_space<vmem>>, vector<1x72xf32>
    %711 = vector.broadcast %710 : vector<1x72xf32> to vector<10x72xf32>
    %712 = arith.mulf %709, %711 : vector<10x72xf32>
    %713 = arith.addf %707, %712 : vector<10x72xf32>
    %c5_559 = arith.constant 5 : index
    %c2_560 = arith.constant 2 : index
    %c0_561 = arith.constant 0 : index
    %714 = vector.load %arg21[%c5_559, %c2_560, %c0_561] : memref<12x12x72xf32, #tpu.memory_space<vmem>>, vector<1x10x72xf32>
    %715 = vector.shape_cast %714 : vector<1x10x72xf32> to vector<10x72xf32>
    %c5_562 = arith.constant 5 : index
    %c0_563 = arith.constant 0 : index
    %716 = vector.load %arg13[%c5_562, %c0_563] : memref<9x72xf32, #tpu.memory_space<vmem>>, vector<1x72xf32>
    %717 = vector.broadcast %716 : vector<1x72xf32> to vector<10x72xf32>
    %718 = arith.mulf %715, %717 : vector<10x72xf32>
    %719 = arith.addf %713, %718 : vector<10x72xf32>
    %c6_564 = arith.constant 6 : index
    %c0_565 = arith.constant 0 : index
    %c0_566 = arith.constant 0 : index
    %720 = vector.load %arg21[%c6_564, %c0_565, %c0_566] : memref<12x12x72xf32, #tpu.memory_space<vmem>>, vector<1x10x72xf32>
    %721 = vector.shape_cast %720 : vector<1x10x72xf32> to vector<10x72xf32>
    %c6_567 = arith.constant 6 : index
    %c0_568 = arith.constant 0 : index
    %722 = vector.load %arg13[%c6_567, %c0_568] : memref<9x72xf32, #tpu.memory_space<vmem>>, vector<1x72xf32>
    %723 = vector.broadcast %722 : vector<1x72xf32> to vector<10x72xf32>
    %724 = arith.mulf %721, %723 : vector<10x72xf32>
    %725 = arith.addf %719, %724 : vector<10x72xf32>
    %c6_569 = arith.constant 6 : index
    %c1_570 = arith.constant 1 : index
    %c0_571 = arith.constant 0 : index
    %726 = vector.load %arg21[%c6_569, %c1_570, %c0_571] : memref<12x12x72xf32, #tpu.memory_space<vmem>>, vector<1x10x72xf32>
    %727 = vector.shape_cast %726 : vector<1x10x72xf32> to vector<10x72xf32>
    %c7_572 = arith.constant 7 : index
    %c0_573 = arith.constant 0 : index
    %728 = vector.load %arg13[%c7_572, %c0_573] : memref<9x72xf32, #tpu.memory_space<vmem>>, vector<1x72xf32>
    %729 = vector.broadcast %728 : vector<1x72xf32> to vector<10x72xf32>
    %730 = arith.mulf %727, %729 : vector<10x72xf32>
    %731 = arith.addf %725, %730 : vector<10x72xf32>
    %c6_574 = arith.constant 6 : index
    %c2_575 = arith.constant 2 : index
    %c0_576 = arith.constant 0 : index
    %732 = vector.load %arg21[%c6_574, %c2_575, %c0_576] : memref<12x12x72xf32, #tpu.memory_space<vmem>>, vector<1x10x72xf32>
    %733 = vector.shape_cast %732 : vector<1x10x72xf32> to vector<10x72xf32>
    %c8_577 = arith.constant 8 : index
    %c0_578 = arith.constant 0 : index
    %734 = vector.load %arg13[%c8_577, %c0_578] : memref<9x72xf32, #tpu.memory_space<vmem>>, vector<1x72xf32>
    %735 = vector.broadcast %734 : vector<1x72xf32> to vector<10x72xf32>
    %736 = arith.mulf %733, %735 : vector<10x72xf32>
    %737 = arith.addf %731, %736 : vector<10x72xf32>
    %cst_579 = arith.constant dense<0.000000e+00> : vector<5x72xf32>
    %738 = tpu.matmul %564, %737, %cst_579 {dimension_numbers = #tpu.dot_dimension_numbers<[1], [0], [0], [1], [0, 0, 1, 1], [], []>} : vector<5x10xf32>, vector<10x72xf32>, vector<5x72xf32> -> vector<5x72xf32>
    %cst_580 = arith.constant 0.000000e+00 : f32
    %739 = vector.broadcast %cst_580 : f32 to vector<5x72xf32>
    %740 = arith.maximumf %738, %739 : vector<5x72xf32>
    %c10_581 = arith.constant 10 : index
    %c0_582 = arith.constant 0 : index
    %741 = vector.load %arg22[%c10_581, %c0_582] : memref<25x72xf32, #tpu.memory_space<vmem>>, vector<5x72xf32>
    tpu.vector_store %arg22[%c10_581, %c0_582], %740 {strides = array<i32>} : memref<25x72xf32, #tpu.memory_space<vmem>>, vector<5x72xf32>,
    %cst_583 = arith.constant 0.000000e+00 : f32
    %742 = vector.broadcast %cst_583 : f32 to vector<10x72xf32>
    %c6_584 = arith.constant 6 : index
    %c0_585 = arith.constant 0 : index
    %c0_586 = arith.constant 0 : index
    %743 = vector.load %arg21[%c6_584, %c0_585, %c0_586] : memref<12x12x72xf32, #tpu.memory_space<vmem>>, vector<1x10x72xf32>
    %744 = vector.shape_cast %743 : vector<1x10x72xf32> to vector<10x72xf32>
    %c0_587 = arith.constant 0 : index
    %c0_588 = arith.constant 0 : index
    %745 = vector.load %arg13[%c0_587, %c0_588] : memref<9x72xf32, #tpu.memory_space<vmem>>, vector<1x72xf32>
    %746 = vector.broadcast %745 : vector<1x72xf32> to vector<10x72xf32>
    %747 = arith.mulf %744, %746 : vector<10x72xf32>
    %748 = arith.addf %742, %747 : vector<10x72xf32>
    %c6_589 = arith.constant 6 : index
    %c1_590 = arith.constant 1 : index
    %c0_591 = arith.constant 0 : index
    %749 = vector.load %arg21[%c6_589, %c1_590, %c0_591] : memref<12x12x72xf32, #tpu.memory_space<vmem>>, vector<1x10x72xf32>
    %750 = vector.shape_cast %749 : vector<1x10x72xf32> to vector<10x72xf32>
    %c1_592 = arith.constant 1 : index
    %c0_593 = arith.constant 0 : index
    %751 = vector.load %arg13[%c1_592, %c0_593] : memref<9x72xf32, #tpu.memory_space<vmem>>, vector<1x72xf32>
    %752 = vector.broadcast %751 : vector<1x72xf32> to vector<10x72xf32>
    %753 = arith.mulf %750, %752 : vector<10x72xf32>
    %754 = arith.addf %748, %753 : vector<10x72xf32>
    %c6_594 = arith.constant 6 : index
    %c2_595 = arith.constant 2 : index
    %c0_596 = arith.constant 0 : index
    %755 = vector.load %arg21[%c6_594, %c2_595, %c0_596] : memref<12x12x72xf32, #tpu.memory_space<vmem>>, vector<1x10x72xf32>
    %756 = vector.shape_cast %755 : vector<1x10x72xf32> to vector<10x72xf32>
    %c2_597 = arith.constant 2 : index
    %c0_598 = arith.constant 0 : index
    %757 = vector.load %arg13[%c2_597, %c0_598] : memref<9x72xf32, #tpu.memory_space<vmem>>, vector<1x72xf32>
    %758 = vector.broadcast %757 : vector<1x72xf32> to vector<10x72xf32>
    %759 = arith.mulf %756, %758 : vector<10x72xf32>
    %760 = arith.addf %754, %759 : vector<10x72xf32>
    %c7_599 = arith.constant 7 : index
    %c0_600 = arith.constant 0 : index
    %c0_601 = arith.constant 0 : index
    %761 = vector.load %arg21[%c7_599, %c0_600, %c0_601] : memref<12x12x72xf32, #tpu.memory_space<vmem>>, vector<1x10x72xf32>
    %762 = vector.shape_cast %761 : vector<1x10x72xf32> to vector<10x72xf32>
    %c3_602 = arith.constant 3 : index
    %c0_603 = arith.constant 0 : index
    %763 = vector.load %arg13[%c3_602, %c0_603] : memref<9x72xf32, #tpu.memory_space<vmem>>, vector<1x72xf32>
    %764 = vector.broadcast %763 : vector<1x72xf32> to vector<10x72xf32>
    %765 = arith.mulf %762, %764 : vector<10x72xf32>
    %766 = arith.addf %760, %765 : vector<10x72xf32>
    %c7_604 = arith.constant 7 : index
    %c1_605 = arith.constant 1 : index
    %c0_606 = arith.constant 0 : index
    %767 = vector.load %arg21[%c7_604, %c1_605, %c0_606] : memref<12x12x72xf32, #tpu.memory_space<vmem>>, vector<1x10x72xf32>
    %768 = vector.shape_cast %767 : vector<1x10x72xf32> to vector<10x72xf32>
    %c4_607 = arith.constant 4 : index
    %c0_608 = arith.constant 0 : index
    %769 = vector.load %arg13[%c4_607, %c0_608] : memref<9x72xf32, #tpu.memory_space<vmem>>, vector<1x72xf32>
    %770 = vector.broadcast %769 : vector<1x72xf32> to vector<10x72xf32>
    %771 = arith.mulf %768, %770 : vector<10x72xf32>
    %772 = arith.addf %766, %771 : vector<10x72xf32>
    %c7_609 = arith.constant 7 : index
    %c2_610 = arith.constant 2 : index
    %c0_611 = arith.constant 0 : index
    %773 = vector.load %arg21[%c7_609, %c2_610, %c0_611] : memref<12x12x72xf32, #tpu.memory_space<vmem>>, vector<1x10x72xf32>
    %774 = vector.shape_cast %773 : vector<1x10x72xf32> to vector<10x72xf32>
    %c5_612 = arith.constant 5 : index
    %c0_613 = arith.constant 0 : index
    %775 = vector.load %arg13[%c5_612, %c0_613] : memref<9x72xf32, #tpu.memory_space<vmem>>, vector<1x72xf32>
    %776 = vector.broadcast %775 : vector<1x72xf32> to vector<10x72xf32>
    %777 = arith.mulf %774, %776 : vector<10x72xf32>
    %778 = arith.addf %772, %777 : vector<10x72xf32>
    %c8_614 = arith.constant 8 : index
    %c0_615 = arith.constant 0 : index
    %c0_616 = arith.constant 0 : index
    %779 = vector.load %arg21[%c8_614, %c0_615, %c0_616] : memref<12x12x72xf32, #tpu.memory_space<vmem>>, vector<1x10x72xf32>
    %780 = vector.shape_cast %779 : vector<1x10x72xf32> to vector<10x72xf32>
    %c6_617 = arith.constant 6 : index
    %c0_618 = arith.constant 0 : index
    %781 = vector.load %arg13[%c6_617, %c0_618] : memref<9x72xf32, #tpu.memory_space<vmem>>, vector<1x72xf32>
    %782 = vector.broadcast %781 : vector<1x72xf32> to vector<10x72xf32>
    %783 = arith.mulf %780, %782 : vector<10x72xf32>
    %784 = arith.addf %778, %783 : vector<10x72xf32>
    %c8_619 = arith.constant 8 : index
    %c1_620 = arith.constant 1 : index
    %c0_621 = arith.constant 0 : index
    %785 = vector.load %arg21[%c8_619, %c1_620, %c0_621] : memref<12x12x72xf32, #tpu.memory_space<vmem>>, vector<1x10x72xf32>
    %786 = vector.shape_cast %785 : vector<1x10x72xf32> to vector<10x72xf32>
    %c7_622 = arith.constant 7 : index
    %c0_623 = arith.constant 0 : index
    %787 = vector.load %arg13[%c7_622, %c0_623] : memref<9x72xf32, #tpu.memory_space<vmem>>, vector<1x72xf32>
    %788 = vector.broadcast %787 : vector<1x72xf32> to vector<10x72xf32>
    %789 = arith.mulf %786, %788 : vector<10x72xf32>
    %790 = arith.addf %784, %789 : vector<10x72xf32>
    %c8_624 = arith.constant 8 : index
    %c2_625 = arith.constant 2 : index
    %c0_626 = arith.constant 0 : index
    %791 = vector.load %arg21[%c8_624, %c2_625, %c0_626] : memref<12x12x72xf32, #tpu.memory_space<vmem>>, vector<1x10x72xf32>
    %792 = vector.shape_cast %791 : vector<1x10x72xf32> to vector<10x72xf32>
    %c8_627 = arith.constant 8 : index
    %c0_628 = arith.constant 0 : index
    %793 = vector.load %arg13[%c8_627, %c0_628] : memref<9x72xf32, #tpu.memory_space<vmem>>, vector<1x72xf32>
    %794 = vector.broadcast %793 : vector<1x72xf32> to vector<10x72xf32>
    %795 = arith.mulf %792, %794 : vector<10x72xf32>
    %796 = arith.addf %790, %795 : vector<10x72xf32>
    %cst_629 = arith.constant dense<0.000000e+00> : vector<5x72xf32>
    %797 = tpu.matmul %564, %796, %cst_629 {dimension_numbers = #tpu.dot_dimension_numbers<[1], [0], [0], [1], [0, 0, 1, 1], [], []>} : vector<5x10xf32>, vector<10x72xf32>, vector<5x72xf32> -> vector<5x72xf32>
    %cst_630 = arith.constant 0.000000e+00 : f32
    %798 = vector.broadcast %cst_630 : f32 to vector<5x72xf32>
    %799 = arith.maximumf %797, %798 : vector<5x72xf32>
    %c15_631 = arith.constant 15 : index
    %c0_632 = arith.constant 0 : index
    %800 = vector.load %arg22[%c15_631, %c0_632] : memref<25x72xf32, #tpu.memory_space<vmem>>, vector<5x72xf32>
    tpu.vector_store %arg22[%c15_631, %c0_632], %799 {strides = array<i32>} : memref<25x72xf32, #tpu.memory_space<vmem>>, vector<5x72xf32>,
    %cst_633 = arith.constant 0.000000e+00 : f32
    %801 = vector.broadcast %cst_633 : f32 to vector<10x72xf32>
    %c8_634 = arith.constant 8 : index
    %c0_635 = arith.constant 0 : index
    %c0_636 = arith.constant 0 : index
    %802 = vector.load %arg21[%c8_634, %c0_635, %c0_636] : memref<12x12x72xf32, #tpu.memory_space<vmem>>, vector<1x10x72xf32>
    %803 = vector.shape_cast %802 : vector<1x10x72xf32> to vector<10x72xf32>
    %c0_637 = arith.constant 0 : index
    %c0_638 = arith.constant 0 : index
    %804 = vector.load %arg13[%c0_637, %c0_638] : memref<9x72xf32, #tpu.memory_space<vmem>>, vector<1x72xf32>
    %805 = vector.broadcast %804 : vector<1x72xf32> to vector<10x72xf32>
    %806 = arith.mulf %803, %805 : vector<10x72xf32>
    %807 = arith.addf %801, %806 : vector<10x72xf32>
    %c8_639 = arith.constant 8 : index
    %c1_640 = arith.constant 1 : index
    %c0_641 = arith.constant 0 : index
    %808 = vector.load %arg21[%c8_639, %c1_640, %c0_641] : memref<12x12x72xf32, #tpu.memory_space<vmem>>, vector<1x10x72xf32>
    %809 = vector.shape_cast %808 : vector<1x10x72xf32> to vector<10x72xf32>
    %c1_642 = arith.constant 1 : index
    %c0_643 = arith.constant 0 : index
    %810 = vector.load %arg13[%c1_642, %c0_643] : memref<9x72xf32, #tpu.memory_space<vmem>>, vector<1x72xf32>
    %811 = vector.broadcast %810 : vector<1x72xf32> to vector<10x72xf32>
    %812 = arith.mulf %809, %811 : vector<10x72xf32>
    %813 = arith.addf %807, %812 : vector<10x72xf32>
    %c8_644 = arith.constant 8 : index
    %c2_645 = arith.constant 2 : index
    %c0_646 = arith.constant 0 : index
    %814 = vector.load %arg21[%c8_644, %c2_645, %c0_646] : memref<12x12x72xf32, #tpu.memory_space<vmem>>, vector<1x10x72xf32>
    %815 = vector.shape_cast %814 : vector<1x10x72xf32> to vector<10x72xf32>
    %c2_647 = arith.constant 2 : index
    %c0_648 = arith.constant 0 : index
    %816 = vector.load %arg13[%c2_647, %c0_648] : memref<9x72xf32, #tpu.memory_space<vmem>>, vector<1x72xf32>
    %817 = vector.broadcast %816 : vector<1x72xf32> to vector<10x72xf32>
    %818 = arith.mulf %815, %817 : vector<10x72xf32>
    %819 = arith.addf %813, %818 : vector<10x72xf32>
    %c9_649 = arith.constant 9 : index
    %c0_650 = arith.constant 0 : index
    %c0_651 = arith.constant 0 : index
    %820 = vector.load %arg21[%c9_649, %c0_650, %c0_651] : memref<12x12x72xf32, #tpu.memory_space<vmem>>, vector<1x10x72xf32>
    %821 = vector.shape_cast %820 : vector<1x10x72xf32> to vector<10x72xf32>
    %c3_652 = arith.constant 3 : index
    %c0_653 = arith.constant 0 : index
    %822 = vector.load %arg13[%c3_652, %c0_653] : memref<9x72xf32, #tpu.memory_space<vmem>>, vector<1x72xf32>
    %823 = vector.broadcast %822 : vector<1x72xf32> to vector<10x72xf32>
    %824 = arith.mulf %821, %823 : vector<10x72xf32>
    %825 = arith.addf %819, %824 : vector<10x72xf32>
    %c9_654 = arith.constant 9 : index
    %c1_655 = arith.constant 1 : index
    %c0_656 = arith.constant 0 : index
    %826 = vector.load %arg21[%c9_654, %c1_655, %c0_656] : memref<12x12x72xf32, #tpu.memory_space<vmem>>, vector<1x10x72xf32>
    %827 = vector.shape_cast %826 : vector<1x10x72xf32> to vector<10x72xf32>
    %c4_657 = arith.constant 4 : index
    %c0_658 = arith.constant 0 : index
    %828 = vector.load %arg13[%c4_657, %c0_658] : memref<9x72xf32, #tpu.memory_space<vmem>>, vector<1x72xf32>
    %829 = vector.broadcast %828 : vector<1x72xf32> to vector<10x72xf32>
    %830 = arith.mulf %827, %829 : vector<10x72xf32>
    %831 = arith.addf %825, %830 : vector<10x72xf32>
    %c9_659 = arith.constant 9 : index
    %c2_660 = arith.constant 2 : index
    %c0_661 = arith.constant 0 : index
    %832 = vector.load %arg21[%c9_659, %c2_660, %c0_661] : memref<12x12x72xf32, #tpu.memory_space<vmem>>, vector<1x10x72xf32>
    %833 = vector.shape_cast %832 : vector<1x10x72xf32> to vector<10x72xf32>
    %c5_662 = arith.constant 5 : index
    %c0_663 = arith.constant 0 : index
    %834 = vector.load %arg13[%c5_662, %c0_663] : memref<9x72xf32, #tpu.memory_space<vmem>>, vector<1x72xf32>
    %835 = vector.broadcast %834 : vector<1x72xf32> to vector<10x72xf32>
    %836 = arith.mulf %833, %835 : vector<10x72xf32>
    %837 = arith.addf %831, %836 : vector<10x72xf32>
    %c10_664 = arith.constant 10 : index
    %c0_665 = arith.constant 0 : index
    %c0_666 = arith.constant 0 : index
    %838 = vector.load %arg21[%c10_664, %c0_665, %c0_666] : memref<12x12x72xf32, #tpu.memory_space<vmem>>, vector<1x10x72xf32>
    %839 = vector.shape_cast %838 : vector<1x10x72xf32> to vector<10x72xf32>
    %c6_667 = arith.constant 6 : index
    %c0_668 = arith.constant 0 : index
    %840 = vector.load %arg13[%c6_667, %c0_668] : memref<9x72xf32, #tpu.memory_space<vmem>>, vector<1x72xf32>
    %841 = vector.broadcast %840 : vector<1x72xf32> to vector<10x72xf32>
    %842 = arith.mulf %839, %841 : vector<10x72xf32>
    %843 = arith.addf %837, %842 : vector<10x72xf32>
    %c10_669 = arith.constant 10 : index
    %c1_670 = arith.constant 1 : index
    %c0_671 = arith.constant 0 : index
    %844 = vector.load %arg21[%c10_669, %c1_670, %c0_671] : memref<12x12x72xf32, #tpu.memory_space<vmem>>, vector<1x10x72xf32>
    %845 = vector.shape_cast %844 : vector<1x10x72xf32> to vector<10x72xf32>
    %c7_672 = arith.constant 7 : index
    %c0_673 = arith.constant 0 : index
    %846 = vector.load %arg13[%c7_672, %c0_673] : memref<9x72xf32, #tpu.memory_space<vmem>>, vector<1x72xf32>
    %847 = vector.broadcast %846 : vector<1x72xf32> to vector<10x72xf32>
    %848 = arith.mulf %845, %847 : vector<10x72xf32>
    %849 = arith.addf %843, %848 : vector<10x72xf32>
    %c10_674 = arith.constant 10 : index
    %c2_675 = arith.constant 2 : index
    %c0_676 = arith.constant 0 : index
    %850 = vector.load %arg21[%c10_674, %c2_675, %c0_676] : memref<12x12x72xf32, #tpu.memory_space<vmem>>, vector<1x10x72xf32>
    %851 = vector.shape_cast %850 : vector<1x10x72xf32> to vector<10x72xf32>
    %c8_677 = arith.constant 8 : index
    %c0_678 = arith.constant 0 : index
    %852 = vector.load %arg13[%c8_677, %c0_678] : memref<9x72xf32, #tpu.memory_space<vmem>>, vector<1x72xf32>
    %853 = vector.broadcast %852 : vector<1x72xf32> to vector<10x72xf32>
    %854 = arith.mulf %851, %853 : vector<10x72xf32>
    %855 = arith.addf %849, %854 : vector<10x72xf32>
    %cst_679 = arith.constant dense<0.000000e+00> : vector<5x72xf32>
    %856 = tpu.matmul %564, %855, %cst_679 {dimension_numbers = #tpu.dot_dimension_numbers<[1], [0], [0], [1], [0, 0, 1, 1], [], []>} : vector<5x10xf32>, vector<10x72xf32>, vector<5x72xf32> -> vector<5x72xf32>
    %cst_680 = arith.constant 0.000000e+00 : f32
    %857 = vector.broadcast %cst_680 : f32 to vector<5x72xf32>
    %858 = arith.maximumf %856, %857 : vector<5x72xf32>
    %c20 = arith.constant 20 : index
    %c0_681 = arith.constant 0 : index
    %859 = vector.load %arg22[%c20, %c0_681] : memref<25x72xf32, #tpu.memory_space<vmem>>, vector<5x72xf32>
    tpu.vector_store %arg22[%c20, %c0_681], %858 {strides = array<i32>} : memref<25x72xf32, #tpu.memory_space<vmem>>, vector<5x72xf32>,
    %c0_682 = arith.constant 0 : index
    %c0_683 = arith.constant 0 : index
    %860 = vector.load %arg22[%c0_682, %c0_683] : memref<25x72xf32, #tpu.memory_space<vmem>>, vector<25x72xf32>
    %c0_684 = arith.constant 0 : index
    %c0_685 = arith.constant 0 : index
    %861 = vector.load %arg14[%c0_684, %c0_685] : memref<72x24xbf16, #tpu.memory_space<vmem>>, vector<72x24xbf16>
    %862 = arith.truncf %860 : vector<25x72xf32> to vector<25x72xbf16>
    %cst_686 = arith.constant dense<0.000000e+00> : vector<25x24xf32>
    %863 = tpu.matmul %862, %861, %cst_686 {dimension_numbers = #tpu.dot_dimension_numbers<[1], [0], [0], [1], [0, 0, 1, 1], [], []>} : vector<25x72xbf16>, vector<72x24xbf16>, vector<25x24xf32> -> vector<25x24xf32>
    %cst_687 = arith.constant 0.000000e+00 : f32
    %864 = vector.broadcast %cst_687 : f32 to vector<25x24xf32>
    %865 = arith.maximumf %863, %864 : vector<25x24xf32>
    %c0_688 = arith.constant 0 : index
    %c0_689 = arith.constant 0 : index
    %866 = vector.load %arg15[%c0_688, %c0_689] : memref<24x88xbf16, #tpu.memory_space<vmem>>, vector<24x88xbf16>
    %867 = arith.truncf %865 : vector<25x24xf32> to vector<25x24xbf16>
    %cst_690 = arith.constant dense<0.000000e+00> : vector<25x88xf32>
    %868 = tpu.matmul %867, %866, %cst_690 {dimension_numbers = #tpu.dot_dimension_numbers<[1], [0], [0], [1], [0, 0, 1, 1], [], []>} : vector<25x24xbf16>, vector<24x88xbf16>, vector<25x88xf32> -> vector<25x88xf32>
    %cst_691 = arith.constant 0.000000e+00 : f32
    %869 = vector.broadcast %cst_691 : f32 to vector<25x88xf32>
    %870 = arith.maximumf %868, %869 : vector<25x88xf32>
    %cst_692 = arith.constant 0.000000e+00 : f32
    %871 = vector.broadcast %cst_692 : f32 to vector<7x7x88xf32>
    %c0_693 = arith.constant 0 : index
    %c0_694 = arith.constant 0 : index
    %c0_695 = arith.constant 0 : index
    %872 = vector.load %arg23[%c0_693, %c0_694, %c0_695] : memref<7x7x88xf32, #tpu.memory_space<vmem>>, vector<7x7x88xf32>
    tpu.vector_store %arg23[%c0_693, %c0_694, %c0_695], %871 {strides = array<i32>} : memref<7x7x88xf32, #tpu.memory_space<vmem>>, vector<7x7x88xf32>,
    %873 = vector.shape_cast %870 : vector<25x88xf32> to vector<5x5x88xf32>
    %c1_696 = arith.constant 1 : index
    %c1_697 = arith.constant 1 : index
    %c0_698 = arith.constant 0 : index
    %874 = vector.load %arg23[%c1_696, %c1_697, %c0_698] : memref<7x7x88xf32, #tpu.memory_space<vmem>>, vector<5x5x88xf32>
    tpu.vector_store %arg23[%c1_696, %c1_697, %c0_698], %873 {strides = array<i32>} : memref<7x7x88xf32, #tpu.memory_space<vmem>>, vector<5x5x88xf32>,
    %cst_699 = arith.constant 0.000000e+00 : f32
    %875 = vector.broadcast %cst_699 : f32 to vector<5x5x88xf32>
    %c0_700 = arith.constant 0 : index
    %c0_701 = arith.constant 0 : index
    %c0_702 = arith.constant 0 : index
    %876 = vector.load %arg23[%c0_700, %c0_701, %c0_702] : memref<7x7x88xf32, #tpu.memory_space<vmem>>, vector<5x5x88xf32>
    %c0_703 = arith.constant 0 : index
    %c0_704 = arith.constant 0 : index
    %877 = vector.load %arg16[%c0_703, %c0_704] : memref<9x88xf32, #tpu.memory_space<vmem>>, vector<1x88xf32>
    %878 = vector.shape_cast %877 : vector<1x88xf32> to vector<1x1x88xf32>
    %879 = vector.broadcast %878 : vector<1x1x88xf32> to vector<5x5x88xf32>
    %880 = arith.mulf %876, %879 : vector<5x5x88xf32>
    %881 = arith.addf %875, %880 : vector<5x5x88xf32>
    %c0_705 = arith.constant 0 : index
    %c1_706 = arith.constant 1 : index
    %c0_707 = arith.constant 0 : index
    %882 = vector.load %arg23[%c0_705, %c1_706, %c0_707] : memref<7x7x88xf32, #tpu.memory_space<vmem>>, vector<5x5x88xf32>
    %c1_708 = arith.constant 1 : index
    %c0_709 = arith.constant 0 : index
    %883 = vector.load %arg16[%c1_708, %c0_709] : memref<9x88xf32, #tpu.memory_space<vmem>>, vector<1x88xf32>
    %884 = vector.shape_cast %883 : vector<1x88xf32> to vector<1x1x88xf32>
    %885 = vector.broadcast %884 : vector<1x1x88xf32> to vector<5x5x88xf32>
    %886 = arith.mulf %882, %885 : vector<5x5x88xf32>
    %887 = arith.addf %881, %886 : vector<5x5x88xf32>
    %c0_710 = arith.constant 0 : index
    %c2_711 = arith.constant 2 : index
    %c0_712 = arith.constant 0 : index
    %888 = vector.load %arg23[%c0_710, %c2_711, %c0_712] : memref<7x7x88xf32, #tpu.memory_space<vmem>>, vector<5x5x88xf32>
    %c2_713 = arith.constant 2 : index
    %c0_714 = arith.constant 0 : index
    %889 = vector.load %arg16[%c2_713, %c0_714] : memref<9x88xf32, #tpu.memory_space<vmem>>, vector<1x88xf32>
    %890 = vector.shape_cast %889 : vector<1x88xf32> to vector<1x1x88xf32>
    %891 = vector.broadcast %890 : vector<1x1x88xf32> to vector<5x5x88xf32>
    %892 = arith.mulf %888, %891 : vector<5x5x88xf32>
    %893 = arith.addf %887, %892 : vector<5x5x88xf32>
    %c1_715 = arith.constant 1 : index
    %c0_716 = arith.constant 0 : index
    %c0_717 = arith.constant 0 : index
    %894 = vector.load %arg23[%c1_715, %c0_716, %c0_717] : memref<7x7x88xf32, #tpu.memory_space<vmem>>, vector<5x5x88xf32>
    %c3_718 = arith.constant 3 : index
    %c0_719 = arith.constant 0 : index
    %895 = vector.load %arg16[%c3_718, %c0_719] : memref<9x88xf32, #tpu.memory_space<vmem>>, vector<1x88xf32>
    %896 = vector.shape_cast %895 : vector<1x88xf32> to vector<1x1x88xf32>
    %897 = vector.broadcast %896 : vector<1x1x88xf32> to vector<5x5x88xf32>
    %898 = arith.mulf %894, %897 : vector<5x5x88xf32>
    %899 = arith.addf %893, %898 : vector<5x5x88xf32>
    %c1_720 = arith.constant 1 : index
    %c1_721 = arith.constant 1 : index
    %c0_722 = arith.constant 0 : index
    %900 = vector.load %arg23[%c1_720, %c1_721, %c0_722] : memref<7x7x88xf32, #tpu.memory_space<vmem>>, vector<5x5x88xf32>
    %c4_723 = arith.constant 4 : index
    %c0_724 = arith.constant 0 : index
    %901 = vector.load %arg16[%c4_723, %c0_724] : memref<9x88xf32, #tpu.memory_space<vmem>>, vector<1x88xf32>
    %902 = vector.shape_cast %901 : vector<1x88xf32> to vector<1x1x88xf32>
    %903 = vector.broadcast %902 : vector<1x1x88xf32> to vector<5x5x88xf32>
    %904 = arith.mulf %900, %903 : vector<5x5x88xf32>
    %905 = arith.addf %899, %904 : vector<5x5x88xf32>
    %c1_725 = arith.constant 1 : index
    %c2_726 = arith.constant 2 : index
    %c0_727 = arith.constant 0 : index
    %906 = vector.load %arg23[%c1_725, %c2_726, %c0_727] : memref<7x7x88xf32, #tpu.memory_space<vmem>>, vector<5x5x88xf32>
    %c5_728 = arith.constant 5 : index
    %c0_729 = arith.constant 0 : index
    %907 = vector.load %arg16[%c5_728, %c0_729] : memref<9x88xf32, #tpu.memory_space<vmem>>, vector<1x88xf32>
    %908 = vector.shape_cast %907 : vector<1x88xf32> to vector<1x1x88xf32>
    %909 = vector.broadcast %908 : vector<1x1x88xf32> to vector<5x5x88xf32>
    %910 = arith.mulf %906, %909 : vector<5x5x88xf32>
    %911 = arith.addf %905, %910 : vector<5x5x88xf32>
    %c2_730 = arith.constant 2 : index
    %c0_731 = arith.constant 0 : index
    %c0_732 = arith.constant 0 : index
    %912 = vector.load %arg23[%c2_730, %c0_731, %c0_732] : memref<7x7x88xf32, #tpu.memory_space<vmem>>, vector<5x5x88xf32>
    %c6_733 = arith.constant 6 : index
    %c0_734 = arith.constant 0 : index
    %913 = vector.load %arg16[%c6_733, %c0_734] : memref<9x88xf32, #tpu.memory_space<vmem>>, vector<1x88xf32>
    %914 = vector.shape_cast %913 : vector<1x88xf32> to vector<1x1x88xf32>
    %915 = vector.broadcast %914 : vector<1x1x88xf32> to vector<5x5x88xf32>
    %916 = arith.mulf %912, %915 : vector<5x5x88xf32>
    %917 = arith.addf %911, %916 : vector<5x5x88xf32>
    %c2_735 = arith.constant 2 : index
    %c1_736 = arith.constant 1 : index
    %c0_737 = arith.constant 0 : index
    %918 = vector.load %arg23[%c2_735, %c1_736, %c0_737] : memref<7x7x88xf32, #tpu.memory_space<vmem>>, vector<5x5x88xf32>
    %c7_738 = arith.constant 7 : index
    %c0_739 = arith.constant 0 : index
    %919 = vector.load %arg16[%c7_738, %c0_739] : memref<9x88xf32, #tpu.memory_space<vmem>>, vector<1x88xf32>
    %920 = vector.shape_cast %919 : vector<1x88xf32> to vector<1x1x88xf32>
    %921 = vector.broadcast %920 : vector<1x1x88xf32> to vector<5x5x88xf32>
    %922 = arith.mulf %918, %921 : vector<5x5x88xf32>
    %923 = arith.addf %917, %922 : vector<5x5x88xf32>
    %c2_740 = arith.constant 2 : index
    %c2_741 = arith.constant 2 : index
    %c0_742 = arith.constant 0 : index
    %924 = vector.load %arg23[%c2_740, %c2_741, %c0_742] : memref<7x7x88xf32, #tpu.memory_space<vmem>>, vector<5x5x88xf32>
    %c8_743 = arith.constant 8 : index
    %c0_744 = arith.constant 0 : index
    %925 = vector.load %arg16[%c8_743, %c0_744] : memref<9x88xf32, #tpu.memory_space<vmem>>, vector<1x88xf32>
    %926 = vector.shape_cast %925 : vector<1x88xf32> to vector<1x1x88xf32>
    %927 = vector.broadcast %926 : vector<1x1x88xf32> to vector<5x5x88xf32>
    %928 = arith.mulf %924, %927 : vector<5x5x88xf32>
    %929 = arith.addf %923, %928 : vector<5x5x88xf32>
    %cst_745 = arith.constant 0.000000e+00 : f32
    %930 = vector.broadcast %cst_745 : f32 to vector<5x5x88xf32>
    %931 = arith.maximumf %929, %930 : vector<5x5x88xf32>
    %932 = vector.shape_cast %931 : vector<5x5x88xf32> to vector<25x88xf32>
    %c0_746 = arith.constant 0 : index
    %c0_747 = arith.constant 0 : index
    %933 = vector.load %arg17[%c0_746, %c0_747] : memref<88x24xbf16, #tpu.memory_space<vmem>>, vector<88x24xbf16>
    %934 = arith.truncf %932 : vector<25x88xf32> to vector<25x88xbf16>
    %cst_748 = arith.constant dense<0.000000e+00> : vector<25x24xf32>
    %935 = tpu.matmul %934, %933, %cst_748 {dimension_numbers = #tpu.dot_dimension_numbers<[1], [0], [0], [1], [0, 0, 1, 1], [], []>} : vector<25x88xbf16>, vector<88x24xbf16>, vector<25x24xf32> -> vector<25x24xf32>
    %cst_749 = arith.constant 0.000000e+00 : f32
    %936 = vector.broadcast %cst_749 : f32 to vector<25x24xf32>
    %937 = arith.maximumf %935, %936 : vector<25x24xf32>
    %938 = vector.shape_cast %937 : vector<25x24xf32> to vector<5x5x24xf32>
    %c0_750 = arith.constant 0 : index
    %c0_751 = arith.constant 0 : index
    %c0_752 = arith.constant 0 : index
    %c0_753 = arith.constant 0 : index
    %939 = vector.load %arg18[%c0_750, %c0_751, %c0_752, %c0_753] : memref<1x5x5x24xf32, #tpu.memory_space<vmem>>, vector<1x5x5x24xf32>
    %940 = vector.shape_cast %939 : vector<1x5x5x24xf32> to vector<5x5x24xf32>
    %941 = vector.shape_cast %938 : vector<5x5x24xf32> to vector<1x5x5x24xf32>
    tpu.vector_store %arg18[%c0_750, %c0_751, %c0_752, %c0_753], %941 {strides = array<i32>} : memref<1x5x5x24xf32, #tpu.memory_space<vmem>>, vector<1x5x5x24xf32>,
    return
  }
  func.func @transform_0(%arg0: i32) -> (i32, i32, i32) {
    %c0_i32 = arith.constant 0 : i32
    %c0_i32_0 = arith.constant 0 : i32
    %c0_i32_1 = arith.constant 0 : i32
    return %arg0, %c0_i32, %c0_i32_0 : i32, i32, i32
  }
  func.func @transform_1(%arg0: i32) -> (i32, i32) {
    %c0_i32 = arith.constant 0 : i32
    %c0_i32_0 = arith.constant 0 : i32
    %c0_i32_1 = arith.constant 0 : i32
    return %c0_i32, %c0_i32_0 : i32, i32
  }
  func.func @transform_2(%arg0: i32) -> (i32, i32) {
    %c0_i32 = arith.constant 0 : i32
    %c0_i32_0 = arith.constant 0 : i32
    %c0_i32_1 = arith.constant 0 : i32
    return %c0_i32, %c0_i32_0 : i32, i32
  }
  func.func @transform_3(%arg0: i32) -> (i32, i32) {
    %c0_i32 = arith.constant 0 : i32
    %c0_i32_0 = arith.constant 0 : i32
    %c0_i32_1 = arith.constant 0 : i32
    return %c0_i32, %c0_i32_0 : i32, i32
  }
  func.func @transform_4(%arg0: i32) -> (i32, i32) {
    %c0_i32 = arith.constant 0 : i32
    %c0_i32_0 = arith.constant 0 : i32
    %c0_i32_1 = arith.constant 0 : i32
    return %c0_i32, %c0_i32_0 : i32, i32
  }
  func.func @transform_5(%arg0: i32) -> (i32, i32) {
    %c0_i32 = arith.constant 0 : i32
    %c0_i32_0 = arith.constant 0 : i32
    %c0_i32_1 = arith.constant 0 : i32
    return %c0_i32, %c0_i32_0 : i32, i32
  }
  func.func @transform_6(%arg0: i32) -> (i32, i32) {
    %c0_i32 = arith.constant 0 : i32
    %c0_i32_0 = arith.constant 0 : i32
    %c0_i32_1 = arith.constant 0 : i32
    return %c0_i32, %c0_i32_0 : i32, i32
  }
  func.func @transform_7(%arg0: i32) -> (i32, i32) {
    %c0_i32 = arith.constant 0 : i32
    %c0_i32_0 = arith.constant 0 : i32
    %c0_i32_1 = arith.constant 0 : i32
    return %c0_i32, %c0_i32_0 : i32, i32
  }
  func.func @transform_8(%arg0: i32) -> (i32, i32) {
    %c0_i32 = arith.constant 0 : i32
    %c0_i32_0 = arith.constant 0 : i32
    %c0_i32_1 = arith.constant 0 : i32
    return %c0_i32, %c0_i32_0 : i32, i32
  }
  func.func @transform_9(%arg0: i32) -> (i32, i32) {
    %c0_i32 = arith.constant 0 : i32
    %c0_i32_0 = arith.constant 0 : i32
    %c0_i32_1 = arith.constant 0 : i32
    return %c0_i32, %c0_i32_0 : i32, i32
  }
  func.func @transform_10(%arg0: i32) -> (i32, i32) {
    %c0_i32 = arith.constant 0 : i32
    %c0_i32_0 = arith.constant 0 : i32
    %c0_i32_1 = arith.constant 0 : i32
    return %c0_i32, %c0_i32_0 : i32, i32
  }
  func.func @transform_11(%arg0: i32) -> (i32, i32) {
    %c0_i32 = arith.constant 0 : i32
    %c0_i32_0 = arith.constant 0 : i32
    %c0_i32_1 = arith.constant 0 : i32
    return %c0_i32, %c0_i32_0 : i32, i32
  }
  func.func @transform_12(%arg0: i32) -> (i32, i32) {
    %c0_i32 = arith.constant 0 : i32
    %c0_i32_0 = arith.constant 0 : i32
    %c0_i32_1 = arith.constant 0 : i32
    return %c0_i32, %c0_i32_0 : i32, i32
  }
  func.func @transform_13(%arg0: i32) -> (i32, i32) {
    %c0_i32 = arith.constant 0 : i32
    %c0_i32_0 = arith.constant 0 : i32
    %c0_i32_1 = arith.constant 0 : i32
    return %c0_i32, %c0_i32_0 : i32, i32
  }
  func.func @transform_14(%arg0: i32) -> (i32, i32) {
    %c0_i32 = arith.constant 0 : i32
    %c0_i32_0 = arith.constant 0 : i32
    %c0_i32_1 = arith.constant 0 : i32
    return %c0_i32, %c0_i32_0 : i32, i32
  }
  func.func @transform_15(%arg0: i32) -> (i32, i32) {
    %c0_i32 = arith.constant 0 : i32
    %c0_i32_0 = arith.constant 0 : i32
    %c0_i32_1 = arith.constant 0 : i32
    return %c0_i32, %c0_i32_0 : i32, i32
  }
  func.func @transform_16(%arg0: i32) -> (i32, i32) {
    %c0_i32 = arith.constant 0 : i32
    %c0_i32_0 = arith.constant 0 : i32
    %c0_i32_1 = arith.constant 0 : i32
    return %c0_i32, %c0_i32_0 : i32, i32
  }
  func.func @transform_17(%arg0: i32) -> (i32, i32, i32, i32) {
    %c0_i32 = arith.constant 0 : i32
    %c0_i32_0 = arith.constant 0 : i32
    %c0_i32_1 = arith.constant 0 : i32
    %c0_i32_2 = arith.constant 0 : i32
    return %arg0, %c0_i32, %c0_i32_0, %c0_i32_1 : i32, i32, i32, i32
  }
}

</mosaic_0001>

<bundles_post_ra>
// kernel: tpu_custom_call.1
= control target key start
LH: loop header
LB: loop body
LE: loop exit
PB: predicated region body
PF: predicated region fallthrough
CT: control target
= control target key end

     0   :  { %s6097_s24 = smov 0   ;;  %s7290_s0 = inlined_call_operand.vmem [shape: f32[2,256,27], index: 0, kind: input, shape index: {}]   ;;  %s7291_s1 = inlined_call_operand.vmem [shape: bf16[27,16], index: 1, kind: input, shape index: {}]   ;;  %s7292_s2 = inlined_call_operand.vmem [shape: f32[1,16], index: 2, kind: input, shape index: {}]   ;;  %s7293_s3 = inlined_call_operand.vmem [shape: f32[9,16], index: 3, kind: input, shape index: {}]   ;;  %s7294_s4 = inlined_call_operand.vmem [shape: f32[1,16], index: 4, kind: input, shape index: {}]   ;;  %s7295_s5 = inlined_call_operand.vmem [shape: bf16[16,8], index: 5, kind: input, shape index: {}]   ;;  %s7296_s6 = inlined_call_operand.vmem [shape: f32[1,8], index: 6, kind: input, shape index: {}]   ;;  %s7297_s7 = inlined_call_operand.vmem [shape: bf16[8,16], index: 7, kind: input, shape index: {}]   ;;  %s7298_s8 = inlined_call_operand.vmem [shape: f32[1,16], index: 8, kind: input, shape index: {}]   ;;  %s7299_s9 = inlined_call_operand.vmem [shape: bf16[16,16], index: 9, kind: input, shape index: {}]   ;;  %s7300_s10 = inlined_call_operand.vmem [shape: f32[1,16], index: 10, kind: input, shape index: {}]   ;;  %s7301_s11 = inlined_call_operand.vmem [shape: bf16[16,72], index: 11, kind: input, shape index: {}]   ;;  %s7302_s12 = inlined_call_operand.vmem [shape: f32[9,72], index: 12, kind: input, shape index: {}]   ;;  %s7303_s13 = inlined_call_operand.vmem [shape: bf16[72,24], index: 13, kind: input, shape index: {}]   ;;  %s7304_s14 = inlined_call_operand.vmem [shape: bf16[24,88], index: 14, kind: input, shape index: {}]   ;;  %s7305_s15 = inlined_call_operand.vmem [shape: f32[9,88], index: 15, kind: input, shape index: {}]   ;;  %s7306_s16 = inlined_call_operand.vmem [shape: bf16[88,24], index: 16, kind: input, shape index: {}]   ;;  %s7307_s17 = inlined_call_operand.vmem [shape: f32[2,5,5,24], index: 17, kind: output, shape index: {}]  }
   0x1   :  { %7309 = sst [smem:[#allocation7_spill]] %s7290_s0 }
   0x2   :  { %7310 = sst [smem:[#allocation8_spill]] %s7291_s1 }
   0x3 LB: > { %s5400_s25 = sadd.s32 4294967295, %s5999_s24   ;;  %p5404_p0 = scmp.ge.s32.totalorder %s5999_s24, 1  ;;  %s5999_s24 = sphi %s6097_s24, %s27_s24  }
   0x4   : > { %p487_p1 = scmp.lt.s32.totalorder %s5999_s24, 3 }
   0x6   : > { %p488_p2 = pnand %p5404_p0, %p487_p1 }
   0x7   : > { %s7311_s28 = sld [smem:[#allocation8_spill]] (!%p488_p2)  ;;  %vm669_vm0 = vcmask (!%p488_p2), 1044480   ;;  %vm670_vm1 = vcmask (!%p488_p2), 1045504   ;;  %p539_p3 = scmp.lt.s32.totalorder (!%p488_p2), %s5400_s25, 1  ;;  %v6001_v2 = vmov (!%p488_p2), 65535   ;;  %vm620_vm2 = vcmask (!%p488_p2), 220160  }
   0x8   : > { %491 = sbr.rel (%p488_p2) target bundleno = 2556 (0x9fc), region = 88  ;;  %v671_v3 = vsel (!%p488_p2), %vm669_vm0, 4294967295, %v6001_v2  ;;  %s7312_s1 = sld [smem:[#allocation7_spill]] (!%p488_p2)  ;;  %vm997_vm3 = vcmask (!%p488_p2), 130048   ;;  %v6002_v54 = vmov (!%p488_p2), 0.0   ;;  %vm1000_vm4 = vcmask (!%p488_p2), 123904  }
   0x9   : > { %v672_v4 = vsel (!%p488_p2), %vm670_vm1, %v671_v3, 0  ;;  %1005 = vst.msk [vmem:[#allocation2 + $0x30] sm:$0xff] (!%p488_p2), %vm997_vm3, %v6002_v54  ;;  %1006 = vst.msk [vmem:[#allocation2 + $0x38] sm:$0xff] (!%p488_p2), %vm997_vm3, %v6002_v54  ;;  %v6003_v55 = vmov (!%p488_p2), 0.0|0.0   ;;  %vm6004_vm5 = vmmov (!%p488_p2), 0   ;;  %vm2579_vm7 = vcmask (!%p488_p2), 1043456  }
   0xa   : > { %998 = vst.msk [vmem:[#allocation2] sm:$0xff] (!%p488_p2), %vm997_vm3, %v6002_v54  ;;  %999 = vst.msk [vmem:[#allocation2 + $0x8] sm:$0xff] (!%p488_p2), %vm997_vm3, %v6002_v54  ;;  %5905 = vmatprep.subr.bf16.mxu1 (!%p488_p2), %v6003_v55  ;;  %5748 = vmatprep.mubr.msk.f32.mxu1 (!%p488_p2), %vm6004_vm5, %v6002_v54  ;;  %v6278_v56 = vld [vmem:[%s7292_s2] ss:$0 sm:$0xff] (!%p488_p2)  ;;  %v6288_v61 = vld [vmem:[%s7293_s3 + $0x1] ss:$0 sm:$0xff] (!%p488_p2) }
   0xb   : > { %1002 = vst.msk [vmem:[#allocation2 + $0x18] sm:$0xff] (!%p488_p2), %vm997_vm3, %v6002_v54  ;;  %1003 = vst.msk [vmem:[#allocation2 + $0x20] sm:$0xff] (!%p488_p2), %vm997_vm3, %v6002_v54  ;;  %v6283_v59 = vld [vmem:[%s7293_s3] ss:$0 sm:$0xff] (!%p488_p2)  ;;  %vm2575_vm8 = vcmask (!%p488_p2), 64512   ;;  %vm2834_vm9 = vcmask (!%p488_p2), 588800  }
   0xc   : > { %1008 = vst.msk [vmem:[#allocation2 + $0x48] sm:$0xff] (!%p488_p2), %vm997_vm3, %v6002_v54  ;;  %1009 = vst.msk [vmem:[#allocation2 + $0x50] sm:$0xff] (!%p488_p2), %vm997_vm3, %v6002_v54  ;;  %vm2836_vm10 = vcmask (!%p488_p2), 584704   ;;  %vm2972_vm11 = vcmask (!%p488_p2), 1041408   ;;  %vm2969_vm12 = vcmask (!%p488_p2), 80896   ;;  %vm6005_vm13 = vmmov (!%p488_p2), 1  }
   0xd   : > { %v5967_v0 = vld [vmem:[%s7311_s28] sm:$0xff] (!%p488_p2)   ;;  %v5968_v1 = vld [vmem:[%s7311_s28 + $0x8] sm:$0x3f] (!%p488_p2)   ;;  %1011 = vst.msk [vmem:[#allocation2 + $0x60] sm:$0xff] (!%p488_p2), %vm997_vm3, %v6002_v54  ;;  %1012 = vst.msk [vmem:[#allocation2 + $0x68] sm:$0xff] (!%p488_p2), %vm997_vm3, %v6002_v54  ;;  %vm3047_vm15 = vcmask (!%p488_p2), 585728  }
   0xe   : > { %5708 = vmatprep.subr.bf16.mxu0 (!%p488_p2), %v5967_v0  ;;  %v674_v5 = vand.u32 (!%p488_p2), %v5968_v1, %v672_v4  ;;  %1014 = vst.msk [vmem:[#allocation2 + $0x78] sm:$0xff] (!%p488_p2), %vm997_vm3, %v6002_v54  ;;  %1015 = vst.msk [vmem:[#allocation2 + $0x80] sm:$0xff] (!%p488_p2), %vm997_vm3, %v6002_v54  ;;  %v1087_v4 = vlaneseq (!%p488_p2)  ;;  %vm3871_vm0 = vcmask (!%p488_p2), 195584   ;;  %vm3934_vm1 = vcmask (!%p488_p2), 718848  }
   0xf   : > { %5709 = vmatpush3.bf16.msra.mxu0 %v5967_v0  ;;  %s7318_s25 = smov (!%p539_p3, %s5400_s25), 1  ;;  %1017 = vst.msk [vmem:[#allocation2 + $0x90] sm:$0xff] %vm997_vm3, %v6002_v54  ;;  %1018 = vst.msk [vmem:[#allocation2 + $0x98] sm:$0xff] %vm997_vm3, %v6002_v54 }
  0x10   : > { %s5617_s30 = sshll.u32 %s7318_s25, 8  ;;  %5710 = vmatprep.subr.bf16.mxu0 %v674_v5  ;;  %1020 = vst.msk [vmem:[#allocation2 + $0xa8] sm:$0xff] %vm997_vm3, %v6002_v54  ;;  %1021 = vst.msk [vmem:[#allocation2 + $0xb0] sm:$0xff] %vm997_vm3, %v6002_v54  ;;  %s5952_s27 = smul.u32 40, %s7318_s25 }
  0x11   : > { %s6117_s20 = scalar_lea.vmem %s7312_s1, %s5617_s30  ;;  %1023 = vst.msk [vmem:[#allocation2 + $0xc0] sm:$0xff] %vm997_vm3, %v6002_v54  ;;  %1024 = vst.msk [vmem:[#allocation2 + $0xc8] sm:$0xff] %vm997_vm3, %v6002_v54  ;;  %v1095_v57 = vld [vmem:[#allocation2] sm:$0xff]  ;;  %v1096_v0 = vld [vmem:[#allocation2 + $0x8] sm:$0xff] }
  0x12   : > { %v550_v6 = vld [vmem:[%s6117_s20] sm:$0xff]  ;;  %v551_v7 = vld [vmem:[%s6117_s20 + $0x8] sm:$0xff]  ;;  %v552_v8 = vld [vmem:[%s6117_s20 + $0x10] sm:$0xff]  ;;  %1026 = vst.msk [vmem:[#allocation2 + $0xd8] sm:$0xff] %vm997_vm3, %v6002_v54  ;;  %s7256_s0 = scalar_lea.vmem %s7307_s17, %s5952_s27 }
  0x13   : > { %5711 = vmatpush3.bf16.msra.mxu0 %v674_v5  ;;  %v587_v9 = vpack.c.bf16 %v551_v7, %v550_v6  ;;  %v553_v10 = vld [vmem:[%s6117_s20 + $0x18] sm:$0xff]  ;;  %v554_v11 = vld [vmem:[%s6117_s20 + $0x20] sm:$0xff]  ;;  %v555_v12 = vld [vmem:[%s6117_s20 + $0x28] sm:$0xff]  ;;  %1027 = vst.msk [vmem:[#allocation2 + $0xe0] sm:$0xff] %vm997_vm3, %v6002_v54 }
  0x14   : > { %v588_v13 = vpack.c.bf16 %v553_v10, %v552_v8  ;;  %v589_v14 = vpack.c.bf16 %v555_v12, %v554_v11  ;;  %v556_v15 = vld [vmem:[%s6117_s20 + $0x30] sm:$0xff]  ;;  %v557_v16 = vld [vmem:[%s6117_s20 + $0x38] sm:$0xff]  ;;  %v558_v17 = vld [vmem:[%s6117_s20 + $0x40] sm:$0xff]  ;;  %1029 = vst.msk [vmem:[#allocation2 + $0xf0] sm:$0xff] %vm997_vm3, %v6002_v54  ;;  %5929 = vmatprep.subr.bf16.mxu0 %v6003_v55  ;;  %v1102_v8 = vmul.f32 %v6283_v59, %v1095_v57 }
  0x15   : > { %5712 = vmatprep.mubr.msk.bf16.mxu0 %vm620_vm2, %v587_v9  ;;  %v559_v18 = vld [vmem:[%s6117_s20 + $0x48] sm:$0xff]  ;;  %v590_v19 = vpack.c.bf16 %v557_v16, %v556_v15  ;;  %v560_v21 = vld [vmem:[%s6117_s20 + $0x50] sm:$0xff]  ;;  %v561_v22 = vld [vmem:[%s6117_s20 + $0x58] sm:$0xff]  ;;  %1030 = vst.msk [vmem:[#allocation2 + $0xf8] sm:$0xff] %vm997_vm3, %v6002_v54  ;;  %v1103_v12 = vmul.f32 %v6283_v59, %v1096_v0 }
  0x16   : > { %5713 = vmatmul.mubr.msk.bf16.vlgmr.msra.gmra.mrb[0].mxu0 %vm620_vm2, %v588_v13  ;;  %v591_v20 = vpack.c.bf16 %v559_v18, %v558_v17  ;;  %v562_v23 = vld [vmem:[%s6117_s20 + $0x60] sm:$0xff]  ;;  %v563_v24 = vld [vmem:[%s6117_s20 + $0x68] sm:$0xff]  ;;  %v592_v25 = vpack.c.bf16 %v561_v22, %v560_v21  ;;  %v564_v27 = vld [vmem:[%s6117_s20 + $0x70] sm:$0xff]  ;;  %1032 = vst.msk [vmem:[#allocation2 + $0x108] sm:$0xff] %vm997_vm3, %v6002_v54 }
  0x17   : > { %5716 = vmatprep.mubr.msk.bf16.mxu0 %vm620_vm2, %v589_v14  ;;  %v593_v26 = vpack.c.bf16 %v563_v24, %v562_v23  ;;  %v565_v28 = vld [vmem:[%s6117_s20 + $0x78] sm:$0xff]  ;;  %v566_v29 = vld [vmem:[%s6117_s20 + $0x80] sm:$0xff]  ;;  %v567_v30 = vld [vmem:[%s6117_s20 + $0x88] sm:$0xff]  ;;  %1033 = vst.msk [vmem:[#allocation2 + $0x110] sm:$0xff] %vm997_vm3, %v6002_v54 }
  0x18   : > { %v594_v31 = vpack.c.bf16 %v565_v28, %v564_v27  ;;  %v595_v32 = vpack.c.bf16 %v567_v30, %v566_v29  ;;  %v568_v33 = vld [vmem:[%s6117_s20 + $0x90] sm:$0xff]  ;;  %v569_v34 = vld [vmem:[%s6117_s20 + $0x98] sm:$0xff]  ;;  %v570_v35 = vld [vmem:[%s6117_s20 + $0xa0] sm:$0xff]  ;;  %1035 = vst.msk [vmem:[#allocation2 + $0x120] sm:$0xff] %vm997_vm3, %v6002_v54 }
  0x19   : > { %v571_v36 = vld [vmem:[%s6117_s20 + $0xa8] sm:$0xff]  ;;  %v596_v37 = vpack.c.bf16 %v569_v34, %v568_v33  ;;  %v572_v39 = vld [vmem:[%s6117_s20 + $0xb0] sm:$0xff]  ;;  %v573_v40 = vld [vmem:[%s6117_s20 + $0xb8] sm:$0xff]  ;;  %1036 = vst.msk [vmem:[#allocation2 + $0x128] sm:$0xff] %vm997_vm3, %v6002_v54  ;;  %v1090_v33 = vand.u32 127, %v1087_v4 }
  0x1a   : > { %v597_v38 = vpack.c.bf16 %v571_v36, %v570_v35  ;;  %v574_v41 = vld [vmem:[%s6117_s20 + $0xc0] sm:$0xff]  ;;  %v575_v42 = vld [vmem:[%s6117_s20 + $0xc8] sm:$0xff]  ;;  %v598_v43 = vpack.c.bf16 %v573_v40, %v572_v39  ;;  %v576_v45 = vld [vmem:[%s6117_s20 + $0xd0] sm:$0xff]  ;;  %1038 = vst.msk [vmem:[#allocation2 + $0x138] sm:$0xff] %vm997_vm3, %v6002_v54 }
  0x1b   : > { %v599_v44 = vpack.c.bf16 %v575_v42, %v574_v41  ;;  %v577_v46 = vld [vmem:[%s6117_s20 + $0xd8] sm:$0xff]  ;;  %v578_v47 = vld [vmem:[%s6117_s20 + $0xe0] sm:$0xff]  ;;  %v579_v48 = vld [vmem:[%s6117_s20 + $0xe8] sm:$0xff]  ;;  %1039 = vst.msk [vmem:[#allocation2 + $0x140] sm:$0xff] %vm997_vm3, %v6002_v54 }
  0x1c   : > { %v600_v49 = vpack.c.bf16 %v577_v46, %v576_v45  ;;  %v601_v50 = vpack.c.bf16 %v579_v48, %v578_v47  ;;  %v580_v51 = vld [vmem:[%s6117_s20 + $0xf0] sm:$0xff]  ;;  %v581_v52 = vld [vmem:[%s6117_s20 + $0xf8] sm:$0xff]  ;;  %1041 = vst.msk [vmem:[#allocation2 + $0x150] sm:$0xff] %vm997_vm3, %v6002_v54  ;;  %1042 = vst.msk [vmem:[#allocation2 + $0x158] sm:$0xff] %vm997_vm3, %v6002_v54 }
  0x1d   : > { %v602_v53 = vpack.c.bf16 %v581_v52, %v580_v51  ;;  %1044 = vst.msk [vmem:[#allocation2 + $0x168] sm:$0xff] %vm997_vm3, %v6002_v54  ;;  %1045 = vst.msk [vmem:[#allocation2 + $0x170] sm:$0xff] %vm997_vm3, %v6002_v54  ;;  %v1106_v60 = vld [vmem:[#allocation2 + $0x1] sm:$0xff] }
  0x1e   : > { %5717 = vmatmul.mubr.msk.bf16.gmra.mrb[4].mxu0 %vm620_vm2, %v590_v19  ;;  %1047 = vst.msk [vmem:[#allocation2 + $0x180] sm:$0xff] %vm997_vm3, %v6002_v54  ;;  %1048 = vst.msk [vmem:[#allocation2 + $0x188] sm:$0xff] %vm997_vm3, %v6002_v54  ;;  %v1113_v9 = vmul.f32 %v6288_v61, %v1106_v60  ;;  %v1117_v16 = vld [vmem:[#allocation2 + $0x2] sm:$0xff] }
  0x1f   : > { %5720 = vmatprep.mubr.msk.bf16.mxu0 %vm620_vm2, %v591_v20  ;;  %1007 = vst.msk [vmem:[#allocation2 + $0x40] sm:$0x3] %vm1000_vm4, %v6002_v54  ;;  %1001 = vst.msk [vmem:[#allocation2 + $0x10] sm:$0x3] %vm1000_vm4, %v6002_v54  ;;  %v6301_v17 = vld [vmem:[%s7293_s3 + $0x2] ss:$0 sm:$0xff] }
  0x20   : > { %1004 = vst.msk [vmem:[#allocation2 + $0x28] sm:$0x3] %vm1000_vm4, %v6002_v54  ;;  %1010 = vst.msk [vmem:[#allocation2 + $0x58] sm:$0x3] %vm1000_vm4, %v6002_v54  ;;  %v6303_v20 = vshrl.u32 %v1087_v4, 7  ;;  %v1115_v23 = vadd.f32 %v1113_v9, %v1102_v8  ;;  %v1124_v28 = vmul.f32 %v6301_v17, %v1117_v16 }
  0x21   : > { %1013 = vst.msk [vmem:[#allocation2 + $0x70] sm:$0x3] %vm1000_vm4, %v6002_v54  ;;  %1016 = vst.msk [vmem:[#allocation2 + $0x88] sm:$0x3] %vm1000_vm4, %v6002_v54 }
  0x22   : > { %1019 = vst.msk [vmem:[#allocation2 + $0xa0] sm:$0x3] %vm1000_vm4, %v6002_v54  ;;  %1022 = vst.msk [vmem:[#allocation2 + $0xb8] sm:$0x3] %vm1000_vm4, %v6002_v54  ;;  %v1091_v39 = vmul.u32 2, %v6303_v20 }
  0x23   : > { %1025 = vst.msk [vmem:[#allocation2 + $0xd0] sm:$0x3] %vm1000_vm4, %v6002_v54  ;;  %1028 = vst.msk [vmem:[#allocation2 + $0xe8] sm:$0x3] %vm1000_vm4, %v6002_v54 }
  0x24   : > { %1031 = vst.msk [vmem:[#allocation2 + $0x100] sm:$0x3] %vm1000_vm4, %v6002_v54  ;;  %1034 = vst.msk [vmem:[#allocation2 + $0x118] sm:$0x3] %vm1000_vm4, %v6002_v54  ;;  %vm6315_vm6 = vcmp.eq.s32.totalorder %v1090_v33, %v1091_v39 }
  0x25   : > { %1037 = vst.msk [vmem:[#allocation2 + $0x130] sm:$0x3] %vm1000_vm4, %v6002_v54  ;;  %1040 = vst.msk [vmem:[#allocation2 + $0x148] sm:$0x3] %vm1000_vm4, %v6002_v54 }
  0x26   : > { %5721 = vmatmul.mubr.msk.bf16.gmra.mrb[8].mxu0 %vm620_vm2, %v592_v25  ;;  %1043 = vst.msk [vmem:[#allocation2 + $0x160] sm:$0x3] %vm1000_vm4, %v6002_v54  ;;  %1046 = vst.msk [vmem:[#allocation2 + $0x178] sm:$0x3] %vm1000_vm4, %v6002_v54  ;;  %v1107_v1 = vld [vmem:[#allocation2 + $0x9] sm:$0xff] }
  0x27   : > { %5724 = vmatprep.mubr.msk.bf16.mxu0 %vm620_vm2, %v593_v26  ;;  %1049 = vst.msk [vmem:[#allocation2 + $0x190] sm:$0x3] %vm1000_vm4, %v6002_v54  ;;  %v1114_v13 = vmul.f32 %v6288_v61, %v1107_v1  ;;  %vm6869_vm14 = vmpackc.low %vm2972_vm11, %vm6005_vm13  ;;  %vm5339_vm4 = vcmask 192512  }
  0x28   : > { %2844 = vst.msk [vmem:[#allocation4 + $0x40] sm:$0xff] %vm2834_vm9, %v6002_v54  ;;  %2835 = vst.msk [vmem:[#allocation4] sm:$0xff] %vm2834_vm9, %v6002_v54 }
  0x29   : > { %v1116_v27 = vadd.f32 %v1114_v13, %v1103_v12  ;;  %v6325_v13 = vld [vmem:[%s7293_s3 + $0x6] ss:$0 sm:$0xff]  ;;  %2845 = vst.msk [vmem:[#allocation4 + $0x48] sm:$0xf] %vm2836_vm10, %v6002_v54  ;;  %2837 = vst.msk [vmem:[#allocation4 + $0x8] sm:$0xf] %vm2836_vm10, %v6002_v54 }
  0x2a   : > { %2838 = vst.msk [vmem:[#allocation4 + $0x10] sm:$0xff] %vm2834_vm9, %v6002_v54  ;;  %2840 = vst.msk [vmem:[#allocation4 + $0x20] sm:$0xff] %vm2834_vm9, %v6002_v54 }
  0x2b   : > { %2839 = vst.msk [vmem:[#allocation4 + $0x18] sm:$0xf] %vm2836_vm10, %v6002_v54  ;;  %2841 = vst.msk [vmem:[#allocation4 + $0x28] sm:$0xf] %vm2836_vm10, %v6002_v54 }
  0x2c   : > { %2842 = vst.msk [vmem:[#allocation4 + $0x30] sm:$0xff] %vm2834_vm9, %v6002_v54  ;;  %2846 = vst.msk [vmem:[#allocation4 + $0x50] sm:$0xff] %vm2834_vm9, %v6002_v54 }
  0x2d   : > { %2843 = vst.msk [vmem:[#allocation4 + $0x38] sm:$0xf] %vm2836_vm10, %v6002_v54  ;;  %2847 = vst.msk [vmem:[#allocation4 + $0x58] sm:$0xf] %vm2836_vm10, %v6002_v54 }
  0x2e   : > { %5725 = vmatmul.mubr.msk.bf16.gmra.mrb[12].mxu0 %vm620_vm2, %v594_v31  ;;  %2848 = vst.msk [vmem:[#allocation4 + $0x60] sm:$0xff] %vm2834_vm9, %v6002_v54  ;;  %2850 = vst.msk [vmem:[#allocation4 + $0x70] sm:$0xff] %vm2834_vm9, %v6002_v54 }
  0x2f   : > { %5728 = vmatprep.mubr.msk.bf16.mxu0 %vm620_vm2, %v595_v32  ;;  %2849 = vst.msk [vmem:[#allocation4 + $0x68] sm:$0xf] %vm2836_vm10, %v6002_v54  ;;  %2851 = vst.msk [vmem:[#allocation4 + $0x78] sm:$0xf] %vm2836_vm10, %v6002_v54 }
  0x30   : > { %2852 = vst.msk [vmem:[#allocation4 + $0x80] sm:$0xff] %vm2834_vm9, %v6002_v54  ;;  %2854 = vst.msk [vmem:[#allocation4 + $0x90] sm:$0xff] %vm2834_vm9, %v6002_v54 }
  0x31   : > { %2853 = vst.msk [vmem:[#allocation4 + $0x88] sm:$0xf] %vm2836_vm10, %v6002_v54  ;;  %2855 = vst.msk [vmem:[#allocation4 + $0x98] sm:$0xf] %vm2836_vm10, %v6002_v54 }
  0x32   : > { %2856 = vst.msk [vmem:[#allocation4 + $0xa0] sm:$0xff] %vm2834_vm9, %v6002_v54 }
  0x33   : > { %2857 = vst.msk [vmem:[#allocation4 + $0xa8] sm:$0xf] %vm2836_vm10, %v6002_v54 }
  0x34   : > { %3935 = vst.msk [vmem:[#allocation6] sm:$0x7f] %vm3934_vm1, %v6002_v54  ;;  %3936 = vst.msk [vmem:[#allocation6 + $0x8] sm:$0x7f] %vm3934_vm1, %v6002_v54 }
  0x35   : > { %3941 = vst.msk [vmem:[#allocation6 + $0x30] sm:$0x7f] %vm3934_vm1, %v6002_v54  ;;  %3937 = vst.msk [vmem:[#allocation6 + $0x10] sm:$0x7f] %vm3934_vm1, %v6002_v54 }
  0x36   : > { %5729 = vmatmul.mubr.msk.bf16.gmra.mrb[16].mxu0 %vm620_vm2, %v596_v37  ;;  %3938 = vst.msk [vmem:[#allocation6 + $0x18] sm:$0x7f] %vm3934_vm1, %v6002_v54  ;;  %3939 = vst.msk [vmem:[#allocation6 + $0x20] sm:$0x7f] %vm3934_vm1, %v6002_v54 }
  0x37   : > { %5732 = vmatprep.mubr.msk.bf16.mxu0 %vm620_vm2, %v597_v38  ;;  %v1118_v38 = vld [vmem:[#allocation2 + $0xa] sm:$0xff]  ;;  %3940 = vst.msk [vmem:[#allocation6 + $0x28] sm:$0x7f] %vm3934_vm1, %v6002_v54 }
  0x38   : > { %v1125_v52 = vmul.f32 %v6301_v17, %v1118_v38 }
  0x3a   : > { %v1127_v8 = vadd.f32 %v1125_v52, %v1116_v27  ;;  %v6342_v27 = vld [vmem:[%s7293_s3 + $0x4] ss:$0 sm:$0xff] }
  0x3e   : > { %5733 = vmatmul.mubr.msk.bf16.gmra.mrb[20].mxu0 %vm620_vm2, %v598_v43 }
  0x3f   : > { %5736 = vmatprep.mubr.msk.bf16.mxu0 %vm620_vm2, %v599_v44 }
  0x46   : > { %5737 = vmatmul.mubr.msk.bf16.gmra.mrb[24].mxu0 %vm620_vm2, %v600_v49 }
  0x47   : > { %5740 = vmatprep.mubr.msk.bf16.mxu0 %vm620_vm2, %v601_v50 }
  0x4e   : > { %5741 = vmatmul.mubr.msk.bf16.gmra.mrb[28].mxu0 %vm620_vm2, %v602_v53  ;;  %vm4308_vm2 = vcmask 716800  }
  0x4f   : > { %5836 = vmatprep.mubr.msk.f32.mxu0 %vm6004_vm5, %v6002_v54 }
  0xe9   : > { %v5714_v58 = vpop.f32.mrb[0].mxu0 }
  0xea   : > { %v719_v62 = vadd.f32 %v5714_v58, %v6278_v56  ;;  %v710_v63 = vpop.f32.mrb[1].mxu0 }
  0xeb   : > { %v711_v2 = vadd.f32 %v6278_v56, %v710_v63  ;;  %v5715_v3 = vpop.f32.mrb[2].mxu0 }
  0xec   : > { %v839_v5 = vadd.f32 3.0, %v719_v62  ;;  %v722_v6 = vadd.f32 %v5715_v3, %v6278_v56  ;;  %v713_v7 = vpop.f32.mrb[3].mxu0  ;;  %v1126_v3 = vadd.f32 %v1124_v28, %v1115_v23 }
  0xed   : > { %v837_v10 = vadd.f32 3.0, %v711_v2  ;;  %v714_v11 = vadd.f32 %v6278_v56, %v713_v7 }
  0xee   : > { %v871_v14 = vmax.f32 %v839_v5, 0.0  ;;  %v840_v15 = vadd.f32 3.0, %v722_v6 }
  0xef   : > { %v869_v18 = vmax.f32 %v837_v10, 0.0  ;;  %v838_v19 = vadd.f32 3.0, %v714_v11 }
  0xf0   : > { %v903_v21 = vmin.f32 %v871_v14, 6.0  ;;  %v872_v22 = vmax.f32 %v840_v15, 0.0  ;;  %v6330_v14 = vsel %vm6315_vm6, 1.0, %v6002_v54 }
  0xf1   : > { %v901_v24 = vmin.f32 %v869_v18, 6.0  ;;  %v870_v25 = vmax.f32 %v838_v19, 0.0  ;;  %v5718_v26 = vpop.f32.mrb[4].mxu0 }
  0xf2   : > { %v935_v29 = vmul.f32 %v903_v21, %v719_v62  ;;  %v904_v30 = vmin.f32 %v872_v22, 6.0  ;;  %v735_v31 = vadd.f32 %v5718_v26, %v6278_v56  ;;  %v726_v32 = vpop.f32.mrb[5].mxu0  ;;  %v6336_v22 = vld [vmem:[%s7293_s3 + $0x3] ss:$0 sm:$0xff] }
  0xf3   : > { %v933_v34 = vmul.f32 %v901_v24, %v711_v2  ;;  %v902_v35 = vmin.f32 %v870_v25, 6.0  ;;  %v727_v36 = vadd.f32 %v6278_v56, %v726_v32  ;;  %v5719_v37 = vpop.f32.mrb[6].mxu0 }
  0xf4   : > { %v967_v40 = vmul.f32 0.16666667, %v935_v29  ;;  %v936_v41 = vmul.f32 %v904_v30, %v722_v6  ;;  %v843_v42 = vadd.f32 3.0, %v735_v31  ;;  %v738_v43 = vadd.f32 %v5719_v37, %v6278_v56  ;;  %v729_v44 = vpop.f32.mrb[7].mxu0 }
  0xf5   : > { %v965_v45 = vmul.f32 0.16666667, %v933_v34  ;;  %v934_v46 = vmul.f32 %v902_v35, %v714_v11  ;;  %v841_v47 = vadd.f32 3.0, %v727_v36  ;;  %v730_v48 = vadd.f32 %v6278_v56, %v729_v44 }
  0xf6   : > { %1056 = vst.msk [vmem:[#allocation2 + $0x31] sm:$0xff] %vm997_vm3, %v967_v40  ;;  %v968_v49 = vmul.f32 0.16666667, %v936_v41  ;;  %v875_v50 = vmax.f32 %v843_v42, 0.0  ;;  %v844_v51 = vadd.f32 3.0, %v738_v43 }
  0xf7   : > { %1054 = vst.msk [vmem:[#allocation2 + $0x19] sm:$0xff] %vm997_vm3, %v965_v45  ;;  %v966_v53 = vmul.f32 0.16666667, %v934_v46  ;;  %v873_v57 = vmax.f32 %v841_v47, 0.0  ;;  %v842_v58 = vadd.f32 3.0, %v730_v48 }
  0xf8   : > { %1057 = vst.msk [vmem:[#allocation2 + $0x39] sm:$0xff] %vm997_vm3, %v968_v49  ;;  %v907_v60 = vmin.f32 %v875_v50, 6.0  ;;  %v876_v62 = vmax.f32 %v844_v51, 0.0 }
  0xf9   : > { %1055 = vst.msk [vmem:[#allocation2 + $0x21] sm:$0xff] %vm997_vm3, %v966_v53  ;;  %v905_v0 = vmin.f32 %v873_v57, 6.0  ;;  %v874_v1 = vmax.f32 %v842_v58, 0.0  ;;  %v5722_v2 = vpop.f32.mrb[8].mxu0 }
  0xfa   : > { %v939_v4 = vmul.f32 %v907_v60, %v735_v31  ;;  %v908_v5 = vmin.f32 %v876_v62, 6.0  ;;  %v751_v6 = vadd.f32 %v5722_v2, %v6278_v56  ;;  %v742_v7 = vpop.f32.mrb[9].mxu0  ;;  %v6369_v2 = vld [vmem:[%s7293_s3 + $0x5] ss:$0 sm:$0xff] }
  0xfb   : > { %v937_v9 = vmul.f32 %v905_v0, %v727_v36  ;;  %v906_v10 = vmin.f32 %v874_v1, 6.0  ;;  %v743_v11 = vadd.f32 %v6278_v56, %v742_v7  ;;  %v5723_v12 = vpop.f32.mrb[10].mxu0 }
  0xfc   : > { %v971_v15 = vmul.f32 0.16666667, %v939_v4  ;;  %v940_v16 = vmul.f32 %v908_v5, %v738_v43  ;;  %v847_v18 = vadd.f32 3.0, %v751_v6  ;;  %v754_v19 = vadd.f32 %v5723_v12, %v6278_v56  ;;  %v745_v21 = vpop.f32.mrb[11].mxu0 }
  0xfd   : > { %v969_v23 = vmul.f32 0.16666667, %v937_v9  ;;  %v938_v24 = vmul.f32 %v906_v10, %v730_v48  ;;  %v845_v25 = vadd.f32 3.0, %v743_v11  ;;  %v746_v26 = vadd.f32 %v6278_v56, %v745_v21  ;;  %v6344_v28 = vld [vmem:[#allocation2 + $0x30] sm:$0xff]  ;;  %v6375_v9 = vld [vmem:[%s7293_s3 + $0x7] ss:$0 sm:$0xff] }
  0xfe   : > { %1060 = vst.msk [vmem:[#allocation2 + $0x61] sm:$0xff] %vm997_vm3, %v971_v15  ;;  %v972_v29 = vmul.f32 0.16666667, %v940_v16  ;;  %v879_v30 = vmax.f32 %v847_v18, 0.0  ;;  %v848_v31 = vadd.f32 3.0, %v754_v19  ;;  %v1128_v32 = vld [vmem:[#allocation2 + $0x18] sm:$0xff]  ;;  %v6349_v34 = vmul.f32 %v6325_v13, %v6344_v28 }
  0xff   : > { %v1139_v33 = vld [vmem:[#allocation2 + $0x19] sm:$0xff]  ;;  %1058 = vst.msk [vmem:[#allocation2 + $0x49] sm:$0xff] %vm997_vm3, %v969_v23  ;;  %v970_v35 = vmul.f32 0.16666667, %v938_v24  ;;  %v877_v36 = vmax.f32 %v845_v25, 0.0  ;;  %v846_v37 = vadd.f32 3.0, %v746_v26  ;;  %v1135_v38 = vmul.f32 %v6336_v22, %v1128_v32 }
 0x100   : > { %v6353_v39 = vld [vmem:[#allocation2 + $0x38] sm:$0xff]  ;;  %1061 = vst.msk [vmem:[#allocation2 + $0x69] sm:$0xff] %vm997_vm3, %v972_v29  ;;  %v911_v40 = vmin.f32 %v879_v30, 6.0  ;;  %v880_v41 = vmax.f32 %v848_v31, 0.0  ;;  %v1129_v42 = vld [vmem:[#allocation2 + $0x20] sm:$0xff]  ;;  %v1146_v44 = vmul.f32 %v6342_v27, %v1139_v33 }
 0x101   : > { %v1140_v43 = vld [vmem:[#allocation2 + $0x21] sm:$0xff]  ;;  %v6359_v45 = vmul.f32 %v6325_v13, %v6353_v39  ;;  %1059 = vst.msk [vmem:[#allocation2 + $0x51] sm:$0xff] %vm997_vm3, %v970_v35  ;;  %v909_v46 = vmin.f32 %v877_v36, 6.0  ;;  %v878_v47 = vmax.f32 %v846_v37, 0.0  ;;  %v5726_v48 = vpop.f32.mrb[12].mxu0  ;;  %v1136_v49 = vmul.f32 %v6336_v22, %v1129_v42  ;;  %v6379_v24 = vld [vmem:[#allocation2 + $0x31] sm:$0xff] }
 0x102   : > { %v1137_v50 = vadd.f32 %v1135_v38, %v1126_v3  ;;  %v943_v51 = vmul.f32 %v911_v40, %v751_v6  ;;  %v912_v52 = vmin.f32 %v880_v41, 6.0  ;;  %v767_v53 = vadd.f32 %v5726_v48, %v6278_v56  ;;  %v758_v57 = vpop.f32.mrb[13].mxu0  ;;  %v1150_v15 = vld [vmem:[#allocation2 + $0x1a] sm:$0xff]  ;;  %v1151_v16 = vld [vmem:[#allocation2 + $0x22] sm:$0xff] }
 0x103   : > { %v1147_v58 = vmul.f32 %v6342_v27, %v1140_v43  ;;  %v941_v60 = vmul.f32 %v909_v46, %v743_v11  ;;  %v910_v62 = vmin.f32 %v878_v47, 6.0  ;;  %v759_v63 = vadd.f32 %v6278_v56, %v758_v57  ;;  %v5727_v0 = vpop.f32.mrb[14].mxu0  ;;  %v6381_v25 = vld [vmem:[#allocation2 + $0x39] sm:$0xff] }
 0x104   : > { %v1138_v1 = vadd.f32 %v1136_v49, %v1127_v8  ;;  %v975_v4 = vmul.f32 0.16666667, %v943_v51  ;;  %v944_v3 = vmul.f32 %v912_v52, %v754_v19  ;;  %v851_v5 = vadd.f32 3.0, %v767_v53  ;;  %v761_v7 = vpop.f32.mrb[15].mxu0 }
 0x105   : > { %v770_v6 = vadd.f32 %v5727_v0, %v6278_v56  ;;  %v973_v10 = vmul.f32 0.16666667, %v941_v60  ;;  %v942_v11 = vmul.f32 %v910_v62, %v746_v26  ;;  %v849_v12 = vadd.f32 3.0, %v759_v63 }
 0x106   : > { %v762_v8 = vadd.f32 %v6278_v56, %v761_v7  ;;  %1064 = vst.msk [vmem:[#allocation2 + $0x91] sm:$0xff] %vm997_vm3, %v975_v4  ;;  %v976_v18 = vmul.f32 0.16666667, %v944_v3  ;;  %v883_v19 = vmax.f32 %v851_v5, 0.0  ;;  %v1148_v23 = vadd.f32 %v1146_v44, %v1137_v50  ;;  %v6396_v7 = vld [vmem:[#allocation2 + $0x32] sm:$0xff] }
 0x107   : > { %v852_v21 = vadd.f32 3.0, %v770_v6  ;;  %1062 = vst.msk [vmem:[#allocation2 + $0x79] sm:$0xff] %vm997_vm3, %v973_v10  ;;  %v974_v29 = vmul.f32 0.16666667, %v942_v11  ;;  %v881_v30 = vmax.f32 %v849_v12, 0.0  ;;  %v1149_v31 = vadd.f32 %v1147_v58, %v1138_v1 }
 0x108   : > { %v850_v26 = vadd.f32 3.0, %v762_v8  ;;  %1065 = vst.msk [vmem:[#allocation2 + $0x99] sm:$0xff] %vm997_vm3, %v976_v18  ;;  %v915_v32 = vmin.f32 %v883_v19, 6.0  ;;  %v1157_v35 = vmul.f32 %v6369_v2, %v1150_v15  ;;  %v1158_v36 = vmul.f32 %v6369_v2, %v1151_v16  ;;  %v1185_v15 = vld [vmem:[#allocation2 + $0x3a] sm:$0xff] }
 0x109   : > { %v884_v33 = vmax.f32 %v852_v21, 0.0  ;;  %1063 = vst.msk [vmem:[#allocation2 + $0x81] sm:$0xff] %vm997_vm3, %v974_v29  ;;  %v913_v37 = vmin.f32 %v881_v30, 6.0  ;;  %v5730_v40 = vpop.f32.mrb[16].mxu0  ;;  %v1180_v41 = vmul.f32 %v6375_v9, %v6379_v24  ;;  %v1181_v42 = vmul.f32 %v6375_v9, %v6381_v25 }
 0x10a   : > { %v882_v38 = vmax.f32 %v850_v26, 0.0  ;;  %v947_v43 = vmul.f32 %v915_v32, %v767_v53  ;;  %v783_v46 = vadd.f32 %v5730_v40, %v6278_v56  ;;  %v774_v47 = vpop.f32.mrb[17].mxu0  ;;  %v1159_v48 = vadd.f32 %v1157_v35, %v1148_v23 }
 0x10b   : > { %v916_v44 = vmin.f32 %v884_v33, 6.0  ;;  %v945_v49 = vmul.f32 %v913_v37, %v759_v63  ;;  %v775_v51 = vadd.f32 %v6278_v56, %v774_v47  ;;  %v5731_v52 = vpop.f32.mrb[18].mxu0  ;;  %v1160_v57 = vadd.f32 %v1158_v36, %v1149_v31  ;;  %v6401_v63 = vld [vmem:[%s7293_s3 + $0x8] ss:$0 sm:$0xff] }
 0x10c   : > { %v914_v50 = vmin.f32 %v882_v38, 6.0  ;;  %v979_v58 = vmul.f32 0.16666667, %v947_v43  ;;  %v855_v62 = vadd.f32 3.0, %v783_v46  ;;  %v786_v0 = vadd.f32 %v5731_v52, %v6278_v56  ;;  %v777_v1 = vpop.f32.mrb[19].mxu0 }
 0x10d   : > { %v948_v60 = vmul.f32 %v916_v44, %v770_v6  ;;  %v977_v4 = vmul.f32 0.16666667, %v945_v49  ;;  %v853_v53 = vadd.f32 3.0, %v775_v51  ;;  %v778_v5 = vadd.f32 %v6278_v56, %v777_v1 }
 0x10e   : > { %v946_v3 = vmul.f32 %v914_v50, %v762_v8  ;;  %1068 = vst.msk [vmem:[#allocation2 + $0xc1] sm:$0xff] %vm997_vm3, %v979_v58  ;;  %v887_v6 = vmax.f32 %v855_v62, 0.0  ;;  %v856_v11 = vadd.f32 3.0, %v786_v0  ;;  %v1171_v12 = vadd.f32 %v6349_v34, %v1159_v48 }
 0x10f   : > { %v980_v10 = vmul.f32 0.16666667, %v948_v60  ;;  %1066 = vst.msk [vmem:[#allocation2 + $0xa9] sm:$0xff] %vm997_vm3, %v977_v4  ;;  %v885_v16 = vmax.f32 %v853_v53, 0.0  ;;  %v854_v18 = vadd.f32 3.0, %v778_v5  ;;  %v1172_v19 = vadd.f32 %v6359_v45, %v1160_v57 }
 0x110   : > { %v978_v8 = vmul.f32 0.16666667, %v946_v3  ;;  %v919_v21 = vmin.f32 %v887_v6, 6.0  ;;  %v888_v23 = vmax.f32 %v856_v11, 0.0  ;;  %v1182_v29 = vadd.f32 %v1180_v41, %v1171_v12 }
 0x111   : > { %1069 = vst.msk [vmem:[#allocation2 + $0xc9] sm:$0xff] %vm997_vm3, %v980_v10  ;;  %v1191_v30 = vmul.f32 %v6401_v63, %v6396_v7  ;;  %v917_v26 = vmin.f32 %v885_v16, 6.0  ;;  %v886_v34 = vmax.f32 %v854_v18, 0.0  ;;  %v5734_v31 = vpop.f32.mrb[20].mxu0  ;;  %v1183_v32 = vadd.f32 %v1181_v42, %v1172_v19 }
 0x112   : > { %1067 = vst.msk [vmem:[#allocation2 + $0xb1] sm:$0xff] %vm997_vm3, %v978_v8  ;;  %v1192_v33 = vmul.f32 %v6401_v63, %v1185_v15  ;;  %v951_v35 = vmul.f32 %v919_v21, %v783_v46  ;;  %v920_v36 = vmin.f32 %v888_v23, 6.0  ;;  %v799_v45 = vadd.f32 %v5734_v31, %v6278_v56  ;;  %v790_v38 = vpop.f32.mrb[21].mxu0  ;;  %v1310_v8 = vld [vmem:[#allocation2 + $0x48] sm:$0xff] }
 0x113   : > { %v1193_v37 = vadd.f32 %v1191_v30, %v1182_v29  ;;  %v949_v40 = vmul.f32 %v917_v26, %v775_v51  ;;  %v918_v43 = vmin.f32 %v886_v34, 6.0  ;;  %v791_v44 = vadd.f32 %v6278_v56, %v790_v38  ;;  %v5735_v47 = vpop.f32.mrb[22].mxu0  ;;  %v1332_v38 = vld [vmem:[#allocation2 + $0x4a] sm:$0xff] }
 0x114   : > { %v1194_v41 = vadd.f32 %v1192_v33, %v1183_v32  ;;  %v983_v48 = vmul.f32 0.16666667, %v951_v35  ;;  %v952_v49 = vmul.f32 %v920_v36, %v786_v0  ;;  %v859_v50 = vadd.f32 3.0, %v799_v45  ;;  %v793_v42 = vpop.f32.mrb[23].mxu0  ;;  %v1321_v33 = vld [vmem:[#allocation2 + $0x49] sm:$0xff]  ;;  %v1322_v35 = vld [vmem:[#allocation2 + $0x51] sm:$0xff] }
 0x115   : > { %v802_v52 = vadd.f32 %v5735_v47, %v6278_v56  ;;  %v981_v57 = vmul.f32 0.16666667, %v949_v40  ;;  %v950_v58 = vmul.f32 %v918_v43, %v778_v5  ;;  %v857_v60 = vadd.f32 3.0, %v791_v44 }
 0x116   : > { %v5906_v46 = vpack.c.bf16 %v1194_v41, %v1193_v37  ;;  %1072 = vst.msk [vmem:[#allocation2 + $0xf1] sm:$0xff] %vm997_vm3, %v983_v48  ;;  %v984_v62 = vmul.f32 0.16666667, %v952_v49  ;;  %v891_v1 = vmax.f32 %v859_v50, 0.0  ;;  %v794_v4 = vadd.f32 %v6278_v56, %v793_v42  ;;  %v1333_v48 = vld [vmem:[#allocation2 + $0x52] sm:$0xff]  ;;  %v1344_v49 = vld [vmem:[#allocation2 + $0x60] sm:$0xff] }
 0x117   : > { %v860_v51 = vadd.f32 3.0, %v802_v52  ;;  %1070 = vst.msk [vmem:[#allocation2 + $0xd9] sm:$0xff] %vm997_vm3, %v981_v57  ;;  %v982_v3 = vmul.f32 0.16666667, %v950_v58  ;;  %v889_v0 = vmax.f32 %v857_v60, 0.0  ;;  %v1283_v53 = vmul.f32 %v6283_v59, %v6344_v28 }
 0x118   : > { %5907 = vmatpush3.bf16.msra.mxu1 %v5906_v46  ;;  %v1284_v5 = vmul.f32 %v6283_v59, %v6353_v39  ;;  %1073 = vst.msk [vmem:[#allocation2 + $0xf9] sm:$0xff] %vm997_vm3, %v984_v62  ;;  %v923_v10 = vmin.f32 %v891_v1, 6.0  ;;  %v858_v11 = vadd.f32 3.0, %v794_v4  ;;  %v1294_v12 = vmul.f32 %v6288_v61, %v6379_v24  ;;  %v1311_v24 = vld [vmem:[#allocation2 + $0x50] sm:$0xff]  ;;  %v1345_v46 = vld [vmem:[#allocation2 + $0x68] sm:$0xff] }
 0x119   : > { %v892_v6 = vmax.f32 %v860_v51, 0.0  ;;  %5908 = vmatprep.subr.bf16.mxu1 %v6003_v55  ;;  %1071 = vst.msk [vmem:[#allocation2 + $0xe1] sm:$0xff] %vm997_vm3, %v982_v3  ;;  %v921_v16 = vmin.f32 %v889_v0, 6.0  ;;  %v5738_v18 = vpop.f32.mrb[24].mxu0  ;;  %v1295_v28 = vmul.f32 %v6288_v61, %v6381_v25  ;;  %v1305_v39 = vmul.f32 %v6301_v17, %v6396_v7  ;;  %v1356_v3 = vld [vmem:[#allocation2 + $0x69] sm:$0xff] }
 0x11a   : > { %v1306_v19 = vmul.f32 %v6301_v17, %v1185_v15  ;;  %v955_v21 = vmul.f32 %v923_v10, %v799_v45  ;;  %v890_v29 = vmax.f32 %v858_v11, 0.0  ;;  %v815_v30 = vadd.f32 %v5738_v18, %v6278_v56  ;;  %v806_v26 = vpop.f32.mrb[25].mxu0  ;;  %v1366_v0 = vld [vmem:[#allocation2 + $0x62] sm:$0xff] }
 0x11b   : > { %v924_v23 = vmin.f32 %v892_v6, 6.0  ;;  %5749 = vmatmul.mubr.msk.f32.vlgmr.msra.gmra.mrb[0].mxu1 %vm997_vm3, %v6330_v14  ;;  %v953_v34 = vmul.f32 %v921_v16, %v791_v44  ;;  %v1296_v31 = vadd.f32 %v1294_v12, %v1283_v53  ;;  %v1297_v32 = vadd.f32 %v1295_v28, %v1284_v5  ;;  %v5739_v7 = vpop.f32.mrb[26].mxu0  ;;  %v1367_v53 = vld [vmem:[#allocation2 + $0x6a] sm:$0xff] }
 0x11c   : > { %v1317_v25 = vmul.f32 %v6336_v22, %v1310_v8  ;;  %5755 = vmatprep.mubr.msk.f32.mxu1 %vm6004_vm5, %v6002_v54  ;;  %v987_v15 = vmul.f32 0.16666667, %v955_v21  ;;  %v922_v45 = vmin.f32 %v890_v29, 6.0  ;;  %v863_v37 = vadd.f32 3.0, %v815_v30  ;;  %v809_v40 = vpop.f32.mrb[27].mxu0 }
 0x11d   : > { %v956_v36 = vmul.f32 %v924_v23, %v802_v52  ;;  %v985_v43 = vmul.f32 0.16666667, %v953_v34  ;;  %v1307_v41 = vadd.f32 %v1305_v39, %v1296_v31  ;;  %v1308_v47 = vadd.f32 %v1306_v19, %v1297_v32  ;;  %v1355_v52 = vld [vmem:[#allocation2 + $0x61] sm:$0xff] }
 0x11e   : > { %v1318_v44 = vmul.f32 %v6336_v22, %v1311_v24  ;;  %1076 = vst.msk [vmem:[#allocation2 + $0x121] sm:$0xff] %vm997_vm3, %v987_v15  ;;  %v954_v42 = vmul.f32 %v922_v45, %v794_v4  ;;  %v895_v57 = vmax.f32 %v863_v37, 0.0  ;;  %v1328_v58 = vmul.f32 %v6342_v27, %v1321_v33 }
 0x11f   : > { %v988_v50 = vmul.f32 0.16666667, %v956_v36  ;;  %1074 = vst.msk [vmem:[#allocation2 + $0x109] sm:$0xff] %vm997_vm3, %v985_v43  ;;  %v1319_v60 = vadd.f32 %v1317_v25, %v1307_v41  ;;  %v1329_v1 = vmul.f32 %v6342_v27, %v1322_v35  ;;  %v1339_v51 = vmul.f32 %v6369_v2, %v1332_v38 }
 0x120   : > { %v1320_v62 = vadd.f32 %v1318_v44, %v1308_v47  ;;  %v986_v5 = vmul.f32 0.16666667, %v954_v42  ;;  %v927_v4 = vmin.f32 %v895_v57, 6.0  ;;  %v1340_v10 = vmul.f32 %v6369_v2, %v1333_v48 }
 0x121   : > { %1077 = vst.msk [vmem:[#allocation2 + $0x129] sm:$0xff] %vm997_vm3, %v988_v50  ;;  %v1351_v6 = vmul.f32 %v6325_v13, %v1344_v49  ;;  %v1330_v11 = vadd.f32 %v1328_v58, %v1319_v60  ;;  %v1352_v8 = vmul.f32 %v6325_v13, %v1345_v46  ;;  %v1362_v16 = vmul.f32 %v6375_v9, %v1355_v52  ;;  %v5742_v18 = vpop.f32.mrb[28].mxu0 }
 0x122   : > { %v1331_v12 = vadd.f32 %v1329_v1, %v1320_v62  ;;  %1075 = vst.msk [vmem:[#allocation2 + $0x111] sm:$0xff] %vm997_vm3, %v986_v5  ;;  %v959_v28 = vmul.f32 %v927_v4, %v815_v30  ;;  %v1363_v39 = vmul.f32 %v6375_v9, %v1356_v3  ;;  %v1373_v19 = vmul.f32 %v6401_v63, %v1366_v0  ;;  %v6453_v23 = vpop.f32.mrb[29].mxu0 }
 0x123   : > { %v1374_v21 = vmul.f32 %v6401_v63, %v1367_v53  ;;  %v1341_v29 = vadd.f32 %v1339_v51, %v1330_v11  ;;  %v807_v34 = vadd.f32 %v6278_v56, %v806_v26  ;;  %v818_v31 = vadd.f32 %v5739_v7, %v6278_v56  ;;  %v6457_v32 = vpop.f32.mrb[30].mxu0  ;;  %v1483_v51 = vld [vmem:[#allocation2 + $0x78] sm:$0xff] }
 0x124   : > { %v1342_v24 = vadd.f32 %v1340_v10, %v1331_v12  ;;  %v991_v25 = vmul.f32 0.16666667, %v959_v28  ;;  %v810_v33 = vadd.f32 %v6278_v56, %v809_v40  ;;  %v831_v30 = vadd.f32 %v5742_v18, %v6278_v56  ;;  %v6462_v15 = vpop.f32.mrb[31].mxu0  ;;  %v1517_v18 = vld [vmem:[#allocation2 + $0x90] sm:$0xff] }
 0x125   : > { %v1456_v35 = vmul.f32 %v6283_v59, %v1344_v49  ;;  %v1353_v36 = vadd.f32 %v1351_v6, %v1341_v29  ;;  %v861_v37 = vadd.f32 3.0, %v807_v34  ;;  %v864_v38 = vadd.f32 3.0, %v818_v31  ;;  %v1495_v29 = vld [vmem:[#allocation2 + $0x81] sm:$0xff] }
 0x126   : > { %v1354_v45 = vadd.f32 %v1352_v8, %v1342_v24  ;;  %1080 = vst.msk [vmem:[#allocation2 + $0x151] sm:$0xff] %vm997_vm3, %v991_v25  ;;  %v862_v26 = vadd.f32 3.0, %v810_v33  ;;  %v867_v43 = vadd.f32 3.0, %v831_v30  ;;  %v1457_v7 = vmul.f32 %v6283_v59, %v1345_v46  ;;  %v1505_v24 = vld [vmem:[#allocation2 + $0x7a] sm:$0xff]  ;;  %v1506_v25 = vld [vmem:[#allocation2 + $0x82] sm:$0xff] }
 0x127   : > { %v1467_v41 = vmul.f32 %v6288_v61, %v1355_v52  ;;  %v1364_v47 = vadd.f32 %v1362_v16, %v1353_v36  ;;  %v893_v44 = vmax.f32 %v861_v37, 0.0  ;;  %v896_v48 = vmax.f32 %v864_v38, 0.0  ;;  %v1484_v52 = vld [vmem:[#allocation2 + $0x80] sm:$0xff]  ;;  %v1539_v38 = vld [vmem:[#allocation2 + $0x92] sm:$0xff] }
 0x128   : > { %v1365_v40 = vadd.f32 %v1363_v39, %v1354_v45  ;;  %v894_v50 = vmax.f32 %v862_v26, 0.0  ;;  %v899_v49 = vmax.f32 %v867_v43, 0.0  ;;  %v1468_v42 = vmul.f32 %v6288_v61, %v1356_v3  ;;  %v1494_v16 = vld [vmem:[#allocation2 + $0x79] sm:$0xff]  ;;  %v1528_v3 = vld [vmem:[#allocation2 + $0x91] sm:$0xff] }
 0x129   : > { %v1469_v57 = vadd.f32 %v1467_v41, %v1456_v35  ;;  %v1375_v58 = vadd.f32 %v1373_v19, %v1364_v47  ;;  %v925_v62 = vmin.f32 %v893_v44, 6.0  ;;  %v928_v1 = vmin.f32 %v896_v48, 6.0  ;;  %v1529_v45 = vld [vmem:[#allocation2 + $0x99] sm:$0xff] }
 0x12a   : > { %v1376_v60 = vadd.f32 %v1374_v21, %v1365_v40  ;;  %v926_v5 = vmin.f32 %v894_v50, 6.0  ;;  %v931_v4 = vmin.f32 %v899_v49, 6.0  ;;  %v1470_v10 = vadd.f32 %v1468_v42, %v1457_v7  ;;  %v1540_v26 = vld [vmem:[#allocation2 + $0x9a] sm:$0xff] }
 0x12b   : > { %v1478_v46 = vmul.f32 %v6301_v17, %v1366_v0  ;;  %v957_v11 = vmul.f32 %v925_v62, %v807_v34  ;;  %v960_v12 = vmul.f32 %v928_v1, %v818_v31  ;;  %v1479_v8 = vmul.f32 %v6301_v17, %v1367_v53  ;;  %v1518_v31 = vld [vmem:[#allocation2 + $0x98] sm:$0xff] }
 0x12c   : > { %v5909_v6 = vpack.c.bf16 %v1376_v60, %v1375_v58  ;;  %v958_v28 = vmul.f32 %v926_v5, %v810_v33  ;;  %v963_v39 = vmul.f32 %v931_v4, %v831_v30  ;;  %v1490_v21 = vmul.f32 %v6336_v22, %v1483_v51 }
 0x12d   : > { %v1480_v19 = vadd.f32 %v1478_v46, %v1469_v57  ;;  %v989_v35 = vmul.f32 0.16666667, %v957_v11  ;;  %v992_v0 = vmul.f32 0.16666667, %v960_v12  ;;  %v1481_v36 = vadd.f32 %v1479_v8, %v1470_v10 }
 0x12e   : > { %5910 = vmatpush3.bf16.msra.mxu1 %v5909_v6  ;;  %v1491_v34 = vmul.f32 %v6336_v22, %v1484_v52  ;;  %v990_v53 = vmul.f32 0.16666667, %v958_v28  ;;  %v995_v37 = vmul.f32 0.16666667, %v963_v39  ;;  %v1501_v30 = vmul.f32 %v6342_v27, %v1494_v16 }
 0x12f   : > { %5911 = vmatprep.subr.bf16.mxu1 %v6003_v55  ;;  %v1492_v33 = vadd.f32 %v1490_v21, %v1480_v19  ;;  %1078 = vst.msk [vmem:[#allocation2 + $0x139] sm:$0xff] %vm997_vm3, %v989_v35  ;;  %1081 = vst.msk [vmem:[#allocation2 + $0x159] sm:$0xff] %vm997_vm3, %v992_v0  ;;  %v1502_v7 = vmul.f32 %v6342_v27, %v1495_v29  ;;  %v1512_v41 = vmul.f32 %v6369_v2, %v1505_v24  ;;  %v1656_v19 = vld [vmem:[#allocation2 + $0xa8] sm:$0xff] }
 0x130   : > { %v1493_v43 = vadd.f32 %v1491_v34, %v1481_v36  ;;  %v1513_v47 = vmul.f32 %v6369_v2, %v1506_v25  ;;  %1079 = vst.msk [vmem:[#allocation2 + $0x141] sm:$0xff] %vm997_vm3, %v990_v53  ;;  %1084 = vst.msk [vmem:[#allocation2 + $0x181] sm:$0xff] %vm997_vm3, %v995_v37  ;;  %v1524_v44 = vmul.f32 %v6325_v13, %v1517_v18  ;;  %v1667_v25 = vld [vmem:[#allocation2 + $0xa9] sm:$0xff] }
 0x131   : > { %5756 = vmatmul.mubr.msk.f32.vlgmr.msra.gmra.mrb[2].mxu1 %vm997_vm3, %v6330_v14  ;;  %v1503_v40 = vadd.f32 %v1501_v30, %v1492_v33  ;;  %v1525_v48 = vmul.f32 %v6325_v13, %v1518_v31  ;;  %v1535_v50 = vmul.f32 %v6375_v9, %v1528_v3  ;;  %v1536_v42 = vmul.f32 %v6375_v9, %v1529_v45 }
 0x132   : > { %v1504_v49 = vadd.f32 %v1502_v7, %v1493_v43  ;;  %v1546_v57 = vmul.f32 %v6401_v63, %v1539_v38  ;;  %v1547_v58 = vmul.f32 %v6401_v63, %v1540_v26  ;;  %5762 = vmatprep.mubr.msk.f32.mxu1 %vm6004_vm5, %v6002_v54  ;;  %v823_v62 = vadd.f32 %v6278_v56, %v6453_v23 }
 0x133   : > { %v1514_v60 = vadd.f32 %v1512_v41, %v1503_v40  ;;  %v834_v1 = vadd.f32 %v6457_v32, %v6278_v56  ;;  %v826_v51 = vadd.f32 %v6278_v56, %v6462_v15  ;;  %v1629_v4 = vmul.f32 %v6283_v59, %v1517_v18  ;;  %v1657_v18 = vld [vmem:[#allocation2 + $0xb0] sm:$0xff] }
 0x134   : > { %v1515_v5 = vadd.f32 %v1513_v47, %v1504_v49  ;;  %v1630_v10 = vmul.f32 %v6283_v59, %v1518_v31  ;;  %v1640_v46 = vmul.f32 %v6288_v61, %v1528_v3  ;;  %v865_v6 = vadd.f32 3.0, %v823_v62  ;;  %v1668_v31 = vld [vmem:[#allocation2 + $0xb1] sm:$0xff]  ;;  %v1691_v49 = vld [vmem:[#allocation2 + $0xc8] sm:$0xff] }
 0x135   : > { %v1526_v52 = vadd.f32 %v1524_v44, %v1514_v60  ;;  %v868_v11 = vadd.f32 3.0, %v834_v1  ;;  %v866_v12 = vadd.f32 3.0, %v826_v51  ;;  %v1641_v23 = vmul.f32 %v6288_v61, %v1529_v45  ;;  %v1678_v41 = vld [vmem:[#allocation2 + $0xaa] sm:$0xff] }
 0x136   : > { %v1527_v8 = vadd.f32 %v1525_v48, %v1515_v5  ;;  %v1642_v16 = vadd.f32 %v1640_v46, %v1629_v4  ;;  %v1651_v32 = vmul.f32 %v6301_v17, %v1539_v38  ;;  %v897_v39 = vmax.f32 %v865_v6, 0.0  ;;  %v1702_v4 = vld [vmem:[#allocation2 + $0xc9] sm:$0xff] }
 0x137   : > { %v1537_v28 = vadd.f32 %v1535_v50, %v1526_v52  ;;  %v900_v56 = vmax.f32 %v868_v11, 0.0  ;;  %v898_v15 = vmax.f32 %v866_v12, 0.0  ;;  %v1643_v29 = vadd.f32 %v1641_v23, %v1630_v10  ;;  %v1690_v50 = vld [vmem:[#allocation2 + $0xc0] sm:$0xff]  ;;  %v1713_v6 = vld [vmem:[#allocation2 + $0xca] sm:$0xff] }
 0x138   : > { %v1538_v21 = vadd.f32 %v1536_v42, %v1527_v8  ;;  %v1652_v3 = vmul.f32 %v6301_v17, %v1540_v26  ;;  %v1653_v24 = vadd.f32 %v1651_v32, %v1642_v16  ;;  %v929_v0 = vmin.f32 %v897_v39, 6.0  ;;  %v1679_v26 = vld [vmem:[#allocation2 + $0xb2] sm:$0xff]  ;;  %v1701_v42 = vld [vmem:[#allocation2 + $0xc1] sm:$0xff] }
 0x139   : > { %v1548_v35 = vadd.f32 %v1546_v57, %v1537_v28  ;;  %v932_v36 = vmin.f32 %v900_v56, 6.0  ;;  %v930_v34 = vmin.f32 %v898_v15, 6.0  ;;  %v1663_v37 = vmul.f32 %v6336_v22, %v1656_v19  ;;  %v1712_v10 = vld [vmem:[#allocation2 + $0xc2] sm:$0xff]  ;;  %v1829_v16 = vld [vmem:[#allocation2 + $0xd8] sm:$0xff] }
 0x13a   : > { %v1549_v45 = vadd.f32 %v1547_v58, %v1538_v21  ;;  %v1654_v53 = vadd.f32 %v1652_v3, %v1643_v29  ;;  %v1664_v33 = vmul.f32 %v6336_v22, %v1657_v18  ;;  %v961_v30 = vmul.f32 %v929_v0, %v823_v62  ;;  %v1830_v32 = vld [vmem:[#allocation2 + $0xe0] sm:$0xff] }
 0x13b   : > { %v964_v38 = vmul.f32 %v932_v36, %v834_v1  ;;  %v962_v43 = vmul.f32 %v930_v34, %v826_v51  ;;  %v1674_v7 = vmul.f32 %v6342_v27, %v1667_v25  ;;  %v1665_v40 = vadd.f32 %v1663_v37, %v1653_v24  ;;  %v1840_v3 = vld [vmem:[#allocation2 + $0xd9] sm:$0xff]  ;;  %v1841_v36 = vld [vmem:[#allocation2 + $0xe1] sm:$0xff] }
 0x13c   : > { %v5912_v47 = vpack.c.bf16 %v1549_v45, %v1548_v35  ;;  %v1666_v44 = vadd.f32 %v1664_v33, %v1654_v53  ;;  %v1675_v48 = vmul.f32 %v6342_v27, %v1668_v31  ;;  %v993_v57 = vmul.f32 0.16666667, %v961_v30  ;;  %v1851_v34 = vld [vmem:[#allocation2 + $0xda] sm:$0xff]  ;;  %v1852_v33 = vld [vmem:[#allocation2 + $0xe2] sm:$0xff]  ;;  %v1863_v30 = vld [vmem:[#allocation2 + $0xf0] sm:$0xff] }
 0x13d   : > { %v996_v58 = vmul.f32 0.16666667, %v964_v38  ;;  %v994_v60 = vmul.f32 0.16666667, %v962_v43  ;;  %v1676_v5 = vadd.f32 %v1674_v7, %v1665_v40  ;;  %v1685_v1 = vmul.f32 %v6369_v2, %v1678_v41  ;;  %v1864_v41 = vld [vmem:[#allocation2 + $0xf8] sm:$0xff] }
 0x13e   : > { %5913 = vmatpush3.bf16.msra.mxu1 %v5912_v47  ;;  %v1677_v62 = vadd.f32 %v1675_v48, %v1666_v44  ;;  %v1686_v51 = vmul.f32 %v6369_v2, %v1679_v26  ;;  %1082 = vst.msk [vmem:[#allocation2 + $0x169] sm:$0xff] %vm997_vm3, %v993_v57  ;;  %v1697_v46 = vmul.f32 %v6325_v13, %v1690_v50  ;;  %v1874_v48 = vld [vmem:[#allocation2 + $0xf1] sm:$0xff] }
 0x13f   : > { %1085 = vst.msk [vmem:[#allocation2 + $0x189] sm:$0xff] %vm997_vm3, %v996_v58  ;;  %1083 = vst.msk [vmem:[#allocation2 + $0x171] sm:$0xff] %vm997_vm3, %v994_v60  ;;  %5914 = vmatprep.subr.bf16.mxu1 %v6003_v55  ;;  %v1698_v52 = vmul.f32 %v6325_v13, %v1691_v49  ;;  %v1687_v11 = vadd.f32 %v1685_v1, %v1676_v5  ;;  %v1708_v8 = vmul.f32 %v6375_v9, %v1701_v42  ;;  %v1886_v5 = vld [vmem:[#allocation2 + $0xfa] sm:$0xff]  ;;  %v2003_v1 = vld [vmem:[#allocation2 + $0x110] sm:$0xff] }
 0x140   : > { %v1688_v12 = vadd.f32 %v1686_v51, %v1677_v62  ;;  %v1802_v23 = vmul.f32 %v6283_v59, %v1690_v50  ;;  %v1803_v28 = vmul.f32 %v6283_v59, %v1691_v49  ;;  %v1813_v39 = vmul.f32 %v6288_v61, %v1701_v42  ;;  %v1875_v50 = vld [vmem:[#allocation2 + $0xf9] sm:$0xff]  ;;  %v2002_v62 = vld [vmem:[#allocation2 + $0x108] sm:$0xff] }
 0x141   : > { %5763 = vmatmul.mubr.msk.f32.vlgmr.msra.gmra.mrb[4].mxu1 %vm997_vm3, %v6330_v14  ;;  %v1814_v56 = vmul.f32 %v6288_v61, %v1702_v4  ;;  %v1824_v15 = vmul.f32 %v6301_v17, %v1712_v10  ;;  %v1699_v19 = vadd.f32 %v1697_v46, %v1687_v11  ;;  %v1709_v21 = vmul.f32 %v6375_v9, %v1702_v4  ;;  %v1885_v49 = vld [vmem:[#allocation2 + $0xf2] sm:$0xff] }
 0x142   : > { %v1700_v18 = vadd.f32 %v1698_v52, %v1688_v12  ;;  %5769 = vmatprep.mubr.msk.f32.mxu1 %vm6004_vm5, %v6002_v54  ;;  %v1825_v29 = vmul.f32 %v6301_v17, %v1713_v6  ;;  %v1815_v24 = vadd.f32 %v1813_v39, %v1802_v23  ;;  %v1836_v35 = vmul.f32 %v6336_v22, %v1829_v16  ;;  %v5989_v12 = vld [vmem:[%s7293_s3 + $0x1] ss:$0 sm:$0xff] }
 0x143   : > { %v1816_v25 = vadd.f32 %v1814_v56, %v1803_v28  ;;  %v1837_v0 = vmul.f32 %v6336_v22, %v1830_v32  ;;  %v1710_v31 = vadd.f32 %v1708_v8, %v1699_v19  ;;  %v1719_v53 = vmul.f32 %v6401_v63, %v1712_v10  ;;  %v2014_v19 = vld [vmem:[#allocation2 + $0x111] sm:$0xff] }
 0x144   : > { %v1711_v45 = vadd.f32 %v1709_v21, %v1700_v18  ;;  %v1720_v37 = vmul.f32 %v6401_v63, %v1713_v6  ;;  %v1826_v38 = vadd.f32 %v1824_v15, %v1815_v24  ;;  %v1847_v7 = vmul.f32 %v6342_v27, %v1840_v3  ;;  %v2013_v15 = vld [vmem:[#allocation2 + $0x109] sm:$0xff] }
 0x145   : > { %v1827_v43 = vadd.f32 %v1825_v29, %v1816_v25  ;;  %v1721_v26 = vadd.f32 %v1719_v53, %v1710_v31  ;;  %v1848_v40 = vmul.f32 %v6342_v27, %v1841_v36  ;;  %v1858_v44 = vmul.f32 %v6369_v2, %v1851_v34  ;;  %v2024_v18 = vld [vmem:[#allocation2 + $0x10a] sm:$0xff]  ;;  %v2036_v36 = vld [vmem:[#allocation2 + $0x120] sm:$0xff] }
 0x146   : > { %v1722_v47 = vadd.f32 %v1720_v37, %v1711_v45  ;;  %v1838_v42 = vadd.f32 %v1836_v35, %v1826_v38  ;;  %v1859_v58 = vmul.f32 %v6369_v2, %v1852_v33  ;;  %v1870_v60 = vmul.f32 %v6325_v13, %v1863_v30  ;;  %v2037_v34 = vld [vmem:[#allocation2 + $0x128] sm:$0xff] }
 0x147   : > { %v1839_v57 = vadd.f32 %v1837_v0, %v1827_v43  ;;  %v1871_v4 = vmul.f32 %v6325_v13, %v1864_v41  ;;  %v1975_v10 = vmul.f32 %v6283_v59, %v1863_v30  ;;  %v1976_v46 = vmul.f32 %v6283_v59, %v1864_v41  ;;  %v2025_v0 = vld [vmem:[#allocation2 + $0x112] sm:$0xff]  ;;  %v2048_v41 = vld [vmem:[#allocation2 + $0x129] sm:$0xff] }
 0x148   : > { %v5915_v51 = vpack.c.bf16 %v1722_v47, %v1721_v26  ;;  %v1849_v52 = vadd.f32 %v1847_v7, %v1838_v42  ;;  %v1986_v11 = vmul.f32 %v6288_v61, %v1874_v48  ;;  %v1987_v8 = vmul.f32 %v5989_v12, %v1875_v50  ;;  %v2047_v7 = vld [vmem:[#allocation2 + $0x121] sm:$0xff] }
 0x149   : > { %v1850_v6 = vadd.f32 %v1848_v40, %v1839_v57  ;;  %v1997_v23 = vmul.f32 %v6301_v17, %v1885_v49  ;;  %v1998_v16 = vmul.f32 %v6301_v17, %v1886_v5  ;;  %v2009_v32 = vmul.f32 %v6336_v22, %v2002_v62  ;;  %v2058_v26 = vld [vmem:[#allocation2 + $0x122] sm:$0xff] }
 0x14a   : > { %5916 = vmatpush3.bf16.msra.mxu1 %v5915_v51  ;;  %v2010_v28 = vmul.f32 %v6336_v22, %v2003_v1  ;;  %v1860_v59 = vadd.f32 %v1858_v44, %v1849_v52  ;;  %v1988_v56 = vadd.f32 %v1986_v11, %v1975_v10  ;;  %v1989_v61 = vadd.f32 %v1987_v8, %v1976_v46  ;;  %v2059_v44 = vld [vmem:[#allocation2 + $0x12a] sm:$0xff]  ;;  %v2176_v62 = vld [vmem:[#allocation2 + $0x140] sm:$0xff] }
 0x14b   : > { %5917 = vmatprep.subr.bf16.mxu1 %v6003_v55  ;;  %v1861_v39 = vadd.f32 %v1859_v58, %v1850_v6  ;;  %v1881_v21 = vmul.f32 %v6375_v9, %v1874_v48  ;;  %v1882_v29 = vmul.f32 %v6375_v9, %v1875_v50  ;;  %v1892_v3 = vmul.f32 %v6401_v63, %v1885_v49  ;;  %v5990_v48 = vld [vmem:[%s7293_s3] ss:$0 sm:$0xff]  ;;  %v5991_v10 = vld [vmem:[%s7293_s3 + $0x2] ss:$0 sm:$0xff] }
 0x14c   : > { %v1872_v17 = vadd.f32 %v1870_v60, %v1860_v59  ;;  %v1999_v25 = vadd.f32 %v1997_v23, %v1988_v56  ;;  %v2000_v35 = vadd.f32 %v1998_v16, %v1989_v61  ;;  %v1893_v31 = vmul.f32 %v6401_v63, %v1886_v5  ;;  %v2175_v5 = vld [vmem:[#allocation2 + $0x138] sm:$0xff] }
 0x14d   : > { %5770 = vmatmul.mubr.msk.f32.vlgmr.msra.gmra.mrb[6].mxu1 %vm997_vm3, %v6330_v14  ;;  %v1873_v24 = vadd.f32 %v1871_v4, %v1861_v39  ;;  %v2020_v45 = vmul.f32 %v6342_v27, %v2013_v15  ;;  %v2021_v53 = vmul.f32 %v6342_v27, %v2014_v19  ;;  %v2031_v37 = vmul.f32 %v6369_v2, %v2024_v18  ;;  %v2186_v59 = vld [vmem:[#allocation2 + $0x139] sm:$0xff]  ;;  %v2187_v39 = vld [vmem:[#allocation2 + $0x141] sm:$0xff] }
 0x14e   : > { %5776 = vmatprep.mubr.msk.f32.mxu1 %vm6004_vm5, %v6002_v54  ;;  %v1883_v33 = vadd.f32 %v1881_v21, %v1872_v17  ;;  %v2011_v38 = vadd.f32 %v2009_v32, %v1999_v25  ;;  %v2012_v43 = vadd.f32 %v2010_v28, %v2000_v35  ;;  %v2032_v47 = vmul.f32 %v6369_v2, %v2025_v0  ;;  %v2197_v15 = vld [vmem:[#allocation2 + $0x13a] sm:$0xff]  ;;  %v2198_v19 = vld [vmem:[#allocation2 + $0x142] sm:$0xff] }
 0x14f   : > { %v1884_v30 = vadd.f32 %v1882_v29, %v1873_v24  ;;  %v2043_v40 = vmul.f32 %v6325_v13, %v2036_v36  ;;  %v2148_v50 = vmul.f32 %v5990_v48, %v2036_v36  ;;  %v2149_v49 = vmul.f32 %v5990_v48, %v2037_v34  ;;  %v5499_v17 = vld [vmem:[%s7293_s3] ss:$0 sm:$0xff]  ;;  %v2210_v36 = vld [vmem:[#allocation2 + $0x158] sm:$0xff] }
 0x150   : > { %v1894_v42 = vadd.f32 %v1892_v3, %v1883_v33  ;;  %v2022_v58 = vadd.f32 %v2020_v45, %v2011_v38  ;;  %v2023_v60 = vadd.f32 %v2021_v53, %v2012_v43  ;;  %v2044_v1 = vmul.f32 %v6325_v13, %v2037_v34  ;;  %v2220_v34 = vld [vmem:[#allocation2 + $0x151] sm:$0xff] }
 0x151   : > { %v1895_v57 = vadd.f32 %v1893_v31, %v1884_v30  ;;  %v2159_v51 = vmul.f32 %v5989_v12, %v2047_v7  ;;  %v2160_v4 = vmul.f32 %v5989_v12, %v2048_v41  ;;  %v2170_v46 = vmul.f32 %v5991_v10, %v2058_v26  ;;  %v5500_v31 = vld [vmem:[%s7293_s3 + $0x1] ss:$0 sm:$0xff]  ;;  %v2221_v30 = vld [vmem:[#allocation2 + $0x159] sm:$0xff] }
 0x152   : > { %v2033_v6 = vadd.f32 %v2031_v37, %v2022_v58  ;;  %v2034_v11 = vadd.f32 %v2032_v47, %v2023_v60  ;;  %v2171_v8 = vmul.f32 %v5991_v10, %v2059_v44  ;;  %v2182_v32 = vmul.f32 %v6336_v22, %v2175_v5  ;;  %v2231_v38 = vld [vmem:[#allocation2 + $0x152] sm:$0xff] }
 0x153   : > { %v5918_v52 = vpack.c.bf16 %v1895_v57, %v1894_v42  ;;  %v2161_v23 = vadd.f32 %v2159_v51, %v2148_v50  ;;  %v2162_v16 = vadd.f32 %v2160_v4, %v2149_v49  ;;  %v2183_v28 = vmul.f32 %v6336_v22, %v2176_v62  ;;  %v2209_v22 = vld [vmem:[#allocation2 + $0x150] sm:$0xff]  ;;  %v2232_v50 = vld [vmem:[#allocation2 + $0x15a] sm:$0xff] }
 0x154   : > { %v2045_v13 = vadd.f32 %v2043_v40, %v2033_v6  ;;  %v2046_v12 = vadd.f32 %v2044_v1, %v2034_v11  ;;  %v2054_v56 = vmul.f32 %v6375_v9, %v2047_v7  ;;  %v2055_v61 = vmul.f32 %v6375_v9, %v2048_v41  ;;  %v5992_v41 = vld [vmem:[%s7293_s3 + $0x6] ss:$0 sm:$0xff]  ;;  %v2348_v40 = vld [vmem:[#allocation2 + $0x168] sm:$0xff]  ;;  %v2349_v57 = vld [vmem:[#allocation2 + $0x170] sm:$0xff] }
 0x155   : > { %5919 = vmatpush3.bf16.msra.mxu1 %v5918_v52  ;;  %v2065_v18 = vmul.f32 %v6401_v63, %v2058_v26  ;;  %v2066_v21 = vmul.f32 %v6401_v63, %v2059_v44  ;;  %v2172_v29 = vadd.f32 %v2170_v46, %v2161_v23  ;;  %v2173_v3 = vadd.f32 %v2171_v8, %v2162_v16  ;;  %v2359_v8 = vld [vmem:[#allocation2 + $0x169] sm:$0xff]  ;;  %v5503_v23 = vld [vmem:[%s7293_s3 + $0x4] ss:$0 sm:$0xff] }
 0x156   : > { %5920 = vmatprep.subr.bf16.mxu1 %v6003_v55  ;;  %v2056_v24 = vadd.f32 %v2054_v56, %v2045_v13  ;;  %v2057_v25 = vadd.f32 %v2055_v61, %v2046_v12  ;;  %v2193_v35 = vmul.f32 %v6342_v27, %v2186_v59  ;;  %v2194_v0 = vmul.f32 %v6342_v27, %v2187_v39  ;;  %v5501_v27 = vld [vmem:[%s7293_s3 + $0x2] ss:$0 sm:$0xff]  ;;  %v2360_v39 = vld [vmem:[#allocation2 + $0x171] sm:$0xff] }
 0x157   : > { %v2184_v45 = vadd.f32 %v2182_v32, %v2172_v29  ;;  %v2185_v53 = vadd.f32 %v2183_v28, %v2173_v3  ;;  %v2204_v37 = vmul.f32 %v6369_v2, %v2197_v15  ;;  %v2205_v33 = vmul.f32 %v6369_v2, %v2198_v19  ;;  %v5502_v2 = vld [vmem:[%s7293_s3 + $0x3] ss:$0 sm:$0xff]  ;;  %v2370_v61 = vld [vmem:[#allocation2 + $0x16a] sm:$0xff]  ;;  %v5504_v15 = vld [vmem:[%s7293_s3 + $0x5] ss:$0 sm:$0xff] }
 0x158   : > { %5777 = vmatmul.mubr.msk.f32.vlgmr.msra.gmra.mrb[8].mxu1 %vm997_vm3, %v6330_v14  ;;  %v2067_v43 = vadd.f32 %v2065_v18, %v2056_v24  ;;  %v2068_v7 = vadd.f32 %v2066_v21, %v2057_v25  ;;  %v2216_v26 = vmul.f32 %v5992_v41, %v2209_v22  ;;  %v2321_v47 = vmul.f32 %v5499_v17, %v2209_v22 }
 0x159   : > { %5783 = vmatprep.mubr.msk.f32.mxu1 %vm6004_vm5, %v6002_v54  ;;  %v2195_v44 = vadd.f32 %v2193_v35, %v2184_v45  ;;  %v2196_v48 = vadd.f32 %v2194_v0, %v2185_v53  ;;  %v2322_v49 = vmul.f32 %v5499_v17, %v2210_v36  ;;  %v2332_v42 = vmul.f32 %v5500_v31, %v2220_v34  ;;  %v5505_v17 = vld [vmem:[%s7293_s3 + $0x6] ss:$0 sm:$0xff]  ;;  %v5506_v53 = vld [vmem:[%s7293_s3 + $0x7] ss:$0 sm:$0xff] }
 0x15a   : > { %v5921_v58 = vpack.c.bf16 %v2068_v7, %v2067_v43  ;;  %v2217_v60 = vmul.f32 %v5992_v41, %v2210_v36  ;;  %v2333_v5 = vmul.f32 %v5500_v31, %v2221_v30  ;;  %v2343_v62 = vmul.f32 %v5501_v27, %v2231_v38  ;;  %v2383_v36 = vld [vmem:[#allocation2 + $0x188] sm:$0xff] }
 0x15b   : > { %v2206_v1 = vadd.f32 %v2204_v37, %v2195_v44  ;;  %v2207_v51 = vadd.f32 %v2205_v33, %v2196_v48  ;;  %v2334_v4 = vadd.f32 %v2332_v42, %v2321_v47  ;;  %v2355_v10 = vmul.f32 %v5502_v2, %v2348_v40  ;;  %v2393_v45 = vld [vmem:[#allocation2 + $0x181] sm:$0xff]  ;;  %v2405_v47 = vld [vmem:[#allocation2 + $0x18a] sm:$0xff] }
 0x15c   : > { %5922 = vmatpush3.bf16.msra.mxu1 %v5921_v58  ;;  %v2227_v46 = vmul.f32 %v6375_v9, %v2220_v34  ;;  %v2335_v52 = vadd.f32 %v2333_v5, %v2322_v49  ;;  %v2344_v6 = vmul.f32 %v5501_v27, %v2232_v50  ;;  %v2356_v11 = vmul.f32 %v5502_v2, %v2349_v57  ;;  %v5507_v40 = vld [vmem:[%s7293_s3 + $0x8] ss:$0 sm:$0xff]  ;;  %v5969_v5 = vld [vmem:[%s7295_s5] sm:$0xff]  }
 0x15d   : > { %5923 = vmatprep.subr.bf16.mxu1 %v6003_v55  ;;  %v2218_v16 = vadd.f32 %v2216_v26, %v2206_v1  ;;  %v2219_v32 = vadd.f32 %v2217_v60, %v2207_v51  ;;  %v2228_v28 = vmul.f32 %v6375_v9, %v2221_v30  ;;  %v2345_v59 = vadd.f32 %v2343_v62, %v2334_v4  ;;  %v2371_v9 = vld [vmem:[#allocation2 + $0x172] sm:$0xff]  ;;  %v2404_v26 = vld [vmem:[#allocation2 + $0x182] sm:$0xff]  ;;  %v5437_v62 = vld [vmem:[%s7294_s4] ss:$0 sm:$0xff] }
 0x15e   : > { %v2238_v13 = vmul.f32 %v6401_v63, %v2231_v38  ;;  %v2239_v12 = vmul.f32 %v6401_v63, %v2232_v50  ;;  %v2346_v56 = vadd.f32 %v2344_v6, %v2335_v52  ;;  %v2366_v29 = vmul.f32 %v5503_v23, %v2359_v8  ;;  %v2382_v63 = vld [vmem:[#allocation2 + $0x180] sm:$0xff]  ;;  %v2394_v38 = vld [vmem:[#allocation2 + $0x189] sm:$0xff] }
 0x15f   : > { %5784 = vmatmul.mubr.msk.f32.vlgmr.msra.gmra.mrb[10].mxu1 %vm997_vm3, %v6330_v14  ;;  %v2229_v19 = vadd.f32 %v2227_v46, %v2218_v16  ;;  %v2230_v18 = vadd.f32 %v2228_v28, %v2219_v32  ;;  %v2357_v21 = vadd.f32 %v2355_v10, %v2345_v59  ;;  %v2367_v22 = vmul.f32 %v5503_v23, %v2360_v39 }
 0x160   : > { %5790 = vmatprep.mubr.msk.f32.mxu1 %vm6004_vm5, %v6002_v54  ;;  %v2358_v3 = vadd.f32 %v2356_v11, %v2346_v56  ;;  %v2377_v0 = vmul.f32 %v5504_v15, %v2370_v61  ;;  %v2378_v31 = vmul.f32 %v5504_v15, %v2371_v9  ;;  %v2389_v30 = vmul.f32 %v5505_v17, %v2382_v63 }
 0x161   : > { %v2240_v24 = vadd.f32 %v2238_v13, %v2229_v19  ;;  %v2241_v25 = vadd.f32 %v2239_v12, %v2230_v18  ;;  %v2368_v35 = vadd.f32 %v2366_v29, %v2357_v21  ;;  %v2390_v43 = vmul.f32 %v5505_v17, %v2383_v36 }
 0x162   : > { %v2369_v34 = vadd.f32 %v2367_v22, %v2358_v3  ;;  %v2400_v41 = vmul.f32 %v5506_v53, %v2393_v45  ;;  %v2401_v44 = vmul.f32 %v5506_v53, %v2394_v38  ;;  %v2411_v49 = vmul.f32 %v5507_v40, %v2404_v26 }
 0x163   : > { %v5924_v37 = vpack.c.bf16 %v2241_v25, %v2240_v24  ;;  %v2379_v33 = vadd.f32 %v2377_v0, %v2368_v35  ;;  %v2412_v42 = vmul.f32 %v5507_v40, %v2405_v47 }
 0x164   : > { %v2380_v27 = vadd.f32 %v2378_v31, %v2369_v34 }
 0x165   : > { %5925 = vmatpush3.bf16.msra.mxu1 %v5924_v37  ;;  %v2391_v7 = vadd.f32 %v2389_v30, %v2379_v33 }
 0x166   : > { %5926 = vmatprep.subr.bf16.mxu1 %v6003_v55  ;;  %v2392_v2 = vadd.f32 %v2390_v43, %v2380_v27 }
 0x167   : > { %v2402_v48 = vadd.f32 %v2400_v41, %v2391_v7 }
 0x168   : > { %5791 = vmatmul.mubr.msk.f32.vlgmr.msra.gmra.mrb[12].mxu1 %vm997_vm3, %v6330_v14  ;;  %v2403_v50 = vadd.f32 %v2401_v44, %v2392_v2 }
 0x169   : > { %5797 = vmatprep.mubr.msk.f32.mxu1 %vm6004_vm5, %v6002_v54  ;;  %v2413_v57 = vadd.f32 %v2411_v49, %v2402_v48 }
 0x16a   : > { %v2414_v58 = vadd.f32 %v2412_v42, %v2403_v50 }
 0x16c   : > { %v5927_v60 = vpack.c.bf16 %v2414_v58, %v2413_v57 }
 0x16e   : > { %5928 = vmatpush3.bf16.msra.mxu1 %v5927_v60 }
 0x16f   : > { %5800 = vmatprep.subr.bf16.mxu1 %v6002_v54 }
 0x171   : > { %5798 = vmatmul.mubr.msk.f32.vlgmr.msra.gmra.mrb[14].mxu1 %vm997_vm3, %v6330_v14 }
 0x172   : > { %5802 = vmatprep.mubr.msk.bf16.mxu1 %vm6004_vm5, %v6002_v54  ;;  %5801 = vmatpush3.bf16.msra.mxu1 %v5969_v5 }
 0x173   : > { %5806 = vmatprep.subr.bf16.mxu1 %v6002_v54 }
 0x1ee   : > { %v1270_v1 = vpop.f32.mrb[0].mxu1 }
 0x1ef   : > { %v1271_v51 = vadd.f32 %v5437_v62, %v1270_v1  ;;  %v5750_v4 = vpop.f32.mrb[1].mxu1 }
 0x1f1   : > { %v1274_v10 = vmax.f32 %v1271_v51, 0.0 }
 0x1f3   : > { %1275 = vst.msk [vmem:[#allocation3] sm:$0xff] %vm997_vm3, %v1274_v10  ;;  %v2572_v10 = vld [vmem:[%s7297_s7] sm:$0xf] }
 0x1fa   : > { %v6645_v9 = vld [vmem:[#allocation3] sm:$0xff] }
 0x1fb   : > { %v2495_v24 = vsel %vm997_vm3, %v6645_v9, 0.0 }
 0x204   : > { %v1443_v46 = vpop.f32.mrb[2].mxu1 }
 0x205   : > { %v1444_v52 = vadd.f32 %v5437_v62, %v1443_v46  ;;  %v5757_v6 = vpop.f32.mrb[3].mxu1  ;;  %v2581_v46 = vsel %vm2579_vm7, %v2572_v10, 0  ;;  %v6753_v10 = vld [vmem:[%s7302_s12] ss:$0 sm:$0xff] }
 0x207   : > { %v1447_v11 = vmax.f32 %v1444_v52, 0.0  ;;  %v2520_v52 = vld [vmem:[%s7296_s6] sm:$0x1] }
 0x209   : > { %1448 = vst.msk [vmem:[#allocation3 + $0x8] sm:$0xff] %vm997_vm3, %v1447_v11 }
 0x210   : > { %v6647_v3 = vld [vmem:[#allocation3 + $0x8] sm:$0xff] }
 0x211   : > { %v2496_v25 = vsel %vm997_vm3, %v6647_v3, 0.0 }
 0x212   : > { %v2497_v36 = vadd.f32 %v2496_v25, %v2495_v24 }
 0x214   : > { %v1616_v8 = vpop.f32.mrb[4].mxu1 }
 0x215   : > { %v1617_v23 = vadd.f32 %v5437_v62, %v1616_v8  ;;  %v5764_v16 = vpop.f32.mrb[5].mxu1 }
 0x217   : > { %v1620_v32 = vmax.f32 %v1617_v23, 0.0 }
 0x219   : > { %1621 = vst.msk [vmem:[#allocation3 + $0x10] sm:$0xff] %vm997_vm3, %v1620_v32 }
 0x220   : > { %v1789_v28 = vpop.f32.mrb[6].mxu1  ;;  %v6653_v0 = vld [vmem:[#allocation3 + $0x10] sm:$0xff] }
 0x221   : > { %v1790_v59 = vadd.f32 %v5437_v62, %v1789_v28  ;;  %v5771_v39 = vpop.f32.mrb[7].mxu1  ;;  %v2498_v34 = vsel %vm997_vm3, %v6653_v0, 0.0 }
 0x222   : > { %v2499_v53 = vadd.f32 %v2498_v34, %v2497_v36  ;;  %v2573_v39 = vld [vmem:[%s7298_s8] sm:$0x1] }
 0x223   : > { %v1793_v13 = vmax.f32 %v1790_v59, 0.0  ;;  %v5970_v59 = vld [vmem:[%s7299_s9] sm:$0xff]  }
 0x225   : > { %1794 = vst.msk [vmem:[#allocation3 + $0x18] sm:$0xff] %vm997_vm3, %v1793_v13 }
 0x22b   : > { %v1962_v12 = vpop.f32.mrb[8].mxu1 }
 0x22c   : > { %v1963_v56 = vadd.f32 %v5437_v62, %v1962_v12  ;;  %v5778_v61 = vpop.f32.mrb[9].mxu1  ;;  %v6658_v31 = vld [vmem:[#allocation3 + $0x18] sm:$0xff] }
 0x22d   : > { %v2500_v30 = vsel %vm997_vm3, %v6658_v31, 0.0 }
 0x22e   : > { %v1966_v15 = vmax.f32 %v1963_v56, 0.0  ;;  %v2501_v7 = vadd.f32 %v2500_v30, %v2499_v53 }
 0x230   : > { %1967 = vst.msk [vmem:[#allocation3 + $0x20] sm:$0xff] %vm997_vm3, %v1966_v15 }
 0x232   : > { %v2135_v19 = vpop.f32.mrb[10].mxu1 }
 0x233   : > { %v2136_v18 = vadd.f32 %v5437_v62, %v2135_v19  ;;  %v5785_v21 = vpop.f32.mrb[11].mxu1 }
 0x235   : > { %v2139_v29 = vmax.f32 %v2136_v18, 0.0 }
 0x237   : > { %2140 = vst.msk [vmem:[#allocation3 + $0x28] sm:$0xff] %vm997_vm3, %v2139_v29  ;;  %v2491_v38 = vld [vmem:[#allocation3 + $0x20] sm:$0xff] }
 0x238   : > { %v2502_v41 = vsel %vm997_vm3, %v2491_v38, 0.0 }
 0x239   : > { %v2503_v40 = vadd.f32 %v2502_v41, %v2501_v7 }
 0x23b   : > { %v2308_v22 = vpop.f32.mrb[12].mxu1 }
 0x23c   : > { %v2309_v63 = vadd.f32 %v5437_v62, %v2308_v22  ;;  %v5792_v17 = vpop.f32.mrb[13].mxu1  ;;  %v2631_v22 = vsub.s32 0, %v6303_v20 }
 0x23e   : > { %v2312_v35 = vmax.f32 %v2309_v63, 0.0  ;;  %v2492_v43 = vld [vmem:[#allocation3 + $0x28] sm:$0xff] }
 0x23f   : > { %v2504_v47 = vsel %vm997_vm3, %v2492_v43, 0.0 }
 0x240   : > { %2313 = vst.msk [vmem:[#allocation3 + $0x30] sm:$0xff] %vm997_vm3, %v2312_v35  ;;  %v2505_v44 = vadd.f32 %v2504_v47, %v2503_v40 }
 0x244   : > { %v2481_v45 = vpop.f32.mrb[14].mxu1 }
 0x245   : > { %v2482_v37 = vadd.f32 %v5437_v62, %v2481_v45  ;;  %v5799_v33 = vpop.f32.mrb[15].mxu1 }
 0x247   : > { %v2485_v27 = vmax.f32 %v2482_v37, 0.0  ;;  %v6664_v26 = vld [vmem:[#allocation3 + $0x30] sm:$0xff] }
 0x248   : > { %v2506_v2 = vsel %vm997_vm3, %v6664_v26, 0.0 }
 0x249   : > { %2486 = vst.msk [vmem:[#allocation3 + $0x38] sm:$0xff] %vm997_vm3, %v2485_v27  ;;  %v2507_v50 = vadd.f32 %v2506_v2, %v2505_v44 }
 0x250   : > { %v2494_v48 = vld [vmem:[#allocation3 + $0x38] sm:$0xff] }
 0x251   : > { %v2508_v49 = vsel %vm997_vm3, %v2494_v48, 0.0 }
 0x252   : > { %v2509_v42 = vadd.f32 %v2508_v49, %v2507_v50 }
 0x254   : > { %v2510_v57 = vrot.slane %v2509_v42, 4 }
 0x256   : > { %v2511_v58 = vadd.f32 %v2510_v57, %v2509_v42 }
 0x258   : > { %v2512_v60 = vrot.slane %v2511_v58, 2 }
 0x25a   : > { %v2513_v5 = vadd.f32 %v2512_v60, %v2511_v58 }
 0x25c   : > { %v2514_v62 = vrot.slane %v2513_v5, 1 }
 0x25e   : > { %v2515_v1 = vadd.f32 %v2514_v62, %v2513_v5 }
 0x260   : > { %v2517_v51 = vmul.f32 0.015625, %v2515_v1 }
 0x262   : > { %v2521_v4 = vpack.c.bf16 %v2517_v51, %v2517_v51  ;;  %v2869_v51 = vld [vmem:[#allocation4] sm:$0xff] }
 0x264   : > { %5803 = vmatmul.mubr.msk.bf16.vlgmr.msra.gmra.mrb[16].mxu1 %vm997_vm3, %v2521_v4  ;;  %v2870_v4 = vld [vmem:[#allocation4 + $0x8] sm:$0x3] }
 0x265   : > { %5808 = vmatprep.mubr.msk.bf16.mxu1 %vm6004_vm5, %v6002_v54  ;;  %5807 = vmatpush3.bf16.msra.mxu1 %v2581_v46  ;;  %v2880_v46 = vld [vmem:[#allocation4 + $0x1] sm:$0xff] }
 0x266   : > { %5812 = vmatprep.subr.bf16.mxu1 %v5970_v59 }
 0x337   : > { %v2565_v6 = vpop.f32.mrb[16].mxu1 }
 0x338   : > { %v2566_v11 = vadd.f32 %v2565_v6, %v2520_v52  ;;  %v5804_v8 = vpop.f32.mrb[17].mxu1  ;;  %v2881_v52 = vld [vmem:[#allocation4 + $0x9] sm:$0x3]  ;;  %v6758_v6 = vld [vmem:[%s7302_s12 + $0x1] ss:$0 sm:$0xff] }
 0x339   : > { %v2568_v23 = vpop.f32.mrb[18].mxu1  ;;  %v2877_v8 = vmul.f32 %v6753_v10, %v2870_v4 }
 0x33a   : > { %v2571_v16 = vmax.f32 %v2566_v11, 0.0  ;;  %v5805_v32 = vpop.f32.mrb[19].mxu1  ;;  %v2876_v11 = vmul.f32 %v6753_v10, %v2869_v51  ;;  %v2887_v23 = vmul.f32 %v6758_v6, %v2880_v46  ;;  %v3458_v51 = vld [vmem:[#allocation4 + $0x7a] sm:$0x3] }
 0x33b   : > { %v2891_v32 = vld [vmem:[#allocation4 + $0x2] sm:$0xff] }
 0x33c   : > { %v2574_v28 = vpack.c.bf16 %v2571_v16, %v2571_v16  ;;  %v2888_v16 = vmul.f32 %v6758_v6, %v2881_v52  ;;  %v6812_v52 = vld [vmem:[%s7302_s12 + $0x7] ss:$0 sm:$0xff] }
 0x33e   : > { %5809 = vmatmul.mubr.msk.bf16.vlgmr.msra.gmra.mrb[20].mxu1 %vm2575_vm8, %v2574_v28  ;;  %v2892_v28 = vld [vmem:[#allocation4 + $0xa] sm:$0x3] }
 0x33f   : > { %5813 = vmatpush3.bf16.msra.mxu1 %v5970_v59  ;;  %v6767_v59 = vld [vmem:[%s7302_s12 + $0x2] ss:$0 sm:$0xff] }
 0x411   : > { %v2617_v13 = vpop.f32.mrb[20].mxu1 }
 0x412   : > { %v2618_v12 = vadd.f32 %v2617_v13, %v2573_v39  ;;  %v5810_v56 = vpop.f32.mrb[21].mxu1  ;;  %v2889_v39 = vadd.f32 %v2887_v23, %v2876_v11  ;;  %v2890_v13 = vadd.f32 %v2888_v16, %v2877_v8 }
 0x413   : > { %v2620_v61 = vpop.f32.mrb[22].mxu1  ;;  %v2899_v56 = vmul.f32 %v6767_v59, %v2892_v28 }
 0x414   : > { %v2623_v15 = vsub.f32 0.0, %v2618_v12  ;;  %v5811_v19 = vpop.f32.mrb[23].mxu1  ;;  %v2898_v12 = vmul.f32 %v6767_v59, %v2891_v32  ;;  %v2903_v61 = vld [vmem:[#allocation4 + $0x10] sm:$0xff] }
 0x415   : > { %v6774_v19 = vld [vmem:[%s7302_s12 + $0x3] ss:$0 sm:$0xff] }
 0x416   : > { %v2624_v18 = vmul.f32 1.442695, %v2623_v15  ;;  %v2904_v15 = vld [vmem:[#allocation4 + $0x18] sm:$0x3] }
 0x418   : > { %5985 = vpow2.f32 %v2624_v18  ;;  %v2900_v18 = vadd.f32 %v2898_v12, %v2889_v39 }
 0x422   : > { %v5986_v21 = vpop.eup %5985 }
 0x423   : > { %v2626_v29 = vadd.f32 1.0, %v5986_v21  ;;  %v2901_v21 = vadd.f32 %v2899_v56, %v2890_v13 }
 0x425   : > { %5987 = vrcp.f32 %v2626_v29  ;;  %v2910_v29 = vmul.f32 %v6774_v19, %v2903_v61 }
 0x42f   : > { %v5988_v63 = vpop.eup %5987 }
 0x430   : > { %v2632_v17 = vrot.slane %v5988_v63, %v2631_v22  ;;  %v2911_v22 = vmul.f32 %v6774_v19, %v2904_v15  ;;  %v2914_v63 = vld [vmem:[#allocation4 + $0x11] sm:$0xff] }
 0x432   : > { %v2633_v24 = vmul.f32 %v2632_v17, %v6645_v9  ;;  %v2634_v25 = vmul.f32 %v2632_v17, %v6647_v3  ;;  %v2635_v35 = vmul.f32 %v2632_v17, %v6653_v0  ;;  %v2636_v36 = vmul.f32 %v2632_v17, %v6658_v31  ;;  %v5971_v3 = vld [vmem:[%s7301_s11] sm:$0xff]  }
 0x433   : > { %v2637_v34 = vmul.f32 %v2632_v17, %v2491_v38  ;;  %v2638_v45 = vmul.f32 %v2632_v17, %v2492_v43  ;;  %v2639_v30 = vmul.f32 %v2632_v17, %v6664_v26  ;;  %v2640_v9 = vmul.f32 %v2632_v17, %v2494_v48  ;;  %5822 = vmatprep.subr.bf16.mxu1 %v5971_v3  ;;  %v5512_v31 = vld [vmem:[%s7300_s10] ss:$0 sm:$0xff]  ;;  %v2915_v17 = vld [vmem:[#allocation4 + $0x19] sm:$0x3] }
 0x434   : > { %v2644_v53 = vpack.c.bf16 %v2634_v25, %v2633_v24  ;;  %v2645_v37 = vpack.c.bf16 %v2636_v36, %v2635_v35  ;;  %v6781_v24 = vld [vmem:[%s7302_s12 + $0x4] ss:$0 sm:$0xff]  ;;  %v2912_v35 = vadd.f32 %v2910_v29, %v2900_v18  ;;  %v2913_v36 = vadd.f32 %v2911_v22, %v2901_v21 }
 0x435   : > { %v2646_v33 = vpack.c.bf16 %v2638_v45, %v2637_v34  ;;  %v2647_v27 = vpack.c.bf16 %v2640_v9, %v2639_v30  ;;  %v2921_v34 = vmul.f32 %v6781_v24, %v2914_v63  ;;  %v2922_v45 = vmul.f32 %v6781_v24, %v2915_v17  ;;  %v2926_v9 = vld [vmem:[#allocation4 + $0x1a] sm:$0x3] }
 0x436   : > { %5814 = vmatprep.mubr.msk.bf16.mxu1 %vm997_vm3, %v2644_v53  ;;  %v2925_v53 = vld [vmem:[#allocation4 + $0x12] sm:$0xff] }
 0x437   : > { %5815 = vmatmul.mubr.msk.bf16.vlgmr.msra.gmra.mrb[24].mxu1 %vm997_vm3, %v2645_v37  ;;  %v6788_v37 = vld [vmem:[%s7302_s12 + $0x5] ss:$0 sm:$0xff] }
 0x438   : > { %5818 = vmatprep.mubr.msk.bf16.mxu1 %vm997_vm3, %v2646_v33  ;;  %5823 = vmatpush3.bf16.msra.mxu1 %v5971_v3 }
 0x43f   : > { %5819 = vmatmul.mubr.msk.bf16.gmra.mrb[28].mxu1 %vm997_vm3, %v2647_v27 }
 0x50a   : > { %v5816_v0 = vpop.f32.mrb[24].mxu1 }
 0x50b   : > { %v2706_v38 = vpop.f32.mrb[25].mxu1  ;;  %v2715_v7 = vadd.f32 %v5816_v0, %v5512_v31 }
 0x50c   : > { %v5817_v43 = vpop.f32.mrb[26].mxu1  ;;  %v2707_v47 = vadd.f32 %v5512_v31, %v2706_v38  ;;  %v2932_v38 = vmul.f32 %v6788_v37, %v2925_v53 }
 0x50d   : > { %v2718_v41 = vadd.f32 %v5817_v43, %v5512_v31  ;;  %v2709_v26 = vpop.f32.mrb[27].mxu1 }
 0x50e   : > { %v2710_v40 = vadd.f32 %v5512_v31, %v2709_v26  ;;  %v2933_v26 = vmul.f32 %v6788_v37, %v2926_v9 }
 0x50f   : > { %v2740_v2 = vpack.c.bf16 %v2718_v41, %v2715_v7  ;;  %v2923_v7 = vadd.f32 %v2921_v34, %v2912_v35  ;;  %v2924_v41 = vadd.f32 %v2922_v45, %v2913_v36 }
 0x510   : > { %v2739_v44 = vpack.c.bf16 %v2710_v40, %v2707_v47  ;;  %v2959_v47 = vld [vmem:[#allocation4 + $0x2a] sm:$0x3]  ;;  %v6798_v40 = vld [vmem:[%s7302_s12 + $0x8] ss:$0 sm:$0xff] }
 0x512   : > { %v5820_v48 = vpop.f32.mrb[28].mxu1  ;;  %5824 = vmatprep.mubr.msk.bf16.mxu1 %vm997_vm3, %v2739_v44  ;;  %v3072_v44 = vld [vmem:[#allocation4 + $0x2a] sm:$0x3] }
 0x513   : > { %v2722_v50 = vpop.f32.mrb[29].mxu1  ;;  %5825 = vmatmul.mubr.msk.bf16.vlgmr.msra.gmra.mrb[32].mxu1 %vm997_vm3, %v2740_v2  ;;  %v2731_v42 = vadd.f32 %v5820_v48, %v5512_v31  ;;  %v6804_v2 = vld [vmem:[%s7302_s12 + $0x6] ss:$0 sm:$0xff]  ;;  %v3106_v48 = vld [vmem:[#allocation4 + $0x3a] sm:$0x3]  ;;  %v6815_v11 = vmul.f32 %v6767_v59, %v3072_v44 }
 0x514   : > { %v5821_v49 = vpop.f32.mrb[30].mxu1  ;;  %v2723_v60 = vadd.f32 %v5512_v31, %v2722_v50  ;;  %v3248_v50 = vld [vmem:[#allocation4 + $0x4a] sm:$0x3]  ;;  %v6818_v8 = vmul.f32 %v6788_v37, %v3106_v48 }
 0x515   : > { %v2734_v57 = vadd.f32 %v5821_v49, %v5512_v31  ;;  %v2725_v58 = vpop.f32.mrb[31].mxu1  ;;  %v3140_v49 = vld [vmem:[#allocation4 + $0x4a] sm:$0x3]  ;;  %v6821_v23 = vmul.f32 %v6767_v59, %v3248_v50 }
 0x516   : > { %v2726_v5 = vadd.f32 %v5512_v31, %v2725_v58  ;;  %v6824_v12 = vmul.f32 %v6798_v40, %v3140_v49 }
 0x517   : > { %v2742_v62 = vpack.c.bf16 %v2734_v57, %v2731_v42  ;;  %v3282_v42 = vld [vmem:[#allocation4 + $0x5a] sm:$0x3]  ;;  %v3424_v57 = vld [vmem:[#allocation4 + $0x6a] sm:$0x3] }
 0x518   : > { %v2741_v1 = vpack.c.bf16 %v2726_v5, %v2723_v60  ;;  %v2934_v60 = vadd.f32 %v2932_v38, %v2923_v7  ;;  %v2935_v5 = vadd.f32 %v2933_v26, %v2924_v41  ;;  %v6827_v56 = vmul.f32 %v6788_v37, %v3282_v42 }
 0x519   : > { %v6830_v61 = vmul.f32 %v6767_v59, %v3424_v57 }
 0x51a   : > { %5828 = vmatprep.mubr.msk.bf16.mxu1 %vm997_vm3, %v2741_v1  ;;  %v3316_v1 = vld [vmem:[#allocation4 + $0x6a] sm:$0x3] }
 0x51b   : > { %5829 = vmatmul.mubr.msk.bf16.gmra.mrb[36].mxu1 %vm997_vm3, %v2742_v62  ;;  %v6807_v62 = vmul.f32 %v6798_v40, %v2959_v47  ;;  %v6837_v17 = vmul.f32 %v6798_v40, %v3316_v1  ;;  %vm4911_vm3 = vcmask 719872  }
 0x5e6   : > { %v5826_v25 = vpop.f32.mrb[32].mxu1 }
 0x5e7   : > { %v2828_v33 = vmax.f32 %v5826_v25, 0.0  ;;  %v2795_v30 = vpop.f32.mrb[33].mxu1  ;;  %v6840_v25 = vmul.f32 %v6788_v37, %v3458_v51 }
 0x5e8   : > { %v2826_v27 = vmax.f32 %v2795_v30, 0.0  ;;  %v5827_v3 = vpop.f32.mrb[34].mxu1 }
 0x5e9   : > { %2863 = vst.msk [vmem:[#allocation4 + $0x42] sm:$0xff] %vm2834_vm9, %v2828_v33  ;;  %v2829_v0 = vmax.f32 %v5827_v3, 0.0  ;;  %v2798_v31 = vpop.f32.mrb[35].mxu1 }
 0x5ea   : > { %2861 = vst.msk [vmem:[#allocation4 + $0x22] sm:$0xff] %vm2834_vm9, %v2826_v27  ;;  %v2827_v43 = vmax.f32 %v2798_v31, 0.0 }
 0x5eb   : > { %2864 = vst.msk [vmem:[#allocation4 + $0x52] sm:$0xff] %vm2834_vm9, %v2829_v0 }
 0x5ec   : > { %2862 = vst.msk [vmem:[#allocation4 + $0x32] sm:$0xff] %vm2834_vm9, %v2827_v43 }
 0x5ee   : > { %v5830_v58 = vpop.f32.mrb[36].mxu1 }
 0x5ef   : > { %v2832_v4 = vmax.f32 %v5830_v58, 0.0  ;;  %v2811_v46 = vpop.f32.mrb[37].mxu1 }
 0x5f0   : > { %v2830_v16 = vmax.f32 %v2811_v46, 0.0  ;;  %v5831_v32 = vpop.f32.mrb[38].mxu1  ;;  %v3117_v28 = vld [vmem:[#allocation4 + $0x40] sm:$0xff]  ;;  %v3118_v39 = vld [vmem:[#allocation4 + $0x48] sm:$0x3] }
 0x5f1   : > { %v3128_v13 = vld [vmem:[#allocation4 + $0x41] sm:$0xff]  ;;  %2867 = vst.msk [vmem:[#allocation4 + $0x82] sm:$0xff] %vm2834_vm9, %v2832_v4  ;;  %v2833_v15 = vmax.f32 %v5831_v32, 0.0  ;;  %v2814_v18 = vpop.f32.mrb[39].mxu1  ;;  %v6834_v63 = vmul.f32 %v6804_v2, %v3117_v28  ;;  %v2948_v45 = vld [vmem:[#allocation4 + $0x29] sm:$0x3]  ;;  %v6846_v30 = vmul.f32 %v6804_v2, %v3118_v39 }
 0x5f2   : > { %v2936_v21 = vld [vmem:[#allocation4 + $0x20] sm:$0xff]  ;;  %v2937_v29 = vld [vmem:[#allocation4 + $0x28] sm:$0x3]  ;;  %2865 = vst.msk [vmem:[#allocation4 + $0x62] sm:$0xff] %vm2834_vm9, %v2830_v16  ;;  %v2831_v35 = vmax.f32 %v2814_v18, 0.0  ;;  %v2955_v27 = vmul.f32 %v6812_v52, %v2948_v45  ;;  %v6860_v58 = vmul.f32 %v6812_v52, %v3128_v13  ;;  %v3232_v45 = vmul.f32 %v6753_v10, %v3117_v28 }
 0x5f3   : > { %v2947_v22 = vld [vmem:[#allocation4 + $0x21] sm:$0xff]  ;;  %v2943_v36 = vmul.f32 %v6804_v2, %v2936_v21  ;;  %v2944_v34 = vmul.f32 %v6804_v2, %v2937_v29  ;;  %2868 = vst.msk [vmem:[#allocation4 + $0x92] sm:$0xff] %vm2834_vm9, %v2833_v15  ;;  %v3056_v3 = vmul.f32 %v6753_v10, %v2936_v21  ;;  %v3061_v31 = vld [vmem:[#allocation4 + $0x29] sm:$0x3]  ;;  %v3083_v38 = vld [vmem:[#allocation4 + $0x30] sm:$0xff] }
 0x5f4   : > { %v2958_v53 = vld [vmem:[#allocation4 + $0x22] sm:$0xff]  ;;  %v2954_v9 = vmul.f32 %v6812_v52, %v2947_v22  ;;  %v3084_v43 = vld [vmem:[#allocation4 + $0x38] sm:$0x3]  ;;  %2866 = vst.msk [vmem:[#allocation4 + $0x72] sm:$0xff] %vm2834_vm9, %v2831_v35  ;;  %v3067_v26 = vmul.f32 %v6758_v6, %v2947_v22  ;;  %v3068_v47 = vmul.f32 %v6758_v6, %v3061_v31  ;;  %v3090_v57 = vmul.f32 %v6774_v19, %v3083_v38 }
 0x5f5   : > { %v3050_v33 = vld [vmem:[#allocation4 + $0x28] sm:$0x3]  ;;  %v2945_v7 = vadd.f32 %v2943_v36, %v2934_v60  ;;  %v2946_v41 = vadd.f32 %v2944_v34, %v2935_v5  ;;  %v3094_v44 = vld [vmem:[#allocation4 + $0x31] sm:$0xff]  ;;  %v3095_v48 = vld [vmem:[#allocation4 + $0x39] sm:$0x3]  ;;  %v2965_v49 = vmul.f32 %v6798_v40, %v2958_v53  ;;  %v3078_v42 = vmul.f32 %v6767_v59, %v2958_v53 }
 0x5f6   : > { %v3057_v0 = vmul.f32 %v6753_v10, %v3050_v33  ;;  %v3105_v50 = vld [vmem:[#allocation4 + $0x32] sm:$0xff]  ;;  %v3069_v5 = vadd.f32 %v3067_v26, %v3056_v3  ;;  %v3226_v4 = vld [vmem:[#allocation4 + $0x48] sm:$0x3]  ;;  %v3091_v16 = vmul.f32 %v6774_v19, %v3084_v43  ;;  %v3101_v32 = vmul.f32 %v6781_v24, %v3094_v44  ;;  %v5974_v34 = vld [vmem:[%s7303_s13 + $0x10] sm:$0xff]  }
 0x5f7   : > { %v2956_v1 = vadd.f32 %v2954_v9, %v2945_v7  ;;  %v2957_v60 = vadd.f32 %v2955_v27, %v2946_v41  ;;  %v3237_v46 = vld [vmem:[#allocation4 + $0x49] sm:$0x3]  ;;  %v3102_v39 = vmul.f32 %v6781_v24, %v3095_v48  ;;  %v3112_v15 = vmul.f32 %v6788_v37, %v3105_v50  ;;  %v3259_v27 = vld [vmem:[#allocation4 + $0x50] sm:$0xff]  ;;  %v3271_v43 = vld [vmem:[#allocation4 + $0x59] sm:$0x3] }
 0x5f8   : > { %v3070_v51 = vadd.f32 %v3068_v47, %v3057_v0  ;;  %v3129_v18 = vld [vmem:[#allocation4 + $0x49] sm:$0x3]  ;;  %v3080_v22 = vadd.f32 %v3078_v42, %v3069_v5  ;;  %v3233_v53 = vmul.f32 %v6753_v10, %v3226_v4  ;;  %v3243_v33 = vmul.f32 %v6758_v6, %v3128_v13  ;;  %v3270_v38 = vld [vmem:[#allocation4 + $0x51] sm:$0xff] }
 0x5f9   : > { %v2967_v21 = vadd.f32 %v2965_v49, %v2956_v1  ;;  %v2968_v29 = vadd.f32 %v6807_v62, %v2957_v60  ;;  %v3139_v36 = vld [vmem:[#allocation4 + $0x42] sm:$0xff]  ;;  %v3244_v9 = vmul.f32 %v6758_v6, %v3237_v46  ;;  %v3260_v62 = vld [vmem:[#allocation4 + $0x58] sm:$0x3]  ;;  %v3136_v31 = vmul.f32 %v6812_v52, %v3129_v18 }
 0x5fa   : > { %v3081_v35 = vadd.f32 %v6815_v11, %v3070_v51  ;;  %v3092_v0 = vadd.f32 %v3090_v57, %v3080_v22  ;;  %v3146_v7 = vmul.f32 %v6798_v40, %v3139_v36  ;;  %v3245_v41 = vadd.f32 %v3243_v33, %v3232_v45  ;;  %v3281_v47 = vld [vmem:[#allocation4 + $0x52] sm:$0xff]  ;;  %v3293_v44 = vld [vmem:[#allocation4 + $0x60] sm:$0xff]  ;;  %v3294_v42 = vld [vmem:[#allocation4 + $0x68] sm:$0x3] }
 0x5fb   : > { %v5930_v3 = vpack.c.bf16 %v2968_v29, %v2967_v21  ;;  %v3246_v26 = vadd.f32 %v3244_v9, %v3233_v53  ;;  %v3254_v28 = vmul.f32 %v6767_v59, %v3139_v36  ;;  %v3266_v50 = vmul.f32 %v6774_v19, %v3259_v27  ;;  %v3304_v57 = vld [vmem:[#allocation4 + $0x61] sm:$0xff]  ;;  %v3413_v18 = vld [vmem:[#allocation4 + $0x69] sm:$0x3] }
 0x5fc   : > { %v3093_v11 = vadd.f32 %v3091_v16, %v3081_v35  ;;  %v3103_v13 = vadd.f32 %v3101_v32, %v3092_v0  ;;  %v3267_v49 = vmul.f32 %v6774_v19, %v3260_v62  ;;  %v3277_v5 = vmul.f32 %v6781_v24, %v3270_v38  ;;  %v3402_v4 = vld [vmem:[#allocation4 + $0x68] sm:$0x3]  ;;  %v3436_v0 = vld [vmem:[#allocation4 + $0x78] sm:$0x3] }
 0x5fd   : > { %5932 = vmatpush3.bf16.msk.msra.mxu0 %vm6869_vm14, %v5930_v3  ;;  %v3256_v1 = vadd.f32 %v3254_v28, %v3245_v41  ;;  %v3257_v60 = vadd.f32 %v6821_v23, %v3246_v26  ;;  %v3278_v51 = vmul.f32 %v6781_v24, %v3271_v43  ;;  %v3288_v32 = vmul.f32 %v6788_v37, %v3281_v47  ;;  %v3305_v22 = vld [vmem:[#allocation4 + $0x69] sm:$0x3]  ;;  %v3435_v3 = vld [vmem:[#allocation4 + $0x70] sm:$0xff] }
 0x5fe   : > { %v3104_v48 = vadd.f32 %v3102_v39, %v3093_v11  ;;  %5933 = vmatprep.subr.bf16.mxu0 %v6003_v55  ;;  %v3114_v46 = vadd.f32 %v3112_v15, %v3103_v13  ;;  %v3300_v39 = vmul.f32 %v6804_v2, %v3293_v44  ;;  %v3301_v23 = vmul.f32 %v6804_v2, %v3294_v42  ;;  %v3315_v36 = vld [vmem:[#allocation4 + $0x62] sm:$0xff]  ;;  %v3446_v47 = vld [vmem:[#allocation4 + $0x71] sm:$0xff] }
 0x5ff   : > { %v3268_v21 = vadd.f32 %v3266_v50, %v3256_v1  ;;  %v3269_v29 = vadd.f32 %v3267_v49, %v3257_v60  ;;  %v3311_v35 = vmul.f32 %v6812_v52, %v3304_v57  ;;  %v3408_v45 = vmul.f32 %v6753_v10, %v3293_v44  ;;  %v3447_v44 = vld [vmem:[#allocation4 + $0x79] sm:$0x3]  ;;  %v3469_v60 = vld [vmem:[#allocation4 + $0x80] sm:$0xff] }
 0x600   : > { %v3115_v16 = vadd.f32 %v6818_v8, %v3104_v48  ;;  %5837 = vmatmul.mubr.msk.f32.vlgmr.msra.gmra.mrb[32].mxu0 %vm2969_vm12, %v6330_v14  ;;  %v3126_v15 = vadd.f32 %v6834_v63, %v3114_v46  ;;  %v3409_v53 = vmul.f32 %v6753_v10, %v3402_v4  ;;  %v3419_v27 = vmul.f32 %v6758_v6, %v3304_v57  ;;  %v3457_v1 = vld [vmem:[#allocation4 + $0x72] sm:$0xff] }
 0x601   : > { %5843 = vmatprep.mubr.msk.f32.mxu0 %vm6004_vm5, %v6002_v54  ;;  %v3279_v33 = vadd.f32 %v3277_v5, %v3268_v21  ;;  %v3280_v9 = vadd.f32 %v3278_v51, %v3269_v29  ;;  %v3420_v62 = vmul.f32 %v6758_v6, %v3413_v18  ;;  %v3430_v38 = vmul.f32 %v6767_v59, %v3315_v36  ;;  %v3600_v5 = vld [vmem:[#allocation4 + $0x8a] sm:$0x3]  ;;  %v3480_v18 = vld [vmem:[#allocation4 + $0x81] sm:$0xff] }
 0x602   : > { %v3127_v8 = vadd.f32 %v6846_v30, %v3115_v16  ;;  %v3137_v11 = vadd.f32 %v6860_v58, %v3126_v15  ;;  %v3312_v30 = vmul.f32 %v6812_v52, %v3305_v22  ;;  %v3421_v26 = vadd.f32 %v3419_v27, %v3408_v45  ;;  %v3589_v21 = vld [vmem:[#allocation4 + $0x89] sm:$0x3] }
 0x603   : > { %v3290_v43 = vadd.f32 %v3288_v32, %v3279_v33  ;;  %v3291_v41 = vadd.f32 %v6827_v56, %v3280_v9  ;;  %v3422_v28 = vadd.f32 %v3420_v62, %v3409_v53  ;;  %v3442_v50 = vmul.f32 %v6774_v19, %v3435_v3  ;;  %v3470_v29 = vld [vmem:[#allocation4 + $0x88] sm:$0x3]  ;;  %v3492_v53 = vld [vmem:[#allocation4 + $0x8a] sm:$0x3] }
 0x604   : > { %v3138_v63 = vadd.f32 %v3136_v31, %v3127_v8  ;;  %v3148_v13 = vadd.f32 %v3146_v7, %v3137_v11  ;;  %v3443_v49 = vmul.f32 %v6774_v19, %v3436_v0  ;;  %v3432_v42 = vadd.f32 %v3430_v38, %v3421_v26  ;;  %v3491_v45 = vld [vmem:[#allocation4 + $0x82] sm:$0xff]  ;;  %v3612_v38 = vld [vmem:[#allocation4 + $0x98] sm:$0x3]  ;;  %v3634_v26 = vld [vmem:[#allocation4 + $0x9a] sm:$0x3] }
 0x605   : > { %v3302_v58 = vadd.f32 %v3300_v39, %v3290_v43  ;;  %v3303_v31 = vadd.f32 %v3301_v23, %v3291_v41  ;;  %v3433_v57 = vadd.f32 %v6830_v61, %v3422_v28  ;;  %v3322_v51 = vmul.f32 %v6798_v40, %v3315_v36  ;;  %v3578_v39 = vld [vmem:[#allocation4 + $0x88] sm:$0x3] }
 0x606   : > { %v3149_v48 = vadd.f32 %v6824_v12, %v3138_v63  ;;  %v3453_v4 = vmul.f32 %v6781_v24, %v3446_v47  ;;  %v3454_v7 = vmul.f32 %v6781_v24, %v3447_v44  ;;  %v3444_v16 = vadd.f32 %v3442_v50, %v3432_v42  ;;  %v3481_v33 = vld [vmem:[#allocation4 + $0x89] sm:$0x3] }
 0x607   : > { %v3313_v12 = vadd.f32 %v3311_v35, %v3302_v58  ;;  %v3314_v46 = vadd.f32 %v3312_v30, %v3303_v31  ;;  %v3445_v32 = vadd.f32 %v3443_v49, %v3433_v57  ;;  %v3464_v61 = vmul.f32 %v6788_v37, %v3457_v1  ;;  %v3611_v30 = vld [vmem:[#allocation4 + $0x90] sm:$0xff]  ;;  %v3645_v31 = vld [vmem:[#allocation4 + $0xa0] sm:$0xff] }
 0x608   : > { %v5934_v56 = vpack.c.bf16 %v3149_v48, %v3148_v13  ;;  %v3476_v23 = vmul.f32 %v6804_v2, %v3469_v60  ;;  %v3607_v22 = vmul.f32 %v6767_v59, %v3600_v5  ;;  %v3455_v15 = vadd.f32 %v3453_v4, %v3444_v16  ;;  %v3622_v13 = vld [vmem:[#allocation4 + $0x91] sm:$0xff]  ;;  %v3623_v48 = vld [vmem:[#allocation4 + $0x99] sm:$0x3] }
 0x609   : > { %v3324_v36 = vadd.f32 %v3322_v51, %v3313_v12  ;;  %v3325_v35 = vadd.f32 %v6837_v17, %v3314_v46  ;;  %v3456_v8 = vadd.f32 %v3454_v7, %v3445_v32  ;;  %v3584_v9 = vmul.f32 %v6753_v10, %v3469_v60  ;;  %v3633_v60 = vld [vmem:[#allocation4 + $0x92] sm:$0xff]  ;;  %v3656_v32 = vld [vmem:[#allocation4 + $0xa1] sm:$0xff] }
 0x60a   : > { %5936 = vmatpush3.bf16.msk.msra.mxu0 %vm6869_vm14, %v5934_v56  ;;  %v3585_v27 = vmul.f32 %v6753_v10, %v3578_v39  ;;  %v3595_v62 = vmul.f32 %v6758_v6, %v3480_v18  ;;  %v3596_v3 = vmul.f32 %v6758_v6, %v3589_v21  ;;  %v3466_v11 = vadd.f32 %v3464_v61, %v3455_v15  ;;  %v3646_v56 = vld [vmem:[#allocation4 + $0xa8] sm:$0x3] }
 0x60b   : > { %5937 = vmatprep.subr.bf16.mxu0 %v6003_v55  ;;  %v5938_v0 = vpack.c.bf16 %v3325_v35, %v3324_v36  ;;  %v3467_v17 = vadd.f32 %v6840_v25, %v3456_v8  ;;  %v3477_v63 = vmul.f32 %v6804_v2, %v3470_v29  ;;  %v3499_v10 = vmul.f32 %v6798_v40, %v3492_v53  ;;  %v3668_v36 = vld [vmem:[#allocation4 + $0xaa] sm:$0x3] }
 0x60c   : > { %v3597_v43 = vadd.f32 %v3595_v62, %v3584_v9  ;;  %v3598_v41 = vadd.f32 %v3596_v3, %v3585_v27  ;;  %v3606_v6 = vmul.f32 %v6767_v59, %v3491_v45  ;;  %v3478_v28 = vadd.f32 %v3476_v23, %v3466_v11  ;;  %v5976_v3 = vld [vmem:[%s7303_s13 + $0x20] ss:$0 sps:$4 sm:$0xff]  }
 0x60d   : > { %5844 = vmatmul.mubr.msk.f32.vlgmr.msra.gmra.mrb[34].mxu0 %vm2969_vm12, %v6330_v14  ;;  %v3479_v47 = vadd.f32 %v3477_v63, %v3467_v17  ;;  %v3487_v25 = vmul.f32 %v6812_v52, %v3480_v18  ;;  %v3488_v44 = vmul.f32 %v6812_v52, %v3481_v33  ;;  %v3618_v58 = vmul.f32 %v6774_v19, %v3611_v30  ;;  %v3657_v18 = vld [vmem:[#allocation4 + $0xa9] sm:$0x3] }
 0x60e   : > { %5850 = vmatprep.mubr.msk.f32.mxu0 %vm6004_vm5, %v6002_v54  ;;  %5940 = vmatpush3.bf16.msk.msra.mxu0 %vm6869_vm14, %v5938_v0  ;;  %v3608_v50 = vadd.f32 %v3606_v6, %v3597_v43  ;;  %v3609_v49 = vadd.f32 %v3607_v22, %v3598_v41  ;;  %v3619_v59 = vmul.f32 %v6774_v19, %v3612_v38  ;;  %v3667_v22 = vld [vmem:[#allocation4 + $0xa2] sm:$0xff]  ;;  %v3802_v0 = vsel %vm2579_vm7, %v5976_v3, 0 }
 0x60f   : > { %5941 = vmatprep.subr.bf16.mxu0 %v6003_v55  ;;  %v3489_v42 = vadd.f32 %v3487_v25, %v3478_v28  ;;  %v3490_v57 = vadd.f32 %v3488_v44, %v3479_v47  ;;  %v3498_v1 = vmul.f32 %v6798_v40, %v3491_v45  ;;  %v3641_v5 = vmul.f32 %v6788_v37, %v3634_v26 }
 0x610   : > { %v3620_v51 = vadd.f32 %v3618_v58, %v3608_v50  ;;  %v3621_v4 = vadd.f32 %v3619_v59, %v3609_v49  ;;  %v3629_v7 = vmul.f32 %v6781_v24, %v3622_v13  ;;  %v3630_v12 = vmul.f32 %v6781_v24, %v3623_v48 }
 0x611   : > { %5851 = vmatmul.mubr.msk.f32.vlgmr.msra.gmra.mrb[36].mxu0 %vm2969_vm12, %v6330_v14  ;;  %v3500_v46 = vadd.f32 %v3498_v1, %v3489_v42  ;;  %v3501_v19 = vadd.f32 %v3499_v10, %v3490_v57  ;;  %v3652_v16 = vmul.f32 %v6804_v2, %v3645_v31  ;;  %v3640_v61 = vmul.f32 %v6788_v37, %v3633_v60  ;;  %v5977_v42 = vld [vmem:[%s7304_s14] sm:$0xff]   ;;  %v5978_v57 = vld [vmem:[%s7304_s14 + $0x8] ss:$0 sps:$4 sm:$0xff]  }
 0x612   : > { %5857 = vmatprep.mubr.msk.f32.mxu0 %vm6004_vm5, %v6002_v54  ;;  %v3631_v39 = vadd.f32 %v3629_v7, %v3620_v51  ;;  %v3632_v21 = vadd.f32 %v3630_v12, %v3621_v4  ;;  %v3653_v29 = vmul.f32 %v6804_v2, %v3646_v56  ;;  %v3663_v15 = vmul.f32 %v6812_v52, %v3656_v32  ;;  %v5979_v32 = vld [vmem:[%s7306_s16] sm:$0xff]  }
 0x613   : > { %v5942_v23 = vpack.c.bf16 %v3501_v19, %v3500_v46  ;;  %v3664_v8 = vmul.f32 %v6812_v52, %v3657_v18  ;;  %v3674_v37 = vmul.f32 %v6798_v40, %v3667_v22  ;;  %v3675_v2 = vmul.f32 %v6798_v40, %v3668_v36  ;;  %v5973_v40 = vld [vmem:[%s7303_s13 + $0x8] sm:$0xff]   ;;  %5881 = vmatprep.subr.bf16.mxu1 %v5977_v42 }
 0x614   : > { %v3642_v35 = vadd.f32 %v3640_v61, %v3631_v39  ;;  %v3643_v24 = vadd.f32 %v3641_v5, %v3632_v21  ;;  %5882 = vmatpush3.bf16.msra.mxu1 %v5977_v42  ;;  %v3879_v1 = vsel %vm2579_vm7, %v5978_v57, 0  ;;  %v5980_v18 = vld [vmem:[%s7306_s16 + $0x8] sm:$0xff]   ;;  %v5981_v39 = vld [vmem:[%s7306_s16 + $0x10] sm:$0xff]   ;;  %v5983_v21 = vld [vmem:[%s7306_s16 + $0x20] sm:$0xff]  }
 0x615   : > { %5944 = vmatpush3.bf16.msk.msra.mxu0 %vm6869_vm14, %v5942_v23  ;;  %5950 = vmatprep.subr.msk.bf16.mxu1 %vm2579_vm7, %v5978_v57  ;;  %v5984_v61 = vld [vmem:[%s7306_s16 + $0x28] ss:$0 sps:$4 sm:$0xff]   ;;  %v6006_v23 = vmov 1966171168  }
 0x616   : > { %5945 = vmatprep.subr.bf16.mxu0 %v6003_v55  ;;  %v3654_v45 = vadd.f32 %v3652_v16, %v3642_v35  ;;  %v3655_v53 = vadd.f32 %v3653_v29, %v3643_v24  ;;  %v5972_v55 = vld [vmem:[%s7303_s13] sm:$0xff]   ;;  %v4919_v29 = vsel %vm2579_vm7, %v5984_v61, 0  ;;  %v3948_v22 = vunpack.c.l.s4 %v6006_v23 }
 0x618   : > { %5858 = vmatmul.mubr.msk.f32.vlgmr.msra.gmra.mrb[38].mxu0 %vm2969_vm12, %v6330_v14  ;;  %v3665_v33 = vadd.f32 %v3663_v15, %v3654_v45  ;;  %v3666_v9 = vadd.f32 %v3664_v8, %v3655_v53  ;;  %5884 = vmatpush3.bf16.msra.mxu1 %v3879_v1  ;;  %v3949_v36 = vunpack.c.0.s8 %v3948_v22 }
 0x619   : > { %5864 = vmatprep.mubr.msk.f32.mxu0 %vm6004_vm5, %v6002_v54  ;;  %5889 = vmatprep.subr.bf16.mxu1 %v5979_v32  ;;  %v5982_v54 = vld [vmem:[%s7306_s16 + $0x18] sm:$0xff]  }
 0x61a   : > { %v3676_v52 = vadd.f32 %v3674_v37, %v3665_v33  ;;  %v3677_v27 = vadd.f32 %v3675_v2, %v3666_v9  ;;  %v7026_v35 = vsub.s32 %v3949_v36, %v6303_v20 }
 0x61c   : > { %v5946_v62 = vpack.c.bf16 %v3677_v27, %v3676_v52 }
 0x61e   : > { %5948 = vmatpush3.bf16.msk.msra.mxu0 %vm6869_vm14, %v5946_v62  ;;  %v4314_v62 = vld [vmem:[#allocation6] sm:$0x1f] }
 0x61f   : > { %5867 = vmatprep.subr.bf16.mxu0 %v5972_v55 }
 0x621   : > { %5865 = vmatmul.mubr.msk.f32.vlgmr.msra.gmra.mrb[40].mxu0 %vm2969_vm12, %v6330_v14  ;;  %v5975_v14 = vld [vmem:[%s7303_s13 + $0x18] sm:$0xff]  }
 0x622   : > { %5868 = vmatpush3.bf16.msra.mxu0 %v5972_v55  ;;  %v7033_v55 = vld [vmem:[%s7305_s15] ss:$0 sm:$0xff] }
 0x623   : > { %5869 = vmatprep.subr.bf16.mxu0 %v5973_v40 }
 0x626   : > { %5870 = vmatpush3.bf16.msra.mxu0 %v5973_v40 }
 0x627   : > { %5871 = vmatprep.subr.bf16.mxu0 %v5974_v34 }
 0x62a   : > { %5872 = vmatpush3.bf16.msra.mxu0 %v5974_v34 }
 0x62b   : > { %5873 = vmatprep.subr.bf16.mxu0 %v5975_v14 }
 0x62e   : > { %5874 = vmatpush3.bf16.msra.mxu0 %v5975_v14 }
 0x62f   : > { %5949 = vmatprep.subr.msk.bf16.mxu0 %vm2579_vm7, %v5976_v3 }
 0x632   : > { %5876 = vmatpush3.bf16.msra.mxu0 %v3802_v0 }
 0x6d3   : > { %v3042_v11 = vpop.f32.mrb[32].mxu0 }
 0x6d4   : > { %v3046_v17 = vmax.f32 %v3042_v11, 0.0  ;;  %v5838_v63 = vpop.f32.mrb[33].mxu0 }
 0x6d5   : > { %v4324_v63 = vmul.f32 %v7033_v55, %v4314_v62 }
 0x6d6   : > { %3048 = vst.msk [vmem:[#allocation5] sm:$0x1f] %vm3047_vm15, %v3046_v17 }
 0x6e0   : > { %v3219_v30 = vpop.f32.mrb[34].mxu0 }
 0x6e1   : > { %v3223_v38 = vmax.f32 %v3219_v30, 0.0  ;;  %v5845_v10 = vpop.f32.mrb[35].mxu0 }
 0x6e3   : > { %3224 = vst.msk [vmem:[#allocation5 + $0x5] sm:$0x1f] %vm3047_vm15, %v3223_v38 }
 0x6e4   : > { %v3395_v43 = vpop.f32.mrb[36].mxu0 }
 0x6e5   : > { %v3399_v41 = vmax.f32 %v3395_v43, 0.0  ;;  %v5852_v6 = vpop.f32.mrb[37].mxu0 }
 0x6e7   : > { %3400 = vst.msk [vmem:[#allocation5 + $0xa] sm:$0x1f] %vm3047_vm15, %v3399_v41 }
 0x6ea   : > { %v3753_v13 = vld [vmem:[#allocation5] sm:$0xff] }
 0x6eb   : > { %v3571_v26 = vpop.f32.mrb[38].mxu0 }
 0x6ec   : > { %v3575_v28 = vmax.f32 %v3571_v26, 0.0  ;;  %v5859_v47 = vpop.f32.mrb[39].mxu0 }
 0x6ed   : > { %v4334_v47 = vld [vmem:[#allocation6 + $0x1] sm:$0x1f] }
 0x6ee   : > { %3576 = vst.msk [vmem:[#allocation5 + $0xf] sm:$0x1f] %vm3047_vm15, %v3575_v28 }
 0x6f4   : > { %v3747_v25 = vpop.f32.mrb[40].mxu0 }
 0x6f5   : > { %v3751_v44 = vmax.f32 %v3747_v25, 0.0  ;;  %v3754_v48 = vld [vmem:[#allocation5 + $0x8] sm:$0xff]  ;;  %v5866_v50 = vpop.f32.mrb[41].mxu0  ;;  %v7051_v25 = vld [vmem:[%s7305_s15 + $0x1] ss:$0 sm:$0xff] }
 0x6f6   : > { %v3766_v49 = vpack.c.bf16 %v3754_v48, %v3753_v13 }
 0x6f7   : > { %3752 = vst.msk [vmem:[#allocation5 + $0x14] sm:$0x1f] %vm3047_vm15, %v3751_v44 }
 0x6f8   : > { %5877 = vmatprep.mubr.msk.bf16.mxu0 %vm2834_vm9, %v3766_v49 }
 0x6fe   : > { %v3755_v58 = vld [vmem:[#allocation5 + $0x10] sm:$0xff]  ;;  %v3756_v59 = vld [vmem:[#allocation5 + $0x18] sm:$0x1] }
 0x6ff   : > { %v3767_v31 = vpack.c.bf16 %v3756_v59, %v3755_v58 }
 0x701   : > { %5878 = vmatmul.mubr.msk.bf16.vlgmr.msra.gmra.mrb[44].mxu0 %vm2834_vm9, %v3767_v31 }
 0x7d4   : > { %v5879_v60 = vpop.f32.mrb[44].mxu0 }
 0x7d5   : > { %v3838_v5 = vpop.f32.mrb[45].mxu0  ;;  %v3855_v51 = vmax.f32 %v5879_v60, 0.0  ;;  %v4344_v60 = vmul.f32 %v7051_v25, %v4334_v47 }
 0x7d6   : > { %v5880_v56 = vpop.f32.mrb[46].mxu0  ;;  %v3853_v12 = vmax.f32 %v3838_v5, 0.0 }
 0x7d7   : > { %v3856_v4 = vmax.f32 %v5880_v56, 0.0  ;;  %v3841_v7 = vpop.f32.mrb[47].mxu0 }
 0x7d8   : > { %v3854_v46 = vmax.f32 %v3841_v7, 0.0 }
 0x7d9   : > { %v3861_v19 = vpack.c.bf16 %v3856_v4, %v3855_v51 }
 0x7da   : > { %v3860_v16 = vpack.c.bf16 %v3854_v46, %v3853_v12 }
 0x7dc   : > { %5885 = vmatprep.mubr.msk.bf16.mxu1 %vm3871_vm0, %v3860_v16 }
 0x7dd   : > { %5886 = vmatmul.mubr.msk.bf16.vlgmr.msra.gmra.mrb[40].mxu1 %vm3871_vm0, %v3861_v19 }
 0x7de   : > { %5890 = vmatpush3.bf16.msra.mxu1 %v5979_v32 }
 0x7df   : > { %5891 = vmatprep.subr.bf16.mxu1 %v5980_v18 }
 0x7e2   : > { %5892 = vmatpush3.bf16.msra.mxu1 %v5980_v18 }
 0x7e3   : > { %5893 = vmatprep.subr.bf16.mxu1 %v5981_v39 }
 0x7e6   : > { %5894 = vmatpush3.bf16.msra.mxu1 %v5981_v39 }
 0x7e7   : > { %5895 = vmatprep.subr.bf16.mxu1 %v5982_v54 }
 0x7ea   : > { %5896 = vmatpush3.bf16.msra.mxu1 %v5982_v54 }
 0x7eb   : > { %5897 = vmatprep.subr.bf16.mxu1 %v5983_v21 }
 0x7ee   : > { %5898 = vmatpush3.bf16.msra.mxu1 %v5983_v21 }
 0x7ef   : > { %5951 = vmatprep.subr.msk.bf16.mxu1 %vm2579_vm7, %v5984_v61 }
 0x7f2   : > { %5900 = vmatpush3.bf16.msra.mxu1 %v4919_v29 }
 0x8b0   : > { %v5887_v24 = vpop.f32.mrb[40].mxu1 }
 0x8b1   : > { %v3932_v15 = vmax.f32 %v5887_v24, 0.0  ;;  %v3915_v8 = vpop.f32.mrb[41].mxu1 }
 0x8b2   : > { %v3930_v45 = vmax.f32 %v3915_v8, 0.0  ;;  %v5888_v53 = vpop.f32.mrb[42].mxu1 }
 0x8b3   : > { %v4044_v37 = vcombine.high %v3932_v15, %v3932_v15  ;;  %v4051_v2 = vrot.slane %v3932_v15, %v7026_v35  ;;  %v3933_v33 = vmax.f32 %v5888_v53, 0.0  ;;  %v3918_v9 = vpop.f32.mrb[43].mxu1 }
 0x8b4   : > { %v3946_v52 = vcombine.high %v3930_v45, %v3930_v45  ;;  %v3953_v27 = vrot.slane %v3930_v45, %v7026_v35  ;;  %v3931_v34 = vmax.f32 %v3918_v9, 0.0 }
 0x8b5   : > { %v4058_v20 = vrot.slane %v4044_v37, %v7026_v35  ;;  %v4099_v40 = vrot.slane %v3933_v33, %v7026_v35  ;;  %v4059_v0 = vcombine.high %v4051_v2, %v4051_v2  ;;  %v7039_v17 = vrot.slane %v4051_v2, %v7026_v35 }
 0x8b6   : > { %v3960_v14 = vrot.slane %v3946_v52, %v7026_v35  ;;  %v3961_v3 = vcombine.high %v3953_v27, %v3953_v27  ;;  %v3969_v38 = vrot.slane %v3953_v27, %v7026_v35  ;;  %v3995_v28 = vcombine.high %v3931_v34, %v3931_v34 }
 0x8b7   : > { %v4060_v11 = vcombine.high %v4058_v20, %v4058_v20  ;;  %v4074_v41 = vrot.slane %v4058_v20, %v7026_v35  ;;  %v4106_v26 = vrot.slane %v4099_v40, %v7026_v35  ;;  %v4081_v49 = vrot.slane %v4059_v0, %v7026_v35  ;;  %v4354_v20 = vld [vmem:[#allocation6 + $0x2] sm:$0x1f]  ;;  %v7081_v40 = vld [vmem:[%s7305_s15 + $0x2] ss:$0 sm:$0xff] }
 0x8b8   : > { %v3962_v30 = vcombine.high %v3960_v14, %v3960_v14  ;;  %v3976_v10 = vrot.slane %v3960_v14, %v7026_v35  ;;  %v3983_v43 = vrot.slane %v3961_v3, %v7026_v35  ;;  %v4002_v31 = vrot.slane %v3931_v34, %v7026_v35 }
 0x8b9   : > { %v4088_v6 = vrot.slane %v4060_v11, %v7026_v35  ;;  %v4089_v5 = vcombine.high %v7039_v17, %v7039_v17  ;;  %v4285_v4 = vrot.slane %v4106_v26, %v7026_v35  ;;  %v4009_v19 = vrot.slane %v3995_v28, %v7026_v35 }
 0x8ba   : > { %v3990_v44 = vrot.slane %v3962_v30, %v7026_v35  ;;  %v3992_v13 = vcombine.high %v3976_v10, %v3976_v10  ;;  %v4107_v48 = vcombine.low %v3969_v38, %v3983_v43  ;;  %v5589_v50 = vcombine.high %v3969_v38, %v3983_v43 }
 0x8bb   : > { %v4263_v58 = vcombine.low %v4074_v41, %v4088_v6  ;;  %v5591_v59 = vcombine.high %v4074_v41, %v4088_v6  ;;  %v4129_v1 = vrot.slane %v3976_v10, %v7026_v35  ;;  %v4091_v16 = vcombine.high %v4081_v49, %v4081_v49 }
 0x8bc   : > { %v4115_v42 = vrot.slane %v4107_v48, %v7026_v35  ;;  %v4122_v57 = vrot.slane %v5589_v50, %v7026_v35  ;;  %v4146_v12 = vcombine.low %v3990_v44, %v3992_v13  ;;  %v3994_v46 = vcombine.high %v3990_v44, %v3990_v44 }
 0x8bd   : > { %v4271_v56 = vrot.slane %v4263_v58, %v7026_v35  ;;  %v4278_v51 = vrot.slane %v5591_v59, %v7026_v35  ;;  %v4010_v18 = vcombine.high %v4002_v31, %v4002_v31  ;;  %v4018_v39 = vrot.slane %v4002_v31, %v7026_v35 }
 0x8be   : > { %v4130_v7 = vcombine.low %v4115_v42, %v4122_v57  ;;  %v4144_v21 = vrot.slane %v4129_v1, %v7026_v35  ;;  %v4011_v61 = vcombine.high %v4009_v19, %v4009_v19  ;;  %v4025_v29 = vrot.slane %v4009_v19, %v7026_v35 }
 0x8bf   : > { %v4286_v32 = vcombine.low %v4271_v56, %v4278_v51  ;;  %v4300_v22 = vrot.slane %v4285_v4, %v7026_v35  ;;  %v4032_v36 = vrot.slane %v4010_v18, %v7026_v35  ;;  %v4147_v24 = vcombine.low %v3994_v46, %v4018_v39 }
 0x8c0   : > { %v4137_v54 = vrot.slane %v4130_v7, %v7026_v35  ;;  %v4039_v8 = vrot.slane %v4011_v61, %v7026_v35  ;;  %v4041_v45 = vcombine.high %v4025_v29, %v4025_v29  ;;  %v4154_v53 = vrot.slane %v4146_v12, %v7026_v35 }
 0x8c1   : > { %v4293_v23 = vrot.slane %v4286_v32, %v7026_v35  ;;  %v4161_v2 = vrot.slane %v4147_v24, %v7026_v35  ;;  %v4168_v33 = vrot.slane %v4032_v36, %v7026_v35  ;;  %v5590_v9 = vcombine.high %v4018_v39, %v4032_v36  ;;  %v7119_v32 = vld [vmem:[%s7305_s15 + $0x5] ss:$0 sm:$0xff] }
 0x8c2   : > { %v4145_v15 = vcombine.low %v4137_v54, %v4144_v21  ;;  %v4225_v52 = vcombine.low %v4081_v49, %v4089_v5  ;;  %v4043_v27 = vcombine.high %v4039_v8, %v4039_v8  ;;  %v4186_v62 = vcombine.low %v4025_v29, %v4039_v8  ;;  %v7109_v5 = vld [vmem:[%s7305_s15 + $0x4] ss:$0 sm:$0xff]  ;;  %v7124_v54 = vld [vmem:[%s7305_s15 + $0x6] ss:$0 sm:$0xff] }
 0x8c3   : > { %v4301_v37 = vcombine.low %v4293_v23, %v4300_v22  ;;  %v4169_v34 = vcombine.low %v4154_v53, %v4161_v2  ;;  %v4349_v14 = vadd.f32 %v4344_v60, %v4324_v63  ;;  %v4193_v3 = vrot.slane %v5590_v9, %v7026_v35  ;;  %v4439_v21 = vld [vmem:[#allocation6 + $0x30] sm:$0x1f] }
 0x8c4   : > { %4309 = vst.msk [vmem:[#allocation6 + $0x9] sm:$0x1f] %vm4308_vm2, %v4145_v15  ;;  %v4200_v0 = vrot.slane %v4186_v62, %v7026_v35  ;;  %v4207_v11 = vrot.slane %v4041_v45, %v7026_v35  ;;  %v4224_v30 = vcombine.low %v4043_v27, %v7039_v17  ;;  %v4246_v38 = vrot.slane %v4091_v16, %v7026_v35  ;;  %v7099_v17 = vld [vmem:[%s7305_s15 + $0x3] ss:$0 sm:$0xff] }
 0x8c5   : > { %4313 = vst.msk [vmem:[#allocation6 + $0x29] sm:$0x1f] %vm4308_vm2, %v4301_v37  ;;  %v4176_v10 = vrot.slane %v4169_v34, %v7026_v35  ;;  %v4183_v43 = vrot.slane %v4168_v33, %v7026_v35  ;;  %v4364_v41 = vmul.f32 %v7081_v40, %v4354_v20  ;;  %v4239_v6 = vrot.slane %v4225_v52, %v7026_v35 }
 0x8c6   : > { %v4208_v26 = vcombine.low %v4193_v3, %v4200_v0  ;;  %v4232_v63 = vrot.slane %v4224_v30, %v7026_v35  ;;  %v4222_v44 = vrot.slane %v4207_v11, %v7026_v35  ;;  %v4261_v48 = vrot.slane %v4246_v38, %v7026_v35  ;;  %v7140_v0 = vld [vmem:[%s7305_s15 + $0x7] ss:$0 sm:$0xff] }
 0x8c7   : > { %v4184_v28 = vcombine.low %v4176_v10, %v4183_v43  ;;  %v4369_v58 = vadd.f32 %v4364_v41, %v4349_v14  ;;  %v7131_v9 = vmul.f32 %v7124_v54, %v4439_v21 }
 0x8c8   : > { %v4215_v47 = vrot.slane %v4208_v26, %v7026_v35  ;;  %v4247_v13 = vcombine.low %v4232_v63, %v4239_v6 }
 0x8c9   : > { %4310 = vst.msk [vmem:[#allocation6 + $0x11] sm:$0x1f] %vm4308_vm2, %v4184_v28 }
 0x8ca   : > { %v4223_v59 = vcombine.low %v4215_v47, %v4222_v44  ;;  %v4254_v31 = vrot.slane %v4247_v13, %v7026_v35 }
 0x8cb   : > { %v4315_v50 = vld [vmem:[#allocation6 + $0x8] sm:$0x1f] }
 0x8cc   : > { %v4335_v49 = vld [vmem:[#allocation6 + $0x9] sm:$0x1f]  ;;  %v4325_v42 = vmul.f32 %v7033_v55, %v4315_v50  ;;  %v4262_v4 = vcombine.low %v4254_v31, %v4261_v48  ;;  %4311 = vst.msk [vmem:[#allocation6 + $0x19] sm:$0x1f] %vm4308_vm2, %v4223_v59  ;;  %v7151_v48 = vld [vmem:[%s7305_s15 + $0x8] ss:$0 sm:$0xff] }
 0x8cd   : > { %v4345_v57 = vmul.f32 %v7051_v25, %v4335_v49  ;;  %v4374_v1 = vld [vmem:[#allocation6 + $0x8] sm:$0x1f] }
 0x8ce   : > { %v4394_v60 = vld [vmem:[#allocation6 + $0x9] sm:$0x1f]  ;;  %v4384_v51 = vmul.f32 %v7099_v17, %v4374_v1  ;;  %4312 = vst.msk [vmem:[#allocation6 + $0x21] sm:$0x1f] %vm4308_vm2, %v4262_v4 }
 0x8cf   : > { %v4355_v56 = vld [vmem:[#allocation6 + $0xa] sm:$0x1f]  ;;  %v4350_v7 = vadd.f32 %v4345_v57, %v4325_v42  ;;  %v4404_v46 = vmul.f32 %v7109_v5, %v4394_v60 }
 0x8d0   : > { %v4389_v12 = vadd.f32 %v4384_v51, %v4369_v58  ;;  %v4365_v19 = vmul.f32 %v7081_v40, %v4355_v56  ;;  %v4414_v16 = vld [vmem:[#allocation6 + $0xa] sm:$0x1f]  ;;  %v4316_v61 = vld [vmem:[#allocation6 + $0x10] sm:$0x1f] }
 0x8d1   : > { %v4438_v39 = vld [vmem:[#allocation6 + $0x28] sm:$0x1f]  ;;  %v4336_v29 = vld [vmem:[#allocation6 + $0x11] sm:$0x1f]  ;;  %v4326_v36 = vmul.f32 %v7033_v55, %v4316_v61  ;;  %v4424_v45 = vmul.f32 %v7119_v32, %v4414_v16 }
 0x8d2   : > { %v4409_v18 = vadd.f32 %v4404_v46, %v4389_v12  ;;  %v4356_v23 = vld [vmem:[#allocation6 + $0x12] sm:$0x1f]  ;;  %v4370_v22 = vadd.f32 %v4365_v19, %v4350_v7  ;;  %v4346_v24 = vmul.f32 %v7051_v25, %v4336_v29  ;;  %v7135_v3 = vmul.f32 %v7124_v54, %v4438_v39 }
 0x8d3   : > { %v4375_v15 = vld [vmem:[#allocation6 + $0x10] sm:$0x1f]  ;;  %v4317_v52 = vld [vmem:[#allocation6 + $0x18] sm:$0x1f]  ;;  %v4366_v34 = vmul.f32 %v7081_v40, %v4356_v23 }
 0x8d4   : > { %v4395_v8 = vld [vmem:[#allocation6 + $0x11] sm:$0x1f]  ;;  %v4385_v53 = vmul.f32 %v7099_v17, %v4375_v15  ;;  %v4337_v27 = vld [vmem:[#allocation6 + $0x19] sm:$0x1f]  ;;  %v4351_v62 = vadd.f32 %v4346_v24, %v4326_v36  ;;  %v4429_v14 = vadd.f32 %v4424_v45, %v4409_v18  ;;  %v4327_v11 = vmul.f32 %v7033_v55, %v4317_v52  ;;  %v4458_v52 = vld [vmem:[#allocation6 + $0x29] sm:$0x1f] }
 0x8d5   : > { %v4415_v37 = vld [vmem:[#allocation6 + $0x12] sm:$0x1f]  ;;  %v4357_v20 = vld [vmem:[#allocation6 + $0x1a] sm:$0x1f]  ;;  %v4347_v30 = vmul.f32 %v7051_v25, %v4337_v27  ;;  %v4405_v41 = vmul.f32 %v7109_v5, %v4395_v8  ;;  %v4377_v63 = vld [vmem:[#allocation6 + $0x20] sm:$0x1f] }
 0x8d6   : > { %v4435_v2 = vld [vmem:[#allocation6 + $0x10] sm:$0x1f]  ;;  %v4376_v38 = vld [vmem:[#allocation6 + $0x18] sm:$0x1f]  ;;  %v4390_v10 = vadd.f32 %v4385_v53, %v4370_v22  ;;  %v4371_v26 = vadd.f32 %v4366_v34, %v4351_v62  ;;  %v4425_v44 = vmul.f32 %v7119_v32, %v4415_v37  ;;  %v4367_v49 = vmul.f32 %v7081_v40, %v4357_v20  ;;  %v4397_v58 = vld [vmem:[#allocation6 + $0x21] sm:$0x1f] }
 0x8d7   : > { %v4455_v33 = vld [vmem:[#allocation6 + $0x11] sm:$0x1f]  ;;  %v4396_v43 = vld [vmem:[#allocation6 + $0x19] sm:$0x1f]  ;;  %v4386_v28 = vmul.f32 %v7099_v17, %v4376_v38  ;;  %v4445_v13 = vmul.f32 %v7124_v54, %v4435_v2  ;;  %v4352_v50 = vadd.f32 %v4347_v30, %v4327_v11  ;;  %v4387_v1 = vmul.f32 %v7099_v17, %v4377_v63  ;;  %v4417_v51 = vld [vmem:[#allocation6 + $0x22] sm:$0x1f] }
 0x8d8   : > { %v4475_v6 = vld [vmem:[#allocation6 + $0x12] sm:$0x1f]  ;;  %v4416_v47 = vld [vmem:[#allocation6 + $0x1a] sm:$0x1f]  ;;  %v4410_v59 = vadd.f32 %v4405_v41, %v4390_v10  ;;  %v4465_v57 = vmul.f32 %v7140_v0, %v4455_v33  ;;  %v4406_v56 = vmul.f32 %v7109_v5, %v4396_v43  ;;  %v4437_v46 = vld [vmem:[#allocation6 + $0x20] sm:$0x1f]  ;;  %v4407_v21 = vmul.f32 %v7109_v5, %v4397_v58 }
 0x8d9   : > { %v4436_v31 = vld [vmem:[#allocation6 + $0x18] sm:$0x1f]  ;;  %v4391_v60 = vadd.f32 %v4386_v28, %v4371_v26  ;;  %v4485_v4 = vmul.f32 %v7151_v48, %v4475_v6  ;;  %v4372_v7 = vadd.f32 %v4367_v49, %v4352_v50  ;;  %v4450_v16 = vadd.f32 %v4445_v13, %v4429_v14  ;;  %v4318_v18 = vld [vmem:[#allocation6 + $0x20] sm:$0x1f]  ;;  %v4378_v30 = vld [vmem:[#allocation6 + $0x28] sm:$0x1f] }
 0x8da   : > { %v4456_v42 = vld [vmem:[#allocation6 + $0x19] sm:$0x1f]  ;;  %v4430_v12 = vadd.f32 %v4425_v44, %v4410_v59  ;;  %v4446_v19 = vmul.f32 %v7124_v54, %v4436_v31  ;;  %v4338_v39 = vld [vmem:[#allocation6 + $0x21] sm:$0x1f]  ;;  %v4426_v29 = vmul.f32 %v7119_v32, %v4416_v47  ;;  %v4328_v45 = vmul.f32 %v7033_v55, %v4318_v18  ;;  %v4418_v50 = vld [vmem:[#allocation6 + $0x2a] sm:$0x1f] }
 0x8db   : > { %v4411_v61 = vadd.f32 %v4406_v56, %v4391_v60  ;;  %v4466_v23 = vmul.f32 %v7140_v0, %v4456_v42  ;;  %v4476_v22 = vld [vmem:[#allocation6 + $0x1a] sm:$0x1f]  ;;  %v4392_v36 = vadd.f32 %v4387_v1, %v4372_v7  ;;  %v4457_v15 = vld [vmem:[#allocation6 + $0x21] sm:$0x1f]  ;;  %v4470_v8 = vadd.f32 %v4465_v57, %v4450_v16 }
 0x8dc   : > { %v4451_v24 = vadd.f32 %v4446_v19, %v4430_v12  ;;  %v4358_v53 = vld [vmem:[#allocation6 + $0x22] sm:$0x1f]  ;;  %v4427_v37 = vmul.f32 %v7119_v32, %v4417_v51  ;;  %v4447_v33 = vmul.f32 %v7124_v54, %v4437_v46  ;;  %v4348_v27 = vmul.f32 %v7051_v25, %v4338_v39  ;;  %v4478_v54 = vld [vmem:[#allocation6 + $0x2a] sm:$0x1f] }
 0x8dd   : > { %v4431_v2 = vadd.f32 %v4426_v29, %v4411_v61  ;;  %v4412_v62 = vadd.f32 %v4407_v21, %v4392_v36  ;;  %v4477_v34 = vld [vmem:[#allocation6 + $0x22] sm:$0x1f]  ;;  %v4486_v14 = vmul.f32 %v7151_v48, %v4476_v22  ;;  %v4490_v11 = vadd.f32 %v4485_v4, %v4470_v8  ;;  %v4398_v25 = vld [vmem:[#allocation6 + $0x29] sm:$0x1f] }
 0x8de   : > { %v4471_v20 = vadd.f32 %v4466_v23, %v4451_v24  ;;  %v4467_v10 = vmul.f32 %v7140_v0, %v4457_v15  ;;  %v4353_v55 = vadd.f32 %v4348_v27, %v4328_v45  ;;  %v4368_v43 = vmul.f32 %v7081_v40, %v4358_v53 }
 0x8df   : > { %v4452_v38 = vadd.f32 %v4447_v33, %v4431_v2  ;;  %v4432_v41 = vadd.f32 %v4427_v37, %v4412_v62  ;;  %v4468_v6 = vmul.f32 %v7140_v0, %v4458_v52  ;;  %v4495_v63 = vmax.f32 %v4490_v11, 0.0 }
 0x8e0   : > { %v4491_v26 = vadd.f32 %v4486_v14, %v4471_v20  ;;  %v4487_v47 = vmul.f32 %v7151_v48, %v4477_v34  ;;  %v4373_v44 = vadd.f32 %v4368_v43, %v4353_v55  ;;  %v4388_v13 = vmul.f32 %v7099_v17, %v4378_v30  ;;  %v4459_v30 = vld [vmem:[#allocation6 + $0x31] sm:$0x1f] }
 0x8e1   : > { %v4472_v28 = vadd.f32 %v4467_v10, %v4452_v38  ;;  %v4453_v49 = vadd.f32 %v7135_v3, %v4432_v41  ;;  %v4505_v59 = vcombine.high %v4495_v63, %v4495_v63  ;;  %v4512_v40 = vrot.slane %v4495_v63, %v7026_v35 }
 0x8e2   : > { %v4496_v58 = vmax.f32 %v4491_v26, 0.0  ;;  %v4488_v31 = vmul.f32 %v7151_v48, %v4478_v54  ;;  %v4393_v57 = vadd.f32 %v4388_v13, %v4373_v44  ;;  %v4408_v1 = vmul.f32 %v7109_v5, %v4398_v25  ;;  %v4479_v26 = vld [vmem:[#allocation6 + $0x32] sm:$0x1f] }
 0x8e3   : > { %v4492_v42 = vadd.f32 %v4487_v47, %v4472_v28  ;;  %v4473_v60 = vadd.f32 %v4468_v6, %v4453_v49  ;;  %v4519_v56 = vrot.slane %v4505_v59, %v7026_v35  ;;  %v4520_v51 = vcombine.high %v4512_v40, %v4512_v40 }
 0x8e4   : > { %v4428_v4 = vmul.f32 %v7119_v32, %v4418_v50  ;;  %v4527_v7 = vrot.slane %v4512_v40, %v7026_v35  ;;  %v4544_v3 = vcombine.high %v4496_v58, %v4496_v58  ;;  %v4551_v12 = vrot.slane %v4496_v58, %v7026_v35 }
 0x8e5   : > { %v4497_v17 = vmax.f32 %v4492_v42, 0.0  ;;  %v4493_v46 = vadd.f32 %v4488_v31, %v4473_v60  ;;  %v4534_v19 = vrot.slane %v4519_v56, %v7026_v35  ;;  %v4541_v16 = vrot.slane %v4520_v51, %v7026_v35 }
 0x8e6   : > { %v4413_v18 = vadd.f32 %v4408_v1, %v4393_v57  ;;  %v4558_v5 = vrot.slane %v4544_v3, %v7026_v35  ;;  %v4559_v39 = vcombine.high %v4551_v12, %v4551_v12  ;;  %v4566_v21 = vrot.slane %v4551_v12, %v7026_v35 }
 0x8e7   : > { %v4583_v61 = vcombine.high %v4497_v17, %v4497_v17  ;;  %v4498_v29 = vmax.f32 %v4493_v46, 0.0  ;;  %v4590_v32 = vrot.slane %v4497_v17, %v7026_v35  ;;  %v4711_v23 = vcombine.low %v4527_v7, %v4541_v16 }
 0x8e8   : > { %v5601_v22 = vcombine.high %v4527_v7, %v4541_v16  ;;  %v4573_v36 = vrot.slane %v4558_v5, %v7026_v35  ;;  %v4580_v24 = vrot.slane %v4559_v39, %v7026_v35  ;;  %v4581_v15 = vcombine.high %v4566_v21, %v4566_v21 }
 0x8e9   : > { %v4597_v8 = vrot.slane %v4583_v61, %v7026_v35  ;;  %v4598_v45 = vcombine.high %v4590_v32, %v4590_v32  ;;  %v4605_v53 = vrot.slane %v4590_v32, %v7026_v35  ;;  %v4622_v37 = vcombine.high %v4498_v29, %v4498_v29 }
 0x8ea   : > { %v4629_v2 = vrot.slane %v4498_v29, %v7026_v35  ;;  %v4582_v33 = vcombine.high %v4580_v24, %v4580_v24  ;;  %v4713_v27 = vcombine.low %v4534_v19, %v4566_v21  ;;  %v4714_v62 = vcombine.low %v4580_v24, %v4581_v15 }
 0x8eb   : > { %v4612_v52 = vrot.slane %v4597_v8, %v7026_v35  ;;  %v4619_v20 = vrot.slane %v4598_v45, %v7026_v35  ;;  %v4721_v11 = vrot.slane %v4711_v23, %v7026_v35  ;;  %v4728_v38 = vrot.slane %v5601_v22, %v7026_v35 }
 0x8ec   : > { %v4637_v34 = vcombine.high %v4629_v2, %v4629_v2  ;;  %v4644_v14 = vrot.slane %v4629_v2, %v7026_v35  ;;  %v4735_v10 = vrot.slane %v4713_v27, %v7026_v35  ;;  %v4742_v55 = vrot.slane %v4714_v62, %v7026_v35 }
 0x8ed   : > { %v4760_v43 = vcombine.low %v4582_v33, %v4573_v36  ;;  %v4761_v41 = vcombine.low %v4605_v53, %v4619_v20  ;;  %v5602_v6 = vcombine.high %v4605_v53, %v4619_v20  ;;  %v4743_v63 = vcombine.low %v4721_v11, %v4728_v38 }
 0x8ee   : > { %v4763_v54 = vcombine.low %v4612_v52, %v4644_v14  ;;  %v4744_v25 = vcombine.low %v4735_v10, %v4742_v55  ;;  %v4433_v28 = vadd.f32 %v4428_v4, %v4413_v18  ;;  %v4469_v47 = vmul.f32 %v7140_v0, %v4459_v30 }
 0x8ef   : > { %v4770_v44 = vrot.slane %v4760_v43, %v7026_v35  ;;  %v4777_v13 = vrot.slane %v4761_v41, %v7026_v35  ;;  %v4784_v50 = vrot.slane %v5602_v6, %v7026_v35  ;;  %v4489_v59 = vmul.f32 %v7151_v48, %v4479_v26 }
 0x8f0   : > { %v4791_v49 = vrot.slane %v4763_v54, %v7026_v35  ;;  %v4454_v58 = vadd.f32 %v7131_v9, %v4433_v28  ;;  %v4636_v40 = vrot.slane %v4622_v37, %v7026_v35  ;;  %v4658_v31 = vrot.slane %v4637_v34, %v7026_v35 }
 0x8f1   : > { %v4758_v42 = vrot.slane %v4744_v25, %v7026_v35  ;;  %v4792_v57 = vcombine.low %v4770_v44, %v4777_v13  ;;  %v4751_v56 = vrot.slane %v4743_v63, %v7026_v35  ;;  %v4659_v17 = vcombine.high %v4644_v14, %v4644_v14 }
 0x8f2   : > { %v4793_v0 = vcombine.low %v4784_v50, %v4791_v49  ;;  %v4474_v1 = vadd.f32 %v4469_v47, %v4454_v58  ;;  %v4660_v60 = vcombine.high %v4658_v31, %v4658_v31  ;;  %v4651_v48 = vrot.slane %v4636_v40, %v7026_v35 }
 0x8f3   : > { %v4800_v51 = vrot.slane %v4792_v57, %v7026_v35  ;;  %v4759_v7 = vcombine.low %v4751_v56, %v4758_v42  ;;  %v4809_v5 = vcombine.low %v4658_v31, %v4659_v17 }
 0x8f4   : > { %v4807_v4 = vrot.slane %v4793_v0, %v7026_v35  ;;  %v4494_v9 = vadd.f32 %v4489_v59, %v4474_v1  ;;  %v4810_v46 = vcombine.low %v4660_v60, %v4651_v48 }
 0x8f5   : > { %v4819_v23 = vrot.slane %v4809_v5, %v7026_v35 }
 0x8f6   : > { %v4808_v3 = vcombine.low %v4800_v51, %v4807_v4  ;;  %v4499_v12 = vmax.f32 %v4494_v9, 0.0  ;;  %v4826_v61 = vrot.slane %v4810_v46, %v7026_v35 }
 0x8f8   : > { %v4876_v19 = vpack.c.bf16 %v4808_v3, %v4759_v7  ;;  %v4661_v16 = vcombine.high %v4499_v12, %v4499_v12  ;;  %v4668_v18 = vrot.slane %v4499_v12, %v7026_v35  ;;  %v4841_v15 = vcombine.low %v4819_v23, %v4826_v61 }
 0x8fa   : > { %5901 = vmatprep.mubr.msk.bf16.mxu1 %vm4911_vm3, %v4876_v19  ;;  %v4675_v39 = vrot.slane %v4661_v16, %v7026_v35  ;;  %v4676_v21 = vcombine.high %v4668_v18, %v4668_v18  ;;  %v4683_v29 = vrot.slane %v4668_v18, %v7026_v35  ;;  %v4849_v37 = vrot.slane %v4841_v15, %v7026_v35 }
 0x8fc   : > { %v4697_v32 = vrot.slane %v4676_v21, %v7026_v35  ;;  %v4690_v22 = vrot.slane %v4675_v39, %v7026_v35 }
 0x8fe   : > { %v4811_v36 = vcombine.low %v4683_v29, %v4697_v32  ;;  %v5603_v24 = vcombine.high %v4683_v29, %v4697_v32  ;;  %v4864_v2 = vrot.slane %v4690_v22, %v7026_v35 }
 0x900   : > { %v4833_v8 = vrot.slane %v4811_v36, %v7026_v35  ;;  %v4840_v45 = vrot.slane %v5603_v24, %v7026_v35  ;;  %v4871_v27 = vrot.slane %v4864_v2, %v7026_v35 }
 0x902   : > { %v4842_v53 = vcombine.low %v4833_v8, %v4840_v45 }
 0x904   : > { %v4856_v33 = vrot.slane %v4842_v53, %v7026_v35 }
 0x906   : > { %v4857_v52 = vcombine.low %v4849_v37, %v4856_v33 }
 0x908   : > { %v4877_v62 = vpack.c.bf16 %v4871_v27, %v4857_v52 }
 0x90a   : > { %5902 = vmatmul.mubr.msk.bf16.vlgmr.msra.gmra.mrb[44].mxu1 %vm4911_vm3, %v4877_v62 }
 0x9dd   : > { %v5903_v20 = vpop.f32.mrb[44].mxu1 }
 0x9de   : > { %v4972_v34 = vmax.f32 %v5903_v20, 0.0  ;;  %v4955_v14 = vpop.f32.mrb[45].mxu1 }
 0x9df   : > { %v4970_v11 = vmax.f32 %v4955_v14, 0.0  ;;  %v5904_v30 = vpop.f32.mrb[46].mxu1 }
 0x9e0   : > { %v5076_v38 = vcombine.high %v4972_v34, %v4972_v34  ;;  %v5083_v10 = vrot.slane %v4972_v34, %v7026_v35  ;;  %v4973_v55 = vmax.f32 %v5904_v30, 0.0  ;;  %v4958_v43 = vpop.f32.mrb[47].mxu1 }
 0x9e1   : > { %v4978_v41 = vcombine.high %v4970_v11, %v4970_v11  ;;  %v4985_v6 = vrot.slane %v4970_v11, %v7026_v35  ;;  %v4971_v63 = vmax.f32 %v4958_v43, 0.0 }
 0x9e2   : > { %v5090_v54 = vrot.slane %v5076_v38, %v7026_v35  ;;  %v5131_v26 = vrot.slane %v4973_v55, %v7026_v35  ;;  %v5091_v47 = vcombine.high %v5083_v10, %v5083_v10  ;;  %v5099_v56 = vrot.slane %v5083_v10, %v7026_v35 }
 0x9e3   : > { %v4992_v25 = vrot.slane %v4978_v41, %v7026_v35  ;;  %v4993_v28 = vcombine.high %v4985_v6, %v4985_v6  ;;  %v5001_v50 = vrot.slane %v4985_v6, %v7026_v35  ;;  %v5027_v42 = vcombine.high %v4971_v63, %v4971_v63 }
 0x9e4   : > { %v5092_v44 = vcombine.high %v5090_v54, %v5090_v54  ;;  %v5106_v59 = vrot.slane %v5090_v54, %v7026_v35  ;;  %v5138_v31 = vrot.slane %v5131_v26, %v7026_v35  ;;  %v5034_v17 = vrot.slane %v4971_v63, %v7026_v35 }
 0x9e5   : > { %v4994_v13 = vcombine.high %v4992_v25, %v4992_v25  ;;  %v5008_v49 = vrot.slane %v4992_v25, %v7026_v35  ;;  %v5015_v58 = vrot.slane %v4993_v28, %v7026_v35  ;;  %v5113_v3 = vrot.slane %v5091_v47, %v7026_v35 }
 0x9e6   : > { %v5120_v40 = vrot.slane %v5092_v44, %v7026_v35  ;;  %v5317_v19 = vrot.slane %v5138_v31, %v7026_v35  ;;  %v5041_v39 = vrot.slane %v5027_v42, %v7026_v35  ;;  %v5121_v21 = vcombine.high %v5099_v56, %v5099_v56 }
 0x9e7   : > { %v5022_v57 = vrot.slane %v4994_v13, %v7026_v35  ;;  %v5024_v0 = vcombine.high %v5008_v49, %v5008_v49  ;;  %v5139_v1 = vcombine.low %v5001_v50, %v5015_v58  ;;  %v5612_v60 = vcombine.high %v5001_v50, %v5015_v58 }
 0x9e8   : > { %v5295_v51 = vcombine.low %v5106_v59, %v5120_v40  ;;  %v5614_v4 = vcombine.high %v5106_v59, %v5120_v40  ;;  %v5161_v7 = vrot.slane %v5008_v49, %v7026_v35  ;;  %v5042_v29 = vcombine.high %v5034_v17, %v5034_v17 }
 0x9e9   : > { %v5147_v9 = vrot.slane %v5139_v1, %v7026_v35  ;;  %v5154_v48 = vrot.slane %v5612_v60, %v7026_v35  ;;  %v5178_v18 = vcombine.low %v5022_v57, %v5024_v0  ;;  %v5026_v5 = vcombine.high %v5022_v57, %v5022_v57 }
 0x9ea   : > { %v5303_v12 = vrot.slane %v5295_v51, %v7026_v35  ;;  %v5310_v46 = vrot.slane %v5614_v4, %v7026_v35  ;;  %v5050_v32 = vrot.slane %v5034_v17, %v7026_v35  ;;  %v5176_v22 = vrot.slane %v5161_v7, %v7026_v35 }
 0x9eb   : > { %v5162_v16 = vcombine.low %v5147_v9, %v5154_v48  ;;  %v5043_v36 = vcombine.high %v5041_v39, %v5041_v39  ;;  %v5057_v24 = vrot.slane %v5041_v39, %v7026_v35  ;;  %v5332_v8 = vrot.slane %v5317_v19, %v7026_v35 }
 0x9ec   : > { %v5318_v61 = vcombine.low %v5303_v12, %v5310_v46  ;;  %v5064_v45 = vrot.slane %v5042_v29, %v7026_v35  ;;  %v5179_v53 = vcombine.low %v5026_v5, %v5050_v32  ;;  %v5186_v52 = vrot.slane %v5178_v18, %v7026_v35 }
 0x9ed   : > { %v5169_v23 = vrot.slane %v5162_v16, %v7026_v35  ;;  %v5071_v2 = vrot.slane %v5043_v36, %v7026_v35  ;;  %v5073_v33 = vcombine.high %v5057_v24, %v5057_v24  ;;  %v5123_v14 = vcombine.high %v5113_v3, %v5113_v3 }
 0x9ee   : > { %v5325_v15 = vrot.slane %v5318_v61, %v7026_v35  ;;  %v5193_v62 = vrot.slane %v5179_v53, %v7026_v35  ;;  %v5200_v20 = vrot.slane %v5064_v45, %v7026_v35  ;;  %v5613_v34 = vcombine.high %v5050_v32, %v5064_v45 }
 0x9ef   : > { %v5177_v37 = vcombine.low %v5169_v23, %v5176_v22  ;;  %v5257_v11 = vcombine.low %v5113_v3, %v5121_v21  ;;  %v5075_v30 = vcombine.high %v5071_v2, %v5071_v2  ;;  %v5218_v38 = vcombine.low %v5057_v24, %v5071_v2 }
 0x9f0   : > { %v5333_v27 = vcombine.low %v5325_v15, %v5332_v8  ;;  %v5201_v10 = vcombine.low %v5186_v52, %v5193_v62  ;;  %v5225_v55 = vrot.slane %v5613_v34, %v7026_v35  ;;  %v5239_v41 = vrot.slane %v5073_v33, %v7026_v35 }
 0x9f1   : > { %5340 = vst.msk [vmem:[%s7256_s0] sm:$0x1f] %vm5339_vm4, %v5177_v37  ;;  %v5232_v43 = vrot.slane %v5218_v38, %v7026_v35  ;;  %v5256_v6 = vcombine.low %v5075_v30, %v5099_v56  ;;  %v5215_v26 = vrot.slane %v5200_v20, %v7026_v35  ;;  %v5271_v63 = vrot.slane %v5257_v11, %v7026_v35 }
 0x9f2   : > { %5344 = vst.msk [vmem:[%s7256_s0 + $0x20] sm:$0x1f] %vm5339_vm4, %v5333_v27  ;;  %v5208_v54 = vrot.slane %v5201_v10, %v7026_v35  ;;  %v5278_v25 = vrot.slane %v5123_v14, %v7026_v35  ;;  %v5254_v50 = vrot.slane %v5239_v41, %v7026_v35 }
 0x9f3   : > { %v5240_v28 = vcombine.low %v5225_v55, %v5232_v43  ;;  %v5264_v47 = vrot.slane %v5256_v6, %v7026_v35 }
 0x9f4   : > { %v5216_v44 = vcombine.low %v5208_v54, %v5215_v26  ;;  %v5293_v58 = vrot.slane %v5278_v25, %v7026_v35 }
 0x9f5   : > { %v5247_v13 = vrot.slane %v5240_v28, %v7026_v35  ;;  %v5279_v49 = vcombine.low %v5264_v47, %v5271_v63 }
 0x9f6   : > { %5341 = vst.msk [vmem:[%s7256_s0 + $0x8] sm:$0x1f] %vm5339_vm4, %v5216_v44 }
 0x9f7   : > { %v5255_v59 = vcombine.low %v5247_v13, %v5254_v50  ;;  %v5286_v40 = vrot.slane %v5279_v49, %v7026_v35 }
 0x9f9   : > { %v5294_v31 = vcombine.low %v5286_v40, %v5293_v58  ;;  %5342 = vst.msk [vmem:[%s7256_s0 + $0x10] sm:$0x1f] %vm5339_vm4, %v5255_v59 }
 0x9fb   : > { %5343 = vst.msk [vmem:[%s7256_s0 + $0x18] sm:$0x1f] %vm5339_vm4, %v5294_v31 }
 0x9fc PF: > { %s27_s24 = sadd.s32 1, %s5999_s24  }
 0x9fd   : > { %p24_p4 = scmp.ge.s32.totalorder %s27_s24, 4  }
 0x9ff   :  { %26 = sbr.rel (!%p24_p4) target bundleno = 3 (0x3), region = 146 }

</bundles_post_ra>
